<compile_context>
chip_gen: v6e
topology: v6e:2x2x1
jax: 0.10.0
libtpu: 0.0.40
codegen_flags: <defaults>
</compile_context>

<pallas_src>
import functools

import jax
import jax.numpy as jnp
from jax.experimental import pallas as pl
from jax.experimental.pallas import tpu as pltpu


def _erf_poly(x):
    # Abramowitz & Stegun 7.1.26, max abs error ~1.5e-7 (float32-accurate).
    a1, a2, a3, a4, a5 = 0.254829592, -0.284496736, 1.421413741, -1.453152027, 1.061405429
    p = 0.3275911
    sgn = jnp.where(x >= 0.0, 1.0, -1.0)
    ax = jnp.abs(x)
    den = 1.0 + p * ax
    # EUP approx reciprocal + one Newton step (full f32 accuracy, frees VPU).
    t = pl.reciprocal(den, approx=True)
    t = t * (2.0 - den * t)
    poly = ((((a5 * t + a4) * t + a3) * t + a2) * t + a1) * t
    return sgn * (1.0 - poly * jnp.exp(-ax * ax))


def _gelu_exact(x):
    # F.gelu default ('none'): 0.5 * x * (1 + erf(x / sqrt(2)))
    return 0.5 * x * (1.0 + _erf_poly(x * 0.7071067811865476))


def _ffn1_kernel(x_ref, mask_ref, w_in_ref, b_in_ref, k_dw_ref, b_dw_ref,
                 w_ca1_ref, b_ca1_ref, w_ca2_ref, b_ca2_ref,
                 w_out_ref, b_out_ref, o_ref, *, width):
    # Layouts (per batch item; channels on sublanes, flattened H*W on lanes):
    #   x_ref:   (Bblk, Cin, HW)
    #   mask_ref:(4, HW) f32  rows = [w>=1, w<=W-2, h>=1, h<=H-2]
    #   w_in:    (C2, Cin)   b_in: (C2, 1)
    #   k_dw:    (C2, 9)     b_dw: (C2, 1)   column j = (dh+1)*3 + (dw+1)
    #   w_ca1:   (Ch, Cr)    b_ca1:(1, Cr)
    #   w_ca2:   (Ch, Cr)    b_ca2:(Ch, 1)   (w_ca2 pre-transposed)
    #   w_out:   (Ch, 1)     b_out:(1, 1)
    #   o_ref:   (Bblk, Cin, HW)
    Bblk, Cin, HW = x_ref.shape
    C2 = k_dw_ref.shape[0]
    Ch = C2 // 2
    W = width

    # ---- batch-invariant loads, hoisted out of the per-batch loop ----------
    m_wl = mask_ref[0:1, :]                 # w >= 1      (valid left neighbour)
    m_wr = mask_ref[1:2, :]                 # w <= W - 2  (valid right neighbour)
    m_hu = mask_ref[2:3, :]                 # h >= 1      (valid upper neighbour)
    m_hd = mask_ref[3:4, :]                 # h <= H - 2  (valid lower neighbour)

    w_in_cols = [w_in_ref[:, c:c + 1] for c in range(Cin)]   # (C2, 1) each
    b_in = b_in_ref[...]                                      # (C2, 1)
    kc = [k_dw_ref[:, j:j + 1] for j in range(9)]             # (C2, 1) each
    b_dw = b_dw_ref[...]                                      # (C2, 1)
    w_ca1 = w_ca1_ref[...]
    b_ca1 = b_ca1_ref[...]
    w_ca2 = w_ca2_ref[...]
    b_ca2 = b_ca2_ref[...]
    w_out = w_out_ref[...]
    b_out = b_out_ref[...]

    for b in range(Bblk):                   # Bblk == 1 (grid path) or B (unrolled)
        x_b = x_ref[b].astype(jnp.float32)                       # (Cin, HW)

        # ---- project_in: 1x1 conv as Cin VPU FMAs ---------------------------
        t = b_in + w_in_cols[0] * x_b[0:1, :]
        for cin in range(1, Cin):
            t = t + w_in_cols[cin] * x_b[cin:cin + 1, :]
        # t: (C2, HW) f32

        # ---- 3x3 depthwise conv, stride 1, zero padding 1 -------------------
        # Horizontal pass: 2 lane rolls + w-border masks (float multiplies).
        t_l = pltpu.roll(t, 1, 1) * m_wl           # value at w-1 (tap dw = -1)
        t_r = pltpu.roll(t, HW - 1, 1) * m_wr      # value at w+1 (tap dw = +1)
        # Per-dh row sums (accumulated in vregs, no VMEM scratch).
        s_m1 = kc[0] * t_l + kc[1] * t + kc[2] * t_r     # dh = -1 row weights
        s_00 = kc[3] * t_l + kc[4] * t + kc[5] * t_r     # dh =  0 row weights
        s_p1 = kc[6] * t_l + kc[7] * t + kc[8] * t_r     # dh = +1 row weights
        # Vertical pass: 2 rolls by +/-W + h-border masks.
        d = s_00 + b_dw
        d = d + pltpu.roll(s_m1, W, 1) * m_hu            # from row h-1
        d = d + pltpu.roll(s_p1, HW - W, 1) * m_hd       # from row h+1

        x1 = d[:Ch, :]                                    # (Ch, HW)
        x2 = d[Ch:, :]                                    # (Ch, HW)

        # ---- CALayer(hidden, reduction=4): pool + 2 tiny layers + sigmoid ---
        pool = jnp.mean(x2, axis=1, keepdims=True)                       # (Ch, 1)
        z = jnp.sum(w_ca1 * pool, axis=0, keepdims=True) + b_ca1         # (1, Cr)
        z = jnp.maximum(z, 0.0)
        g = jnp.sum(w_ca2 * z, axis=1, keepdims=True) + b_ca2            # (Ch, 1)
        g = 1.0 / (1.0 + jnp.exp(-g))                                    # sigmoid (tiny)

        # ---- gelu(x1) * CA(x2) ----------------------------------------------
        u = _gelu_exact(x1) * (x2 * g)                                   # (Ch, HW)

        # ---- project_out (Cout = dim//2 = 1): multiply + sublane reduce ------
        p = jnp.sum(u * w_out, axis=0, keepdims=True) + b_out            # (1, HW)

        # ---- residual: 1 output channel broadcasts across dim input channels
        o_ref[b] = (p + x_b).astype(o_ref.dtype)


def feed_forward1(x_nchw, params):
    """x_nchw: (B, dim, H, W) float32 -> (B, dim, H, W). No boundary transposes."""
    (w_in, b_in, k_dw, b_dw, w_ca1, b_ca1, w_ca2, b_ca2, w_out, b_out) = params
    B, C, H, W = x_nchw.shape
    C2 = w_in.shape[1]
    Ch = C2 // 2
    Cr = w_ca1.shape[1]
    HW = H * W
    # The PyTorch module's `x + y` (dim//2 channels + dim channels) only
    # broadcasts when dim//2 == 1; make that explicit.
    assert C // 2 == 1, "FeedForward1 residual only broadcasts when dim//2 == 1"
    assert w_out.shape[1] == C // 2

    x_flat = x_nchw.reshape(B, C, HW)          # free: contiguous reshape, no transpose

    # Precomputed border masks as floats: one VPU multiply per masked tap.
    h_idx = jnp.repeat(jnp.arange(H, dtype=jnp.int32), W)     # (HW,)
    w_idx = jnp.tile(jnp.arange(W, dtype=jnp.int32), H)       # (HW,)
    masks = jnp.stack([w_idx >= 1, w_idx <= W - 2,
                       h_idx >= 1, h_idx <= H - 2], axis=0).astype(jnp.float32)  # (4, HW)

    # Tiny weight relayouts (outside the kernel; negligible bytes).
    w_in_k = jnp.transpose(w_in)                # (C2, Cin)
    b_in_k = b_in.reshape(C2, 1)
    k_dw_k = jnp.transpose(k_dw.reshape(9, C2))  # (C2, 9); column = (dh+1)*3 + (dw+1)
    b_dw_k = b_dw.reshape(C2, 1)
    b_ca1_k = b_ca1.reshape(1, Cr)
    w_ca2_k = jnp.transpose(w_ca2)               # (Ch, Cr)
    b_ca2_k = b_ca2.reshape(Ch, 1)
    b_out_k = b_out.reshape(1, 1)

    operands = (x_flat, masks, w_in_k, b_in_k, k_dw_k, b_dw_k,
                w_ca1, b_ca1_k, w_ca2_k, b_ca2_k, w_out, b_out_k)

    flops = B * HW * (C2 * 2 * C + C2 * 18 + Ch * 16 + 2 * Ch + C)
    bytes_accessed = 4 * (2 * B * C * HW + masks.size + w_in.size + b_in.size +
                          k_dw.size + b_dw.size + w_ca1.size + b_ca1.size +
                          w_ca2.size + b_ca2.size + w_out.size + b_out.size)
    cost = pl.CostEstimate(flops=flops,
                           transcendentals=B * HW * 2 * Ch,  # exp + recip in gelu
                           bytes_accessed=bytes_accessed)

    # v7x has 2 TensorCores per chip: shard the batch across them via a
    # parallel grid.  On v5e/v6e (1 TC) the grid would be pure sequential
    # overhead, so keep the batch unrolled inside a grid-less call.
    kind = jax.devices()[0].device_kind.lower()
    use_batch_grid = B > 1 and ("v7" in kind or "tpu7" in kind)

    # VMEM-budget guard: whole-image-in-VMEM needs ~(2*B*C + ~6*C2) * HW * 4 B.
    # Raise the scoped limit only when it actually grows (larger H*W would be
    # better served by an H-strip grid with a 1-row halo).
    approx_vmem = 4 * (2 * B * C * HW + 6 * C2 * HW)
    cp_kwargs = {}
    if use_batch_grid:
        cp_kwargs["dimension_semantics"] = ("parallel",)
    if approx_vmem > (12 << 20):
        cp_kwargs["vmem_limit_bytes"] = min(4 * approx_vmem, 96 << 20)
    compiler_params = pltpu.CompilerParams(**cp_kwargs) if cp_kwargs else None

    kernel_fn = functools.partial(_ffn1_kernel, width=W)
    call_kwargs = dict(out_shape=jax.ShapeDtypeStruct((B, C, HW), x_nchw.dtype),
                       cost_estimate=cost)
    if compiler_params is not None:
        call_kwargs["compiler_params"] = compiler_params

    if use_batch_grid:
        full = lambda i: (0, 0)
        call_kwargs["grid_spec"] = pltpu.PrefetchScalarGridSpec(
            num_scalar_prefetch=0,
            grid=(B,),
            in_specs=[
                pl.BlockSpec((1, C, HW), lambda i: (i, 0, 0)),   # x
                pl.BlockSpec((4, HW), full),                     # masks
                pl.BlockSpec((C2, C), full),                     # w_in
                pl.BlockSpec((C2, 1), full),                     # b_in
                pl.BlockSpec((C2, 9), full),                     # k_dw
                pl.BlockSpec((C2, 1), full),                     # b_dw
                pl.BlockSpec((Ch, Cr), full),                    # w_ca1
                pl.BlockSpec((1, Cr), full),                     # b_ca1
                pl.BlockSpec((Ch, Cr), full),                    # w_ca2
                pl.BlockSpec((Ch, 1), full),                     # b_ca2
                pl.BlockSpec((Ch, 1), full),                     # w_out
                pl.BlockSpec((1, 1), full),                      # b_out
            ],
            out_specs=pl.BlockSpec((1, C, HW), lambda i: (i, 0, 0)),
        )
    else:
        vmem_spec = pl.BlockSpec(memory_space=pltpu.MemorySpace.VMEM)
        call_kwargs["in_specs"] = [vmem_spec] * len(operands)
        call_kwargs["out_specs"] = vmem_spec

    out_flat = pl.pallas_call(kernel_fn, **call_kwargs)(*operands)
    return out_flat.reshape(B, C, H, W)        # free reshape back to NCHW


def init_params(key, dim, ffn_expansion_factor):
    """Deterministic synthetic parameters (PyTorch-style uniform fan-in init)."""
    hidden = int(dim * ffn_expansion_factor)
    C2 = hidden * 2
    red = 4  # CALayer(hidden_features, 4)
    ks = jax.random.split(key, 10)

    def u(k, shape, fan_in):
        bound = 1.0 / float(fan_in) ** 0.5
        return jax.random.uniform(k, shape, jnp.float32, -bound, bound)

    w_in = u(ks[0], (dim, C2), dim)            # 1x1 conv as (Cin, Cout)
    b_in = u(ks[1], (C2,), dim)
    k_dw = u(ks[2], (3, 3, C2), 9)             # depthwise 3x3, fan_in = 1*3*3
    b_dw = u(ks[3], (C2,), 9)
    w_ca1 = u(ks[4], (hidden, hidden // red), hidden)
    b_ca1 = u(ks[5], (hidden // red,), hidden)
    w_ca2 = u(ks[6], (hidden // red, hidden), hidden // red)
    b_ca2 = u(ks[7], (hidden,), hidden // red)
    w_out = u(ks[8], (hidden, dim // 2), hidden)
    b_out = u(ks[9], (dim // 2,), hidden)
    return (w_in, b_in, k_dw, b_dw, w_ca1, b_ca1, w_ca2, b_ca2, w_out, b_out)


def reference(x_nchw, params):
    """Pure-JAX (non-Pallas) reference with exact erf-GELU, NCHW end-to-end."""
    from jax.scipy.special import erf
    (w_in, b_in, k_dw, b_dw, w_ca1, b_ca1, w_ca2, b_ca2, w_out, b_out) = params
    x = x_nchw.astype(jnp.float32)
    B, C, H, W = x.shape
    C2 = w_in.shape[1]
    Ch = C2 // 2

    t = jnp.einsum('bchw,cd->bdhw', x, w_in) + b_in[None, :, None, None]
    tp = jnp.pad(t, ((0, 0), (0, 0), (1, 1), (1, 1)))
    d = jnp.zeros_like(t)
    for dh in range(3):
        for dw in range(3):
            d = d + tp[:, :, dh:dh + H, dw:dw + W] * k_dw[dh, dw][None, :, None, None]
    d = d + b_dw[None, :, None, None]

    x1, x2 = d[:, :Ch], d[:, Ch:]
    pool = jnp.mean(x2, axis=(2, 3))                       # (B, Ch)
    z = jnp.maximum(pool @ w_ca1 + b_ca1, 0.0)
    s = jax.nn.sigmoid(z @ w_ca2 + b_ca2)                  # (B, Ch)
    x2 = x2 * s[:, :, None, None]
    g = 0.5 * x1 * (1.0 + erf(x1 / jnp.sqrt(2.0)))
    u = g * x2
    p = jnp.einsum('bchw,co->bohw', u, w_out) + b_out[None, :, None, None]
    return p + x                                           # broadcast dim//2 -> dim


if __name__ == "__main__":
    # dim must satisfy dim // 2 == 1 for the module's residual add to broadcast.
    dim = 2
    ffn_expansion_factor = 16.0    # hidden = 32, hidden*2 = 64
    B, H, W = 2, 16, 16

    key = jax.random.PRNGKey(0)
    kx, kp = jax.random.split(key)
    x = jax.random.normal(kx, (B, dim, H, W), jnp.float32)
    params = init_params(kp, dim, ffn_expansion_factor)

    out = feed_forward1(x, params)
    out = jax.block_until_ready(out)

    ref = reference(x, params)
    assert out.shape == (B, dim, H, W), out.shape
    max_err = float(jnp.max(jnp.abs(out - ref)))
    assert max_err < 1e-3, f"max abs err {max_err}"
    print("KERNEL_OK")
</pallas_src>

<mosaic_0001>
module attributes {stable_mosaic.version = 11 : i64} {
  func.func @_ffn1_kernel(%arg0: memref<2x2x256xf32, #tpu.memory_space<vmem>>, %arg1: memref<4x256xf32, #tpu.memory_space<vmem>>, %arg2: memref<64x2xf32, #tpu.memory_space<vmem>>, %arg3: memref<64x1xf32, #tpu.memory_space<vmem>>, %arg4: memref<64x9xf32, #tpu.memory_space<vmem>>, %arg5: memref<64x1xf32, #tpu.memory_space<vmem>>, %arg6: memref<32x8xf32, #tpu.memory_space<vmem>>, %arg7: memref<1x8xf32, #tpu.memory_space<vmem>>, %arg8: memref<32x8xf32, #tpu.memory_space<vmem>>, %arg9: memref<32x1xf32, #tpu.memory_space<vmem>>, %arg10: memref<32x1xf32, #tpu.memory_space<vmem>>, %arg11: memref<1x1xf32, #tpu.memory_space<vmem>>, %arg12: memref<2x2x256xf32, #tpu.memory_space<vmem>>) attributes {dimension_semantics = [], scalar_prefetch = 0 : i64, scratch_operands = 0 : i64, tpu.core_type = #tpu.core_type<tc>} {
    %c0 = arith.constant 0 : index
    %c0_0 = arith.constant 0 : index
    %0 = vector.load %arg1[%c0, %c0_0] : memref<4x256xf32, #tpu.memory_space<vmem>>, vector<1x256xf32>
    %c1 = arith.constant 1 : index
    %c0_1 = arith.constant 0 : index
    %1 = vector.load %arg1[%c1, %c0_1] : memref<4x256xf32, #tpu.memory_space<vmem>>, vector<1x256xf32>
    %c2 = arith.constant 2 : index
    %c0_2 = arith.constant 0 : index
    %2 = vector.load %arg1[%c2, %c0_2] : memref<4x256xf32, #tpu.memory_space<vmem>>, vector<1x256xf32>
    %c3 = arith.constant 3 : index
    %c0_3 = arith.constant 0 : index
    %3 = vector.load %arg1[%c3, %c0_3] : memref<4x256xf32, #tpu.memory_space<vmem>>, vector<1x256xf32>
    %c0_4 = arith.constant 0 : index
    %c0_5 = arith.constant 0 : index
    %4 = vector.load %arg2[%c0_4, %c0_5] : memref<64x2xf32, #tpu.memory_space<vmem>>, vector<64x1xf32>
    %c0_6 = arith.constant 0 : index
    %c1_7 = arith.constant 1 : index
    %5 = vector.load %arg2[%c0_6, %c1_7] : memref<64x2xf32, #tpu.memory_space<vmem>>, vector<64x1xf32>
    %c0_8 = arith.constant 0 : index
    %c0_9 = arith.constant 0 : index
    %6 = vector.load %arg3[%c0_8, %c0_9] : memref<64x1xf32, #tpu.memory_space<vmem>>, vector<64x1xf32>
    %c0_10 = arith.constant 0 : index
    %c0_11 = arith.constant 0 : index
    %7 = vector.load %arg4[%c0_10, %c0_11] : memref<64x9xf32, #tpu.memory_space<vmem>>, vector<64x1xf32>
    %c0_12 = arith.constant 0 : index
    %c1_13 = arith.constant 1 : index
    %8 = vector.load %arg4[%c0_12, %c1_13] : memref<64x9xf32, #tpu.memory_space<vmem>>, vector<64x1xf32>
    %c0_14 = arith.constant 0 : index
    %c2_15 = arith.constant 2 : index
    %9 = vector.load %arg4[%c0_14, %c2_15] : memref<64x9xf32, #tpu.memory_space<vmem>>, vector<64x1xf32>
    %c0_16 = arith.constant 0 : index
    %c3_17 = arith.constant 3 : index
    %10 = vector.load %arg4[%c0_16, %c3_17] : memref<64x9xf32, #tpu.memory_space<vmem>>, vector<64x1xf32>
    %c0_18 = arith.constant 0 : index
    %c4 = arith.constant 4 : index
    %11 = vector.load %arg4[%c0_18, %c4] : memref<64x9xf32, #tpu.memory_space<vmem>>, vector<64x1xf32>
    %c0_19 = arith.constant 0 : index
    %c5 = arith.constant 5 : index
    %12 = vector.load %arg4[%c0_19, %c5] : memref<64x9xf32, #tpu.memory_space<vmem>>, vector<64x1xf32>
    %c0_20 = arith.constant 0 : index
    %c6 = arith.constant 6 : index
    %13 = vector.load %arg4[%c0_20, %c6] : memref<64x9xf32, #tpu.memory_space<vmem>>, vector<64x1xf32>
    %c0_21 = arith.constant 0 : index
    %c7 = arith.constant 7 : index
    %14 = vector.load %arg4[%c0_21, %c7] : memref<64x9xf32, #tpu.memory_space<vmem>>, vector<64x1xf32>
    %c0_22 = arith.constant 0 : index
    %c8 = arith.constant 8 : index
    %15 = vector.load %arg4[%c0_22, %c8] : memref<64x9xf32, #tpu.memory_space<vmem>>, vector<64x1xf32>
    %c0_23 = arith.constant 0 : index
    %c0_24 = arith.constant 0 : index
    %16 = vector.load %arg5[%c0_23, %c0_24] : memref<64x1xf32, #tpu.memory_space<vmem>>, vector<64x1xf32>
    %c0_25 = arith.constant 0 : index
    %c0_26 = arith.constant 0 : index
    %17 = vector.load %arg6[%c0_25, %c0_26] : memref<32x8xf32, #tpu.memory_space<vmem>>, vector<32x8xf32>
    %c0_27 = arith.constant 0 : index
    %c0_28 = arith.constant 0 : index
    %18 = vector.load %arg7[%c0_27, %c0_28] : memref<1x8xf32, #tpu.memory_space<vmem>>, vector<1x8xf32>
    %c0_29 = arith.constant 0 : index
    %c0_30 = arith.constant 0 : index
    %19 = vector.load %arg8[%c0_29, %c0_30] : memref<32x8xf32, #tpu.memory_space<vmem>>, vector<32x8xf32>
    %c0_31 = arith.constant 0 : index
    %c0_32 = arith.constant 0 : index
    %20 = vector.load %arg9[%c0_31, %c0_32] : memref<32x1xf32, #tpu.memory_space<vmem>>, vector<32x1xf32>
    %c0_33 = arith.constant 0 : index
    %c0_34 = arith.constant 0 : index
    %21 = vector.load %arg10[%c0_33, %c0_34] : memref<32x1xf32, #tpu.memory_space<vmem>>, vector<32x1xf32>
    %c0_35 = arith.constant 0 : index
    %c0_36 = arith.constant 0 : index
    %22 = vector.load %arg11[%c0_35, %c0_36] : memref<1x1xf32, #tpu.memory_space<vmem>>, vector<1x1xf32>
    %c0_37 = arith.constant 0 : index
    %c0_38 = arith.constant 0 : index
    %c0_39 = arith.constant 0 : index
    %23 = vector.load %arg0[%c0_37, %c0_38, %c0_39] : memref<2x2x256xf32, #tpu.memory_space<vmem>>, vector<1x2x256xf32>
    %24 = vector.shape_cast %23 : vector<1x2x256xf32> to vector<2x256xf32>
    %25 = vector.extract_strided_slice %24 {offsets = [0, 0], sizes = [1, 256], strides = [1, 1]} : vector<2x256xf32> to vector<1x256xf32>
    %26 = vector.broadcast %4 : vector<64x1xf32> to vector<64x256xf32>
    %27 = vector.broadcast %25 : vector<1x256xf32> to vector<64x256xf32>
    %28 = arith.mulf %26, %27 : vector<64x256xf32>
    %29 = vector.broadcast %6 : vector<64x1xf32> to vector<64x256xf32>
    %30 = arith.addf %29, %28 : vector<64x256xf32>
    %31 = vector.extract_strided_slice %24 {offsets = [1, 0], sizes = [1, 256], strides = [1, 1]} : vector<2x256xf32> to vector<1x256xf32>
    %32 = vector.broadcast %5 : vector<64x1xf32> to vector<64x256xf32>
    %33 = vector.broadcast %31 : vector<1x256xf32> to vector<64x256xf32>
    %34 = arith.mulf %32, %33 : vector<64x256xf32>
    %35 = arith.addf %30, %34 : vector<64x256xf32>
    %c1_i32 = arith.constant 1 : i32
    %36 = tpu.dynamic_rotate %35 by %c1_i32 dim 1 : vector<64x256xf32>, i32 -> vector<64x256xf32>
    %37 = vector.broadcast %0 : vector<1x256xf32> to vector<64x256xf32>
    %38 = arith.mulf %36, %37 : vector<64x256xf32>
    %c255_i32 = arith.constant 255 : i32
    %39 = tpu.dynamic_rotate %35 by %c255_i32 dim 1 : vector<64x256xf32>, i32 -> vector<64x256xf32>
    %40 = vector.broadcast %1 : vector<1x256xf32> to vector<64x256xf32>
    %41 = arith.mulf %39, %40 : vector<64x256xf32>
    %42 = vector.broadcast %7 : vector<64x1xf32> to vector<64x256xf32>
    %43 = arith.mulf %42, %38 : vector<64x256xf32>
    %44 = vector.broadcast %8 : vector<64x1xf32> to vector<64x256xf32>
    %45 = arith.mulf %44, %35 : vector<64x256xf32>
    %46 = arith.addf %43, %45 : vector<64x256xf32>
    %47 = vector.broadcast %9 : vector<64x1xf32> to vector<64x256xf32>
    %48 = arith.mulf %47, %41 : vector<64x256xf32>
    %49 = arith.addf %46, %48 : vector<64x256xf32>
    %50 = vector.broadcast %10 : vector<64x1xf32> to vector<64x256xf32>
    %51 = arith.mulf %50, %38 : vector<64x256xf32>
    %52 = vector.broadcast %11 : vector<64x1xf32> to vector<64x256xf32>
    %53 = arith.mulf %52, %35 : vector<64x256xf32>
    %54 = arith.addf %51, %53 : vector<64x256xf32>
    %55 = vector.broadcast %12 : vector<64x1xf32> to vector<64x256xf32>
    %56 = arith.mulf %55, %41 : vector<64x256xf32>
    %57 = arith.addf %54, %56 : vector<64x256xf32>
    %58 = vector.broadcast %13 : vector<64x1xf32> to vector<64x256xf32>
    %59 = arith.mulf %58, %38 : vector<64x256xf32>
    %60 = vector.broadcast %14 : vector<64x1xf32> to vector<64x256xf32>
    %61 = arith.mulf %60, %35 : vector<64x256xf32>
    %62 = arith.addf %59, %61 : vector<64x256xf32>
    %63 = vector.broadcast %15 : vector<64x1xf32> to vector<64x256xf32>
    %64 = arith.mulf %63, %41 : vector<64x256xf32>
    %65 = arith.addf %62, %64 : vector<64x256xf32>
    %66 = vector.broadcast %16 : vector<64x1xf32> to vector<64x256xf32>
    %67 = arith.addf %57, %66 : vector<64x256xf32>
    %c16_i32 = arith.constant 16 : i32
    %68 = tpu.dynamic_rotate %49 by %c16_i32 dim 1 : vector<64x256xf32>, i32 -> vector<64x256xf32>
    %69 = vector.broadcast %2 : vector<1x256xf32> to vector<64x256xf32>
    %70 = arith.mulf %68, %69 : vector<64x256xf32>
    %71 = arith.addf %67, %70 : vector<64x256xf32>
    %c240_i32 = arith.constant 240 : i32
    %72 = tpu.dynamic_rotate %65 by %c240_i32 dim 1 : vector<64x256xf32>, i32 -> vector<64x256xf32>
    %73 = vector.broadcast %3 : vector<1x256xf32> to vector<64x256xf32>
    %74 = arith.mulf %72, %73 : vector<64x256xf32>
    %75 = arith.addf %71, %74 : vector<64x256xf32>
    %76 = vector.extract_strided_slice %75 {offsets = [0, 0], sizes = [32, 256], strides = [1, 1]} : vector<64x256xf32> to vector<32x256xf32>
    %77 = vector.extract_strided_slice %75 {offsets = [32, 0], sizes = [32, 256], strides = [1, 1]} : vector<64x256xf32> to vector<32x256xf32>
    %cst = arith.constant dense<0.000000e+00> : vector<32xf32>
    %78 = vector.multi_reduction <add>, %77, %cst [1] : vector<32x256xf32> to vector<32xf32>
    %79 = vector.shape_cast %78 : vector<32xf32> to vector<32x1xf32>
    %cst_40 = arith.constant 2.560000e+02 : f32
    %80 = vector.broadcast %cst_40 : f32 to vector<32x1xf32>
    %81 = arith.divf %79, %80 : vector<32x1xf32>
    %82 = vector.broadcast %81 : vector<32x1xf32> to vector<32x8xf32>
    %83 = arith.mulf %17, %82 : vector<32x8xf32>
    %cst_41 = arith.constant dense<0.000000e+00> : vector<8xf32>
    %84 = vector.multi_reduction <add>, %83, %cst_41 [0] : vector<32x8xf32> to vector<8xf32>
    %85 = vector.shape_cast %84 : vector<8xf32> to vector<1x8xf32>
    %86 = arith.addf %85, %18 : vector<1x8xf32>
    %cst_42 = arith.constant 0.000000e+00 : f32
    %87 = vector.broadcast %cst_42 : f32 to vector<1x8xf32>
    %88 = arith.maximumf %86, %87 : vector<1x8xf32>
    %89 = vector.broadcast %88 : vector<1x8xf32> to vector<32x8xf32>
    %90 = arith.mulf %19, %89 : vector<32x8xf32>
    %cst_43 = arith.constant dense<0.000000e+00> : vector<32xf32>
    %91 = vector.multi_reduction <add>, %90, %cst_43 [1] : vector<32x8xf32> to vector<32xf32>
    %92 = vector.shape_cast %91 : vector<32xf32> to vector<32x1xf32>
    %93 = arith.addf %92, %20 : vector<32x1xf32>
    %cst_44 = arith.constant 0.000000e+00 : f32
    %94 = vector.broadcast %cst_44 : f32 to vector<32x1xf32>
    %95 = arith.subf %94, %93 : vector<32x1xf32>
    %96 = math.exp %95 : vector<32x1xf32>
    %cst_45 = arith.constant 1.000000e+00 : f32
    %97 = vector.broadcast %cst_45 : f32 to vector<32x1xf32>
    %98 = arith.addf %97, %96 : vector<32x1xf32>
    %cst_46 = arith.constant 1.000000e+00 : f32
    %99 = vector.broadcast %cst_46 : f32 to vector<32x1xf32>
    %100 = arith.divf %99, %98 : vector<32x1xf32>
    %cst_47 = arith.constant 5.000000e-01 : f32
    %101 = vector.broadcast %cst_47 : f32 to vector<32x256xf32>
    %102 = arith.mulf %101, %76 : vector<32x256xf32>
    %cst_48 = arith.constant 0.707106769 : f32
    %103 = vector.broadcast %cst_48 : f32 to vector<32x256xf32>
    %104 = arith.mulf %76, %103 : vector<32x256xf32>
    %cst_49 = arith.constant 0.000000e+00 : f32
    %105 = vector.broadcast %cst_49 : f32 to vector<32x256xf32>
    %106 = arith.cmpf oge, %104, %105 : vector<32x256xf32>
    %cst_50 = arith.constant 1.000000e+00 : f32
    %cst_51 = arith.constant -1.000000e+00 : f32
    %107 = vector.broadcast %cst_50 : f32 to vector<32x256xf32>
    %108 = vector.broadcast %cst_51 : f32 to vector<32x256xf32>
    %109 = arith.select %106, %107, %108 : vector<32x256xi1>, vector<32x256xf32>
    %110 = math.absf %104 : vector<32x256xf32>
    %cst_52 = arith.constant 0.327591091 : f32
    %111 = vector.broadcast %cst_52 : f32 to vector<32x256xf32>
    %112 = arith.mulf %111, %110 : vector<32x256xf32>
    %cst_53 = arith.constant 1.000000e+00 : f32
    %113 = vector.broadcast %cst_53 : f32 to vector<32x256xf32>
    %114 = arith.addf %113, %112 : vector<32x256xf32>
    %115 = tpu.reciprocal %114 {approx = true} : vector<32x256xf32> -> vector<32x256xf32>
    %116 = arith.mulf %114, %115 : vector<32x256xf32>
    %cst_54 = arith.constant 2.000000e+00 : f32
    %117 = vector.broadcast %cst_54 : f32 to vector<32x256xf32>
    %118 = arith.subf %117, %116 : vector<32x256xf32>
    %119 = arith.mulf %115, %118 : vector<32x256xf32>
    %cst_55 = arith.constant 1.06140542 : f32
    %120 = vector.broadcast %cst_55 : f32 to vector<32x256xf32>
    %121 = arith.mulf %120, %119 : vector<32x256xf32>
    %cst_56 = arith.constant -1.45315206 : f32
    %122 = vector.broadcast %cst_56 : f32 to vector<32x256xf32>
    %123 = arith.addf %121, %122 : vector<32x256xf32>
    %124 = arith.mulf %123, %119 : vector<32x256xf32>
    %cst_57 = arith.constant 1.42141378 : f32
    %125 = vector.broadcast %cst_57 : f32 to vector<32x256xf32>
    %126 = arith.addf %124, %125 : vector<32x256xf32>
    %127 = arith.mulf %126, %119 : vector<32x256xf32>
    %cst_58 = arith.constant -0.284496725 : f32
    %128 = vector.broadcast %cst_58 : f32 to vector<32x256xf32>
    %129 = arith.addf %127, %128 : vector<32x256xf32>
    %130 = arith.mulf %129, %119 : vector<32x256xf32>
    %cst_59 = arith.constant 0.254829586 : f32
    %131 = vector.broadcast %cst_59 : f32 to vector<32x256xf32>
    %132 = arith.addf %130, %131 : vector<32x256xf32>
    %133 = arith.mulf %132, %119 : vector<32x256xf32>
    %cst_60 = arith.constant 0.000000e+00 : f32
    %134 = vector.broadcast %cst_60 : f32 to vector<32x256xf32>
    %135 = arith.subf %134, %110 : vector<32x256xf32>
    %136 = arith.mulf %135, %110 : vector<32x256xf32>
    %137 = math.exp %136 : vector<32x256xf32>
    %138 = arith.mulf %133, %137 : vector<32x256xf32>
    %cst_61 = arith.constant 1.000000e+00 : f32
    %139 = vector.broadcast %cst_61 : f32 to vector<32x256xf32>
    %140 = arith.subf %139, %138 : vector<32x256xf32>
    %141 = arith.mulf %109, %140 : vector<32x256xf32>
    %cst_62 = arith.constant 1.000000e+00 : f32
    %142 = vector.broadcast %cst_62 : f32 to vector<32x256xf32>
    %143 = arith.addf %142, %141 : vector<32x256xf32>
    %144 = arith.mulf %102, %143 : vector<32x256xf32>
    %145 = vector.broadcast %100 : vector<32x1xf32> to vector<32x256xf32>
    %146 = arith.mulf %77, %145 : vector<32x256xf32>
    %147 = arith.mulf %144, %146 : vector<32x256xf32>
    %148 = vector.broadcast %21 : vector<32x1xf32> to vector<32x256xf32>
    %149 = arith.mulf %147, %148 : vector<32x256xf32>
    %cst_63 = arith.constant dense<0.000000e+00> : vector<256xf32>
    %150 = vector.multi_reduction <add>, %149, %cst_63 [0] : vector<32x256xf32> to vector<256xf32>
    %151 = vector.shape_cast %150 : vector<256xf32> to vector<1x256xf32>
    %152 = vector.broadcast %22 : vector<1x1xf32> to vector<1x256xf32>
    %153 = arith.addf %151, %152 : vector<1x256xf32>
    %154 = vector.broadcast %153 : vector<1x256xf32> to vector<2x256xf32>
    %155 = arith.addf %154, %24 : vector<2x256xf32>
    %c0_64 = arith.constant 0 : index
    %c0_65 = arith.constant 0 : index
    %c0_66 = arith.constant 0 : index
    %156 = vector.load %arg12[%c0_64, %c0_65, %c0_66] : memref<2x2x256xf32, #tpu.memory_space<vmem>>, vector<1x2x256xf32>
    %157 = vector.shape_cast %156 : vector<1x2x256xf32> to vector<2x256xf32>
    %158 = vector.shape_cast %155 : vector<2x256xf32> to vector<1x2x256xf32>
    tpu.vector_store %arg12[%c0_64, %c0_65, %c0_66], %158 {strides = array<i32>} : memref<2x2x256xf32, #tpu.memory_space<vmem>>, vector<1x2x256xf32>,
    %c1_67 = arith.constant 1 : index
    %c0_68 = arith.constant 0 : index
    %c0_69 = arith.constant 0 : index
    %159 = vector.load %arg0[%c1_67, %c0_68, %c0_69] : memref<2x2x256xf32, #tpu.memory_space<vmem>>, vector<1x2x256xf32>
    %160 = vector.shape_cast %159 : vector<1x2x256xf32> to vector<2x256xf32>
    %161 = vector.extract_strided_slice %160 {offsets = [0, 0], sizes = [1, 256], strides = [1, 1]} : vector<2x256xf32> to vector<1x256xf32>
    %162 = vector.broadcast %4 : vector<64x1xf32> to vector<64x256xf32>
    %163 = vector.broadcast %161 : vector<1x256xf32> to vector<64x256xf32>
    %164 = arith.mulf %162, %163 : vector<64x256xf32>
    %165 = vector.broadcast %6 : vector<64x1xf32> to vector<64x256xf32>
    %166 = arith.addf %165, %164 : vector<64x256xf32>
    %167 = vector.extract_strided_slice %160 {offsets = [1, 0], sizes = [1, 256], strides = [1, 1]} : vector<2x256xf32> to vector<1x256xf32>
    %168 = vector.broadcast %5 : vector<64x1xf32> to vector<64x256xf32>
    %169 = vector.broadcast %167 : vector<1x256xf32> to vector<64x256xf32>
    %170 = arith.mulf %168, %169 : vector<64x256xf32>
    %171 = arith.addf %166, %170 : vector<64x256xf32>
    %c1_i32_70 = arith.constant 1 : i32
    %172 = tpu.dynamic_rotate %171 by %c1_i32_70 dim 1 : vector<64x256xf32>, i32 -> vector<64x256xf32>
    %173 = vector.broadcast %0 : vector<1x256xf32> to vector<64x256xf32>
    %174 = arith.mulf %172, %173 : vector<64x256xf32>
    %c255_i32_71 = arith.constant 255 : i32
    %175 = tpu.dynamic_rotate %171 by %c255_i32_71 dim 1 : vector<64x256xf32>, i32 -> vector<64x256xf32>
    %176 = vector.broadcast %1 : vector<1x256xf32> to vector<64x256xf32>
    %177 = arith.mulf %175, %176 : vector<64x256xf32>
    %178 = vector.broadcast %7 : vector<64x1xf32> to vector<64x256xf32>
    %179 = arith.mulf %178, %174 : vector<64x256xf32>
    %180 = vector.broadcast %8 : vector<64x1xf32> to vector<64x256xf32>
    %181 = arith.mulf %180, %171 : vector<64x256xf32>
    %182 = arith.addf %179, %181 : vector<64x256xf32>
    %183 = vector.broadcast %9 : vector<64x1xf32> to vector<64x256xf32>
    %184 = arith.mulf %183, %177 : vector<64x256xf32>
    %185 = arith.addf %182, %184 : vector<64x256xf32>
    %186 = vector.broadcast %10 : vector<64x1xf32> to vector<64x256xf32>
    %187 = arith.mulf %186, %174 : vector<64x256xf32>
    %188 = vector.broadcast %11 : vector<64x1xf32> to vector<64x256xf32>
    %189 = arith.mulf %188, %171 : vector<64x256xf32>
    %190 = arith.addf %187, %189 : vector<64x256xf32>
    %191 = vector.broadcast %12 : vector<64x1xf32> to vector<64x256xf32>
    %192 = arith.mulf %191, %177 : vector<64x256xf32>
    %193 = arith.addf %190, %192 : vector<64x256xf32>
    %194 = vector.broadcast %13 : vector<64x1xf32> to vector<64x256xf32>
    %195 = arith.mulf %194, %174 : vector<64x256xf32>
    %196 = vector.broadcast %14 : vector<64x1xf32> to vector<64x256xf32>
    %197 = arith.mulf %196, %171 : vector<64x256xf32>
    %198 = arith.addf %195, %197 : vector<64x256xf32>
    %199 = vector.broadcast %15 : vector<64x1xf32> to vector<64x256xf32>
    %200 = arith.mulf %199, %177 : vector<64x256xf32>
    %201 = arith.addf %198, %200 : vector<64x256xf32>
    %202 = vector.broadcast %16 : vector<64x1xf32> to vector<64x256xf32>
    %203 = arith.addf %193, %202 : vector<64x256xf32>
    %c16_i32_72 = arith.constant 16 : i32
    %204 = tpu.dynamic_rotate %185 by %c16_i32_72 dim 1 : vector<64x256xf32>, i32 -> vector<64x256xf32>
    %205 = vector.broadcast %2 : vector<1x256xf32> to vector<64x256xf32>
    %206 = arith.mulf %204, %205 : vector<64x256xf32>
    %207 = arith.addf %203, %206 : vector<64x256xf32>
    %c240_i32_73 = arith.constant 240 : i32
    %208 = tpu.dynamic_rotate %201 by %c240_i32_73 dim 1 : vector<64x256xf32>, i32 -> vector<64x256xf32>
    %209 = vector.broadcast %3 : vector<1x256xf32> to vector<64x256xf32>
    %210 = arith.mulf %208, %209 : vector<64x256xf32>
    %211 = arith.addf %207, %210 : vector<64x256xf32>
    %212 = vector.extract_strided_slice %211 {offsets = [0, 0], sizes = [32, 256], strides = [1, 1]} : vector<64x256xf32> to vector<32x256xf32>
    %213 = vector.extract_strided_slice %211 {offsets = [32, 0], sizes = [32, 256], strides = [1, 1]} : vector<64x256xf32> to vector<32x256xf32>
    %cst_74 = arith.constant dense<0.000000e+00> : vector<32xf32>
    %214 = vector.multi_reduction <add>, %213, %cst_74 [1] : vector<32x256xf32> to vector<32xf32>
    %215 = vector.shape_cast %214 : vector<32xf32> to vector<32x1xf32>
    %cst_75 = arith.constant 2.560000e+02 : f32
    %216 = vector.broadcast %cst_75 : f32 to vector<32x1xf32>
    %217 = arith.divf %215, %216 : vector<32x1xf32>
    %218 = vector.broadcast %217 : vector<32x1xf32> to vector<32x8xf32>
    %219 = arith.mulf %17, %218 : vector<32x8xf32>
    %cst_76 = arith.constant dense<0.000000e+00> : vector<8xf32>
    %220 = vector.multi_reduction <add>, %219, %cst_76 [0] : vector<32x8xf32> to vector<8xf32>
    %221 = vector.shape_cast %220 : vector<8xf32> to vector<1x8xf32>
    %222 = arith.addf %221, %18 : vector<1x8xf32>
    %cst_77 = arith.constant 0.000000e+00 : f32
    %223 = vector.broadcast %cst_77 : f32 to vector<1x8xf32>
    %224 = arith.maximumf %222, %223 : vector<1x8xf32>
    %225 = vector.broadcast %224 : vector<1x8xf32> to vector<32x8xf32>
    %226 = arith.mulf %19, %225 : vector<32x8xf32>
    %cst_78 = arith.constant dense<0.000000e+00> : vector<32xf32>
    %227 = vector.multi_reduction <add>, %226, %cst_78 [1] : vector<32x8xf32> to vector<32xf32>
    %228 = vector.shape_cast %227 : vector<32xf32> to vector<32x1xf32>
    %229 = arith.addf %228, %20 : vector<32x1xf32>
    %cst_79 = arith.constant 0.000000e+00 : f32
    %230 = vector.broadcast %cst_79 : f32 to vector<32x1xf32>
    %231 = arith.subf %230, %229 : vector<32x1xf32>
    %232 = math.exp %231 : vector<32x1xf32>
    %cst_80 = arith.constant 1.000000e+00 : f32
    %233 = vector.broadcast %cst_80 : f32 to vector<32x1xf32>
    %234 = arith.addf %233, %232 : vector<32x1xf32>
    %cst_81 = arith.constant 1.000000e+00 : f32
    %235 = vector.broadcast %cst_81 : f32 to vector<32x1xf32>
    %236 = arith.divf %235, %234 : vector<32x1xf32>
    %cst_82 = arith.constant 5.000000e-01 : f32
    %237 = vector.broadcast %cst_82 : f32 to vector<32x256xf32>
    %238 = arith.mulf %237, %212 : vector<32x256xf32>
    %cst_83 = arith.constant 0.707106769 : f32
    %239 = vector.broadcast %cst_83 : f32 to vector<32x256xf32>
    %240 = arith.mulf %212, %239 : vector<32x256xf32>
    %cst_84 = arith.constant 0.000000e+00 : f32
    %241 = vector.broadcast %cst_84 : f32 to vector<32x256xf32>
    %242 = arith.cmpf oge, %240, %241 : vector<32x256xf32>
    %cst_85 = arith.constant 1.000000e+00 : f32
    %cst_86 = arith.constant -1.000000e+00 : f32
    %243 = vector.broadcast %cst_85 : f32 to vector<32x256xf32>
    %244 = vector.broadcast %cst_86 : f32 to vector<32x256xf32>
    %245 = arith.select %242, %243, %244 : vector<32x256xi1>, vector<32x256xf32>
    %246 = math.absf %240 : vector<32x256xf32>
    %cst_87 = arith.constant 0.327591091 : f32
    %247 = vector.broadcast %cst_87 : f32 to vector<32x256xf32>
    %248 = arith.mulf %247, %246 : vector<32x256xf32>
    %cst_88 = arith.constant 1.000000e+00 : f32
    %249 = vector.broadcast %cst_88 : f32 to vector<32x256xf32>
    %250 = arith.addf %249, %248 : vector<32x256xf32>
    %251 = tpu.reciprocal %250 {approx = true} : vector<32x256xf32> -> vector<32x256xf32>
    %252 = arith.mulf %250, %251 : vector<32x256xf32>
    %cst_89 = arith.constant 2.000000e+00 : f32
    %253 = vector.broadcast %cst_89 : f32 to vector<32x256xf32>
    %254 = arith.subf %253, %252 : vector<32x256xf32>
    %255 = arith.mulf %251, %254 : vector<32x256xf32>
    %cst_90 = arith.constant 1.06140542 : f32
    %256 = vector.broadcast %cst_90 : f32 to vector<32x256xf32>
    %257 = arith.mulf %256, %255 : vector<32x256xf32>
    %cst_91 = arith.constant -1.45315206 : f32
    %258 = vector.broadcast %cst_91 : f32 to vector<32x256xf32>
    %259 = arith.addf %257, %258 : vector<32x256xf32>
    %260 = arith.mulf %259, %255 : vector<32x256xf32>
    %cst_92 = arith.constant 1.42141378 : f32
    %261 = vector.broadcast %cst_92 : f32 to vector<32x256xf32>
    %262 = arith.addf %260, %261 : vector<32x256xf32>
    %263 = arith.mulf %262, %255 : vector<32x256xf32>
    %cst_93 = arith.constant -0.284496725 : f32
    %264 = vector.broadcast %cst_93 : f32 to vector<32x256xf32>
    %265 = arith.addf %263, %264 : vector<32x256xf32>
    %266 = arith.mulf %265, %255 : vector<32x256xf32>
    %cst_94 = arith.constant 0.254829586 : f32
    %267 = vector.broadcast %cst_94 : f32 to vector<32x256xf32>
    %268 = arith.addf %266, %267 : vector<32x256xf32>
    %269 = arith.mulf %268, %255 : vector<32x256xf32>
    %cst_95 = arith.constant 0.000000e+00 : f32
    %270 = vector.broadcast %cst_95 : f32 to vector<32x256xf32>
    %271 = arith.subf %270, %246 : vector<32x256xf32>
    %272 = arith.mulf %271, %246 : vector<32x256xf32>
    %273 = math.exp %272 : vector<32x256xf32>
    %274 = arith.mulf %269, %273 : vector<32x256xf32>
    %cst_96 = arith.constant 1.000000e+00 : f32
    %275 = vector.broadcast %cst_96 : f32 to vector<32x256xf32>
    %276 = arith.subf %275, %274 : vector<32x256xf32>
    %277 = arith.mulf %245, %276 : vector<32x256xf32>
    %cst_97 = arith.constant 1.000000e+00 : f32
    %278 = vector.broadcast %cst_97 : f32 to vector<32x256xf32>
    %279 = arith.addf %278, %277 : vector<32x256xf32>
    %280 = arith.mulf %238, %279 : vector<32x256xf32>
    %281 = vector.broadcast %236 : vector<32x1xf32> to vector<32x256xf32>
    %282 = arith.mulf %213, %281 : vector<32x256xf32>
    %283 = arith.mulf %280, %282 : vector<32x256xf32>
    %284 = vector.broadcast %21 : vector<32x1xf32> to vector<32x256xf32>
    %285 = arith.mulf %283, %284 : vector<32x256xf32>
    %cst_98 = arith.constant dense<0.000000e+00> : vector<256xf32>
    %286 = vector.multi_reduction <add>, %285, %cst_98 [0] : vector<32x256xf32> to vector<256xf32>
    %287 = vector.shape_cast %286 : vector<256xf32> to vector<1x256xf32>
    %288 = vector.broadcast %22 : vector<1x1xf32> to vector<1x256xf32>
    %289 = arith.addf %287, %288 : vector<1x256xf32>
    %290 = vector.broadcast %289 : vector<1x256xf32> to vector<2x256xf32>
    %291 = arith.addf %290, %160 : vector<2x256xf32>
    %c1_99 = arith.constant 1 : index
    %c0_100 = arith.constant 0 : index
    %c0_101 = arith.constant 0 : index
    %292 = vector.load %arg12[%c1_99, %c0_100, %c0_101] : memref<2x2x256xf32, #tpu.memory_space<vmem>>, vector<1x2x256xf32>
    %293 = vector.shape_cast %292 : vector<1x2x256xf32> to vector<2x256xf32>
    %294 = vector.shape_cast %291 : vector<2x256xf32> to vector<1x2x256xf32>
    tpu.vector_store %arg12[%c1_99, %c0_100, %c0_101], %294 {strides = array<i32>} : memref<2x2x256xf32, #tpu.memory_space<vmem>>, vector<1x2x256xf32>,
    return
  }
}

</mosaic_0001>

<bundles_post_ra>
// kernel: tpu_custom_call.1
= control target key start
LH: loop header
LB: loop body
LE: loop exit
PB: predicated region body
PF: predicated region fallthrough
CT: control target
= control target key end

     0   :  { %s6028_s0 = inlined_call_operand.vmem [shape: f32[2,2,256], index: 0, kind: input, shape index: {}]   ;;  %s6029_s1 = inlined_call_operand.vmem [shape: f32[4,256], index: 1, kind: input, shape index: {}]   ;;  %s6030_s2 = inlined_call_operand.vmem [shape: f32[64,2], index: 2, kind: input, shape index: {}]   ;;  %s6031_s3 = inlined_call_operand.vmem [shape: f32[64,1], index: 3, kind: input, shape index: {}]   ;;  %s6032_s4 = inlined_call_operand.vmem [shape: f32[64,9], index: 4, kind: input, shape index: {}]   ;;  %s6033_s5 = inlined_call_operand.vmem [shape: f32[64,1], index: 5, kind: input, shape index: {}]   ;;  %s6034_s6 = inlined_call_operand.vmem [shape: f32[32,8], index: 6, kind: input, shape index: {}]   ;;  %s6035_s7 = inlined_call_operand.vmem [shape: f32[1,8], index: 7, kind: input, shape index: {}]   ;;  %s6036_s8 = inlined_call_operand.vmem [shape: f32[32,8], index: 8, kind: input, shape index: {}]   ;;  %s6037_s9 = inlined_call_operand.vmem [shape: f32[32,1], index: 9, kind: input, shape index: {}]   ;;  %s6038_s10 = inlined_call_operand.vmem [shape: f32[32,1], index: 10, kind: input, shape index: {}]   ;;  %s6039_s11 = inlined_call_operand.<no memory space> [shape: f32[1,1], index: 11, kind: input, shape index: {}]   ;;  %s6040_s12 = inlined_call_operand.hbm [shape: f32[2,2,256], index: 12, kind: output, shape index: {}]  }
   0x1   :  { %v17_v0 = vstv %s6039_s11 }
   0x2   :  { %18 = vst [vmem:[#allocation2] sm:$0x1] %v17_v0 }
   0x3   :  { %v53_v1 = vld [vmem:[%s6030_s2 + $0x10] sm:$0xff]  ;;  %v51_v2 = vld [vmem:[%s6030_s2] sm:$0xff]  ;;  %v6042_v3 = vmov 0   ;;  %v54_v4 = vld [vmem:[%s6030_s2 + $0x18] sm:$0xff] }
   0x4   :  { %2771 = vset.pattern.permute.xlu1 %v6042_v3  ;;  %2770 = vset.pattern.permute.xlu0 %v6042_v3  ;;  %v52_v5 = vld [vmem:[%s6030_s2 + $0x8] sm:$0xff]  ;;  %v55_v7 = vld [vmem:[%s6030_s2 + $0x20] sm:$0xff] }
   0x5   :  { %114 = vperm.xlu1 %2771, %v53_v1   ;;  %104 = vperm.xlu0 %2770, %v51_v2   ;;  %v56_v6 = vld [vmem:[%s6030_s2 + $0x28] sm:$0xff] }
   0x9   :  { %119 = vperm.xlu1 %2771, %v54_v4   ;;  %109 = vperm.xlu0 %2770, %v52_v5  }
   0xa   :  { %19 = vsyncpa [#allocation4], 0  ;;  %v58_v8 = vld [vmem:[%s6030_s2 + $0x38] sm:$0xff]  ;;  %v57_v9 = vld [vmem:[%s6030_s2 + $0x30] sm:$0xff]  ;;  %v2926_v18 = vmov 1   ;;  %v6041_v31 = vlaneseq  ;;  %s2927_s29 = smov 1  }
   0xb   :  { %v60_v10 = vld [vmem:[%s6031_s3 + $0x8] sm:$0xff]  ;;  %v59_v11 = vld [vmem:[%s6031_s3] sm:$0xff]  ;;  %v62_v12 = vld [vmem:[%s6031_s3 + $0x18] sm:$0xff]  ;;  %s2928_s30 = smov 127   ;;  %s2936_s24 = smov 16   ;;  %vm1266_vm4 = vcmask 64512  }
   0xc   :  { %v61_v13 = vld [vmem:[%s6031_s3 + $0x10] sm:$0xff]  ;;  %v64_v14 = vld [vmem:[%s6031_s3 + $0x28] sm:$0xff]  ;;  %v63_v15 = vld [vmem:[%s6031_s3 + $0x20] sm:$0xff]  ;;  %v144_v34 = vshrl.u32 %v6041_v31, 7  ;;  %s2937_s28 = smov 112   ;;  %s2939_s17 = smov [#allocation3]  }
   0xd   :  { %129 = vperm.xlu1 %2771, %v56_v6   ;;  %124 = vperm.xlu0 %2770, %v55_v7   ;;  %v66_v16 = vld [vmem:[%s6031_s3 + $0x38] sm:$0xff]  ;;  %v65_v17 = vld [vmem:[%s6031_s3 + $0x30] sm:$0xff]  ;;  %v3063_v19 = vld [vmem:[%s6032_s4] sm:$0xff]  ;;  %s2735_s3 = sshll.u32 %s2939_s17, 4  ;;  %s2736_s3 = int_to_ptr.vmem [resolvable:$true] %s2735_s3 }
   0xe   :  { %v3071_v20 = vld [vmem:[%s6032_s4 + $0x10] sm:$0xff]  ;;  %v3077_v21 = vld [vmem:[%s6032_s4 + $0x18] sm:$0xff]  ;;  %v3083_v22 = vld [vmem:[%s6032_s4 + $0x28] sm:$0xff]  ;;  %v3119_v37 = vsub.s32 0, %v144_v34  ;;  %v149_v38 = vsub.s32 2, %v144_v34  ;;  %v3127_v41 = vsub.s32 1, %v144_v34  ;;  %p2908_p1 = scmp.lt.s32.totalorder %s2736_s3, %s2736_s3 }
   0xf   :  { %v3089_v23 = vld [vmem:[%s6032_s4 + $0x38] sm:$0xff]  ;;  %v3095_v24 = vld [vmem:[%s6032_s4 + $0x8] sm:$0xff]  ;;  %v101_v39 = vld [vmem:[%s6028_s0] sm:$0xf]  ;;  %v271_v44 = vsub.s32 3, %v144_v34  ;;  %s2903_s18 = scalar_lea.vmem %s2736_s3, 128 }
  0x10   :  { %6262 = vst [vmem:[#allocation6_spill] sm:$0xff] %v3119_v37  ;;  %v2750_v40 = vld [vmem:[%s6028_s0 + $0x4] sm:$0xf]  ;;  %6263 = vst [vmem:[#allocation7_spill] sm:$0xff] %v3127_v41  ;;  %v146_v45 = vrot.slane %v101_v39, %v3119_v37  ;;  %v150_v48 = vrot.slane %v101_v39, %v149_v38  ;;  %v268_v51 = vrot.slane %v101_v39, %v3127_v41  ;;  %p2904_p0 = scmp.ne.s32.totalorder %s2736_s3, %s2903_s18  ;;  %p2909_p2 = scmp.lt.s32.totalorder %s2903_s18, %s2903_s18 }
  0x11   :  { %139 = vperm.xlu1 %2771, %v58_v8   ;;  %134 = vperm.xlu0 %2770, %v57_v9   ;;  %v1685_v46 = vrot.slane %v2750_v40, %v3119_v37  ;;  %v1689_v47 = vrot.slane %v2750_v40, %v149_v38  ;;  %v272_v52 = vrot.slane %v101_v39, %v271_v44 }
  0x12   :  { %v1735_v53 = vrot.slane %v2750_v40, %v3127_v41  ;;  %v1739_v54 = vrot.slane %v2750_v40, %v271_v44  ;;  %v3142_v55 = vrot.slane %v146_v45, %v3119_v37  ;;  %v3151_v58 = vrot.slane %v150_v48, %v3119_v37  ;;  %p2910_p3 = por %p2909_p2, %p2908_p1 }
  0x13   :  { %v3145_v56 = vrot.slane %v1685_v46, %v3119_v37  ;;  %v3148_v57 = vrot.slane %v1689_v47, %v3119_v37  ;;  %v3158_v61 = vrot.slane %v268_v51, %v3127_v41  ;;  %v3161_v62 = vrot.slane %v272_v52, %v3127_v41 }
  0x14   :  { %v3164_v63 = vrot.slane %v1735_v53, %v3127_v41  ;;  %v3167_v0 = vrot.slane %v1739_v54, %v3127_v41  ;;  %p2911_p4 = pnand %p2910_p3, %p2904_p0 }
  0x15   :  { %184 = vperm.xlu1 %2771, %v60_v10   ;;  %179 = vperm.xlu0 %2770, %v59_v11  }
  0x19   :  { %194 = vperm.xlu1 %2771, %v62_v12   ;;  %189 = vperm.xlu0 %2770, %v61_v13  }
  0x1d   :  { %204 = vperm.xlu1 %2771, %v64_v14   ;;  %199 = vperm.xlu0 %2770, %v63_v15  }
  0x21   :  { %214 = vperm.xlu1 %2771, %v66_v16   ;;  %209 = vperm.xlu0 %2770, %v65_v17  }
  0x25   :  { %2773 = vset.pattern.permute.xlu1 %v2926_v18  ;;  %2772 = vset.pattern.permute.xlu0 %v2926_v18 }
  0x26   :  { %238 = vperm.xlu1 %2773, %v52_v5   ;;  %234 = vperm.xlu0 %2772, %v51_v2  }
  0x2a   :  { %242 = vperm.xlu1 %2773, %v53_v1   ;;  %246 = vperm.xlu0 %2772, %v54_v4  }
  0x2e   :  { %250 = vperm.xlu1 %2773, %v55_v7   ;;  %254 = vperm.xlu0 %2772, %v56_v6  }
  0x32   :  { %258 = vperm.xlu1 %2773, %v57_v9   ;;  %262 = vperm.xlu0 %2772, %v58_v8  }
  0x36   :  { %2774 = vset.pattern.permute.xlu1 %v6042_v3  ;;  %526 = vperm.xlu0 %2772, %v3063_v19  }
  0x37   :  { %471 = vperm.xlu1 %2774, %v3063_v19  }
  0x3b   :  { %481 = vperm.xlu1 %2774, %v3071_v20  }
  0x3f   :  { %486 = vperm.xlu1 %2774, %v3077_v21  }
  0x43   :  { %496 = vperm.xlu1 %2774, %v3083_v22  }
  0x47   :  { %506 = vperm.xlu1 %2774, %v3089_v23  }
  0x4b   :  { %2775 = vset.pattern.permute.xlu1 %v2926_v18 }
  0x4c   :  { %530 = vperm.xlu1 %2775, %v3095_v24  }
  0x80   :  { %v3098_v25 = vpop.permute.xlu1 %114  ;;  %v3100_v26 = vpop.permute.xlu0 %104 }
  0x81   :  { %v165_v1 = vmul.f32 %v3142_v55, %v3098_v25  ;;  %v1704_v2 = vmul.f32 %v3145_v56, %v3098_v25  ;;  %v1705_v4 = vmul.f32 %v3148_v57, %v3098_v25  ;;  %v161_v5 = vmul.f32 %v3142_v55, %v3100_v26 }
  0x82   :  { %v1700_v6 = vmul.f32 %v3145_v56, %v3100_v26  ;;  %v1701_v7 = vmul.f32 %v3148_v57, %v3100_v26 }
  0x84   :  { %v3102_v27 = vpop.permute.xlu1 %119  ;;  %v3104_v28 = vpop.permute.xlu0 %109 }
  0x85   :  { %v163_v8 = vmul.f32 %v3142_v55, %v3104_v28  ;;  %v1702_v9 = vmul.f32 %v3145_v56, %v3104_v28  ;;  %v167_v10 = vmul.f32 %v3142_v55, %v3102_v27  ;;  %v1706_v11 = vmul.f32 %v3145_v56, %v3102_v27 }
  0x86   :  { %v1707_v12 = vmul.f32 %v3148_v57, %v3102_v27  ;;  %v1703_v13 = vmul.f32 %v3148_v57, %v3104_v28 }
  0x88   :  { %v3106_v29 = vpop.permute.xlu1 %129  ;;  %v3108_v30 = vpop.permute.xlu0 %124 }
  0x89   :  { %v171_v14 = vmul.f32 %v3142_v55, %v3106_v29  ;;  %v169_v15 = vmul.f32 %v3142_v55, %v3108_v30 }
  0x8c   :  { %v3110_v32 = vpop.permute.xlu1 %139  ;;  %v3112_v33 = vpop.permute.xlu0 %134 }
  0x90   :  { %v3115_v35 = vpop.permute.xlu1 %184  ;;  %v3117_v36 = vpop.permute.xlu0 %179 }
  0x91   :  { %v219_v16 = vadd.f32 %v3115_v35, %v163_v8  ;;  %v1718_v17 = vadd.f32 %v1702_v9, %v3115_v35  ;;  %v1719_v18 = vadd.f32 %v1703_v13, %v3115_v35  ;;  %v217_v34 = vadd.f32 %v3117_v36, %v161_v5 }
  0x92   :  { %v1716_v38 = vadd.f32 %v1700_v6, %v3117_v36  ;;  %v1717_v39 = vadd.f32 %v1701_v7, %v3117_v36 }
  0x94   :  { %v3129_v42 = vpop.permute.xlu1 %194  ;;  %v3131_v43 = vpop.permute.xlu0 %189 }
  0x95   :  { %v223_v45 = vadd.f32 %v3129_v42, %v167_v10  ;;  %v1722_v51 = vadd.f32 %v1706_v11, %v3129_v42  ;;  %v221_v5 = vadd.f32 %v3131_v43, %v165_v1  ;;  %v1720_v9 = vadd.f32 %v1704_v2, %v3131_v43 }
  0x96   :  { %v1721_v1 = vadd.f32 %v1705_v4, %v3131_v43 }
  0x98   :  { %v3135_v49 = vpop.permute.xlu1 %204  ;;  %v3137_v50 = vpop.permute.xlu0 %199 }
  0x9c   :  { %v3153_v59 = vpop.permute.xlu1 %214  ;;  %v3155_v60 = vpop.permute.xlu0 %209 }
  0xa1   :  { %v3203_v40 = vpop.permute.xlu1 %238  ;;  %v3205_v44 = vpop.permute.xlu0 %234 }
  0xa2   :  { %v285_v46 = vmul.f32 %v3158_v61, %v3203_v40  ;;  %v1752_v47 = vmul.f32 %v3164_v63, %v3203_v40  ;;  %v1753_v48 = vmul.f32 %v3167_v0, %v3203_v40  ;;  %v283_v52 = vmul.f32 %v3158_v61, %v3205_v44 }
  0xa3   :  { %v1750_v53 = vmul.f32 %v3164_v63, %v3205_v44  ;;  %v1751_v54 = vmul.f32 %v3167_v0, %v3205_v44 }
  0xa4   :  { %v3222_v6 = vadd.f32 %v285_v46, %v219_v16  ;;  %v3224_v7 = vadd.f32 %v1752_v47, %v1718_v17  ;;  %v3226_v8 = vadd.f32 %v1753_v48, %v1719_v18  ;;  %v3229_v10 = vadd.f32 %v283_v52, %v217_v34 }
  0xa5   :  { %v3231_v11 = vadd.f32 %v1750_v53, %v1716_v38  ;;  %v3233_v13 = vadd.f32 %v1751_v54, %v1717_v39  ;;  %v3235_v31 = vpop.permute.xlu1 %242  ;;  %v3237_v3 = vpop.permute.xlu0 %246  ;;  %v1723_v18 = vadd.f32 %v1707_v12, %v3129_v42  ;;  %v1709_v39 = vmul.f32 %v3148_v57, %v3108_v30 }
  0xa6   :  { %6264 = vst [vmem:[#allocation8_spill] sm:$0xff] %v3222_v6  ;;  %6265 = vst [vmem:[#allocation9_spill] sm:$0xff] %v3224_v7  ;;  %v287_v16 = vmul.f32 %v3158_v61, %v3235_v31  ;;  %v1754_v17 = vmul.f32 %v3164_v63, %v3235_v31  ;;  %v1755_v2 = vmul.f32 %v3167_v0, %v3235_v31  ;;  %317 = vrot.lane.b32.xlu0 %v3222_v6, %s2927_s29 }
  0xa7   :  { %6266 = vst [vmem:[#allocation10_spill] sm:$0xff] %v3226_v8  ;;  %6267 = vst [vmem:[#allocation11_spill] sm:$0xff] %v3229_v10  ;;  %v289_v34 = vmul.f32 %v3158_v61, %v3237_v3  ;;  %v1756_v4 = vmul.f32 %v3164_v63, %v3237_v3  ;;  %v1757_v38 = vmul.f32 %v3167_v0, %v3237_v3  ;;  %315 = vrot.lane.b32.xlu1 %v3229_v10, %s2927_s29 }
  0xa8   :  { %6268 = vst [vmem:[#allocation12_spill] sm:$0xff] %v3231_v11  ;;  %6269 = vst [vmem:[#allocation13_spill] sm:$0xff] %v3233_v13  ;;  %v3259_v46 = vadd.f32 %v287_v16, %v221_v5  ;;  %v3261_v47 = vadd.f32 %v1754_v17, %v1720_v9  ;;  %v3263_v12 = vadd.f32 %v1755_v2, %v1721_v1 }
  0xa9   :  { %v1711_v48 = vmul.f32 %v3148_v57, %v3106_v29  ;;  %v3267_v52 = vadd.f32 %v289_v34, %v223_v45  ;;  %v3269_v53 = vadd.f32 %v1756_v4, %v1722_v51  ;;  %v3271_v54 = vadd.f32 %v1757_v38, %v1723_v18  ;;  %v3273_v8 = vpop.permute.xlu1 %250  ;;  %v3275_v7 = vpop.permute.xlu0 %254 }
  0xaa   :  { %6270 = vst [vmem:[#allocation14_spill] sm:$0xff] %v3259_v46  ;;  %6271 = vst [vmem:[#allocation15_spill] sm:$0xff] %v3261_v47  ;;  %v225_v5 = vadd.f32 %v3137_v50, %v169_v15  ;;  %v1725_v9 = vadd.f32 %v1709_v39, %v3137_v50  ;;  %v291_v1 = vmul.f32 %v3158_v61, %v3273_v8 }
  0xab   :  { %6272 = vst [vmem:[#allocation16_spill] sm:$0xff] %v3263_v12  ;;  %6273 = vst [vmem:[#allocation17_spill] sm:$0xff] %v3267_v52  ;;  %v1759_v16 = vmul.f32 %v3167_v0, %v3273_v8  ;;  %v227_v45 = vadd.f32 %v3135_v49, %v171_v14  ;;  %v1727_v51 = vadd.f32 %v1711_v48, %v3135_v49  ;;  %319 = vrot.lane.b32.xlu1 %v3259_v46, %s2927_s29 }
  0xac   :  { %6274 = vst [vmem:[#allocation18_spill] sm:$0xff] %v3269_v53  ;;  %6275 = vst [vmem:[#allocation19_spill] sm:$0xff] %v3271_v54  ;;  %v293_v17 = vmul.f32 %v3158_v61, %v3275_v7  ;;  %v1761_v2 = vmul.f32 %v3167_v0, %v3275_v7  ;;  %v173_v15 = vmul.f32 %v3142_v55, %v3112_v33  ;;  %321 = vrot.lane.b32.xlu0 %v3267_v52, %s2927_s29 }
  0xad   :  { %v1713_v18 = vmul.f32 %v3148_v57, %v3112_v33  ;;  %v3295_v34 = vadd.f32 %v291_v1, %v225_v5  ;;  %v3297_v14 = vadd.f32 %v1759_v16, %v1725_v9  ;;  %v175_v4 = vmul.f32 %v3142_v55, %v3110_v32  ;;  %v3309_v54 = vpop.permute.xlu1 %258  ;;  %v3311_v12 = vpop.permute.xlu0 %262 }
  0xae   :  { %v1715_v38 = vmul.f32 %v3148_v57, %v3110_v32  ;;  %v3305_v39 = vadd.f32 %v293_v17, %v227_v45  ;;  %v3307_v48 = vadd.f32 %v1761_v2, %v1727_v51  ;;  %v229_v5 = vadd.f32 %v3155_v60, %v173_v15 }
  0xaf   :  { %6276 = vst [vmem:[#allocation20_spill] sm:$0xff] %v3295_v34  ;;  %v1729_v9 = vadd.f32 %v1713_v18, %v3155_v60  ;;  %v295_v1 = vmul.f32 %v3158_v61, %v3309_v54  ;;  %v1763_v55 = vmul.f32 %v3167_v0, %v3309_v54  ;;  %v231_v57 = vadd.f32 %v3153_v59, %v175_v4 }
  0xb0   :  { %6277 = vst [vmem:[#allocation21_spill] sm:$0xff] %v3305_v39  ;;  %v1731_v16 = vadd.f32 %v1715_v38, %v3153_v59  ;;  %v297_v45 = vmul.f32 %v3158_v61, %v3311_v12  ;;  %v1765_v51 = vmul.f32 %v3167_v0, %v3311_v12  ;;  %323 = vrot.lane.b32.xlu1 %v3295_v34, %s2927_s29 }
  0xb1   :  { %v3327_v17 = vadd.f32 %v295_v1, %v229_v5  ;;  %v3329_v2 = vadd.f32 %v1763_v55, %v1729_v9  ;;  %325 = vrot.lane.b32.xlu0 %v3305_v39, %s2927_s29  ;;  %v162_v15 = vmul.f32 %v3151_v58, %v3100_v26  ;;  %v284_v18 = vmul.f32 %v3161_v62, %v3205_v44 }
  0xb2   :  { %v3337_v61 = vadd.f32 %v297_v45, %v231_v57  ;;  %v3339_v4 = vadd.f32 %v1765_v51, %v1731_v16  ;;  %v164_v0 = vmul.f32 %v3151_v58, %v3104_v28  ;;  %v286_v38 = vmul.f32 %v3161_v62, %v3203_v40 }
  0xb3   :  { %6278 = vst [vmem:[#allocation22_spill] sm:$0xff] %v3329_v2  ;;  %v218_v5 = vadd.f32 %v3117_v36, %v162_v15  ;;  %v166_v44 = vmul.f32 %v3151_v58, %v3098_v25  ;;  %v288_v28 = vmul.f32 %v3161_v62, %v3235_v31  ;;  %v168_v40 = vmul.f32 %v3151_v58, %v3102_v27 }
  0xb4   :  { %6279 = vst [vmem:[#allocation23_spill] sm:$0xff] %v3337_v61  ;;  %6280 = vst [vmem:[#allocation24_spill] sm:$0xff] %v3339_v4  ;;  %327 = vrot.lane.b32.xlu1 %v3327_v17, %s2927_s29  ;;  %v220_v26 = vadd.f32 %v3115_v35, %v164_v0  ;;  %v290_v1 = vmul.f32 %v3161_v62, %v3237_v3  ;;  %v170_v31 = vmul.f32 %v3151_v58, %v3108_v30 }
  0xb5   :  { %329 = vrot.lane.b32.xlu0 %v3337_v61, %s2927_s29  ;;  %v3353_v9 = vadd.f32 %v284_v18, %v218_v5  ;;  %v222_v35 = vadd.f32 %v3131_v43, %v166_v44  ;;  %v224_v25 = vadd.f32 %v3129_v42, %v168_v40  ;;  %v292_v27 = vmul.f32 %v3161_v62, %v3273_v8 }
  0xb6   :  { %v3359_v36 = vadd.f32 %v286_v38, %v220_v26  ;;  %v172_v3 = vmul.f32 %v3151_v58, %v3106_v29  ;;  %v294_v57 = vmul.f32 %v3161_v62, %v3275_v7  ;;  %v226_v42 = vadd.f32 %v3137_v50, %v170_v31 }
  0xb7   :  { %6281 = vst [vmem:[#allocation25_spill] sm:$0xff] %v3353_v9  ;;  %v3371_v55 = vadd.f32 %v288_v28, %v222_v35  ;;  %v3377_v43 = vadd.f32 %v290_v1, %v224_v25  ;;  %v174_v45 = vmul.f32 %v3151_v58, %v3112_v33  ;;  %v296_v15 = vmul.f32 %v3161_v62, %v3309_v54  ;;  %v3463_v1 = vpop.permute.xlu1 %471 }
  0xb8   :  { %6282 = vst [vmem:[#allocation26_spill] sm:$0xff] %v3359_v36  ;;  %331 = vrot.lane.b32.xlu1 %v3353_v9, %s2927_s29  ;;  %v228_v16 = vadd.f32 %v3135_v49, %v172_v3  ;;  %v3389_v51 = vadd.f32 %v292_v27, %v226_v42  ;;  %v176_v18 = vmul.f32 %v3151_v58, %v3110_v32  ;;  %v3449_v58 = vld [vmem:[%s6032_s4 + $0x20] sm:$0xff]  ;;  %v2929_v40 = vmov 2   ;;  %6289 = vst [vmem:[#allocation33_spill] sm:$0xff] %v3463_v1  ;;  %v3487_v42 = vpop.permute.xlu0 %526 }
  0xb9   :  { %333 = vrot.lane.b32.xlu0 %v3359_v36, %s2927_s29  ;;  %6283 = vst [vmem:[#allocation27_spill] sm:$0xff] %v3371_v55  ;;  %6284 = vst [vmem:[#allocation28_spill] sm:$0xff] %v3377_v43  ;;  %v298_v38 = vmul.f32 %v3161_v62, %v3311_v12  ;;  %v230_v5 = vadd.f32 %v3155_v60, %v174_v45  ;;  %v3456_v62 = vld [vmem:[%s6032_s4 + $0x30] sm:$0xff]  ;;  %v2930_v25 = vmov 3  }
  0xba   :  { %6285 = vst [vmem:[#allocation29_spill] sm:$0xff] %v3389_v51  ;;  %v3395_v0 = vadd.f32 %v294_v57, %v228_v16  ;;  %v232_v26 = vadd.f32 %v3153_v59, %v176_v18  ;;  %v2931_v57 = vmov 4   ;;  %6293 = vst [vmem:[#allocation37_spill] sm:$0xff] %v3487_v42 }
  0xbb   :  { %v3405_v44 = vadd.f32 %v296_v15, %v230_v5  ;;  %v3469_v35 = vpop.permute.xlu1 %481 }
  0xbc   :  { %335 = vrot.lane.b32.xlu1 %v3371_v55, %s2927_s29  ;;  %6286 = vst [vmem:[#allocation30_spill] sm:$0xff] %v3395_v0  ;;  %v3407_v28 = vadd.f32 %v298_v38, %v232_v26  ;;  %6290 = vst [vmem:[#allocation34_spill] sm:$0xff] %v3469_v35  ;;  %v2932_v38 = vmov 5   ;;  %v2933_v35 = vmov 6  }
  0xbd   :  { %337 = vrot.lane.b32.xlu0 %v3377_v43, %s2927_s29  ;;  %6287 = vst [vmem:[#allocation31_spill] sm:$0xff] %v3405_v44 }
  0xbe   :  { %6288 = vst [vmem:[#allocation32_spill] sm:$0xff] %v3407_v28 }
  0xbf   :  { %v3473_v31 = vpop.permute.xlu1 %486 }
  0xc0   :  { %339 = vrot.lane.b32.xlu1 %v3389_v51, %s2927_s29  ;;  %6291 = vst [vmem:[#allocation35_spill] sm:$0xff] %v3473_v31 }
  0xc1   :  { %341 = vrot.lane.b32.xlu0 %v3395_v0, %s2927_s29 }
  0xc3   :  { %v3477_v27 = vpop.permute.xlu1 %496 }
  0xc4   :  { %343 = vrot.lane.b32.xlu1 %v3405_v44, %s2927_s29 }
  0xc5   :  { %345 = vrot.lane.b32.xlu0 %v3407_v28, %s2927_s29 }
  0xc7   :  { %v3483_v3 = vpop.permute.xlu1 %506 }
  0xc8   :  { %393 = vrot.lane.b32.xlu1 %v3229_v10, %s2928_s30  ;;  %6292 = vst [vmem:[#allocation36_spill] sm:$0xff] %v3483_v3  ;;  %v6311_v10 = vmov 0  }
  0xc9   :  { %395 = vrot.lane.b32.xlu0 %v3222_v6, %s2928_s30 }
  0xcb   :  { %v3489_v16 = vpop.permute.xlu1 %530 }
  0xcc   :  { %397 = vrot.lane.b32.xlu1 %v3259_v46, %s2928_s30  ;;  %6294 = vst [vmem:[#allocation38_spill] sm:$0xff] %v3489_v16 }
  0xcd   :  { %399 = vrot.lane.b32.xlu0 %v3267_v52, %s2928_s30 }
  0xd0   :  { %401 = vrot.lane.b32.xlu1 %v3295_v34, %s2928_s30 }
  0xd1   :  { %403 = vrot.lane.b32.xlu0 %v3305_v39, %s2928_s30 }
  0xd4   :  { %405 = vrot.lane.b32.xlu1 %v3327_v17, %s2928_s30 }
  0xd5   :  { %407 = vrot.lane.b32.xlu0 %v3337_v61, %s2928_s30 }
  0xd8   :  { %409 = vrot.lane.b32.xlu1 %v3353_v9, %s2928_s30 }
  0xd9   :  { %411 = vrot.lane.b32.xlu0 %v3359_v36, %s2928_s30 }
  0xdc   :  { %413 = vrot.lane.b32.xlu1 %v3371_v55, %s2928_s30 }
  0xdd   :  { %415 = vrot.lane.b32.xlu0 %v3377_v43, %s2928_s30 }
  0xe0   :  { %417 = vrot.lane.b32.xlu1 %v3389_v51, %s2928_s30 }
  0xe1   :  { %419 = vrot.lane.b32.xlu0 %v3395_v0, %s2928_s30 }
  0xe4   :  { %421 = vrot.lane.b32.xlu1 %v3405_v44, %s2928_s30 }
  0xe5   :  { %538 = vperm.xlu0 %2772, %v3077_v21  }
  0xe8   :  { %534 = vperm.xlu1 %2775, %v3071_v20  }
  0xe9   :  { %546 = vperm.xlu0 %2772, %v3083_v22  }
  0xec   :  { %542 = vperm.xlu1 %2775, %v3449_v58  }
  0xed   :  { %554 = vperm.xlu0 %2772, %v3089_v23  }
  0xf0   :  { %550 = vperm.xlu1 %2775, %v3456_v62  }
  0xf1   :  { %423 = vrot.lane.b32.xlu0 %v3407_v28, %s2928_s30 }
  0xf2   :  { %2777 = vset.pattern.permute.xlu0 %v2929_v40 }
  0xf4   :  { %2776 = vset.pattern.permute.xlu1 %v2929_v40 }
  0xf5   :  { %594 = vperm.xlu0 %2777, %v3095_v24   ;;  %590 = vperm.xlu1 %2776, %v3063_v19  }
  0xf9   :  { %606 = vperm.xlu0 %2777, %v3449_v58   ;;  %598 = vperm.xlu1 %2776, %v3071_v20  }
  0xfd   :  { %614 = vperm.xlu0 %2777, %v3456_v62   ;;  %602 = vperm.xlu1 %2776, %v3077_v21  }
 0x101   :  { %2778 = vset.pattern.permute.xlu0 %v2930_v25  ;;  %610 = vperm.xlu1 %2776, %v3083_v22  }
 0x102   :  { %654 = vperm.xlu0 %2778, %v3063_v19  }
 0x105   :  { %618 = vperm.xlu1 %2776, %v3089_v23  }
 0x106   :  { %666 = vperm.xlu0 %2778, %v3077_v21  }
 0x109   :  { %2779 = vset.pattern.permute.xlu1 %v2930_v25 }
 0x10a   :  { %674 = vperm.xlu0 %2778, %v3083_v22   ;;  %658 = vperm.xlu1 %2779, %v3095_v24  }
 0x10e   :  { %682 = vperm.xlu0 %2778, %v3089_v23   ;;  %662 = vperm.xlu1 %2779, %v3071_v20  }
 0x112   :  { %2781 = vset.pattern.permute.xlu0 %v2931_v57  ;;  %670 = vperm.xlu1 %2779, %v3449_v58  }
 0x113   :  { %706 = vperm.xlu0 %2781, %v3095_v24  }
 0x116   :  { %678 = vperm.xlu1 %2779, %v3456_v62  }
 0x117   :  { %718 = vperm.xlu0 %2781, %v3449_v58  }
 0x118   :  { %v3493_v45 = vpop.permute.xlu0 %317 }
 0x119   :  { %6295 = vst [vmem:[#allocation39_spill] sm:$0xff] %v3493_v45  ;;  %v3495_v15 = vpop.permute.xlu1 %315 }
 0x11a   :  { %2780 = vset.pattern.permute.xlu1 %v2931_v57  ;;  %6296 = vst [vmem:[#allocation40_spill] sm:$0xff] %v3495_v15 }
 0x11b   :  { %726 = vperm.xlu0 %2781, %v3456_v62   ;;  %702 = vperm.xlu1 %2780, %v3063_v19  }
 0x11d   :  { %v3499_v18 = vpop.permute.xlu1 %319 }
 0x11e   :  { %6297 = vst [vmem:[#allocation41_spill] sm:$0xff] %v3499_v18  ;;  %v3501_v5 = vpop.permute.xlu0 %321 }
 0x11f   :  { %2782 = vset.pattern.permute.xlu0 %v2932_v38  ;;  %6298 = vst [vmem:[#allocation42_spill] sm:$0xff] %v3501_v5  ;;  %710 = vperm.xlu1 %2780, %v3071_v20  }
 0x120   :  { %766 = vperm.xlu0 %2782, %v3063_v19  }
 0x122   :  { %v3505_v26 = vpop.permute.xlu1 %323 }
 0x123   :  { %v3507_v40 = vpop.permute.xlu0 %325  ;;  %714 = vperm.xlu1 %2780, %v3077_v21  }
 0x124   :  { %778 = vperm.xlu0 %2782, %v3077_v21  }
 0x126   :  { %v3511_v25 = vpop.permute.xlu1 %327 }
 0x127   :  { %v3513_v57 = vpop.permute.xlu0 %329  ;;  %722 = vperm.xlu1 %2780, %v3083_v22  }
 0x128   :  { %786 = vperm.xlu0 %2782, %v3083_v22  }
 0x12a   :  { %v3517_v52 = vpop.permute.xlu1 %331 }
 0x12b   :  { %6299 = vst [vmem:[#allocation43_spill] sm:$0xff] %v3517_v52  ;;  %v3519_v31 = vpop.permute.xlu0 %333  ;;  %730 = vperm.xlu1 %2780, %v3089_v23  }
 0x12c   :  { %6300 = vst [vmem:[#allocation44_spill] sm:$0xff] %v3519_v31  ;;  %794 = vperm.xlu0 %2782, %v3089_v23  }
 0x12e   :  { %v3523_v43 = vpop.permute.xlu1 %335 }
 0x12f   :  { %6301 = vst [vmem:[#allocation45_spill] sm:$0xff] %v3523_v43  ;;  %v3525_v5 = vpop.permute.xlu0 %337  ;;  %2783 = vset.pattern.permute.xlu1 %v2932_v38  ;;  %v1760_v38 = vmul.f32 %v3164_v63, %v3275_v7  ;;  %v6068_v7 = vmov 8  }
 0x130   :  { %6302 = vst [vmem:[#allocation46_spill] sm:$0xff] %v3525_v5  ;;  %2785 = vset.pattern.permute.xlu0 %v2933_v35  ;;  %770 = vperm.xlu1 %2783, %v3095_v24   ;;  %v1710_v5 = vmul.f32 %v3145_v56, %v3106_v29 }
 0x131   :  { %834 = vperm.xlu0 %2785, %v3095_v24  }
 0x132   :  { %v3529_v55 = vpop.permute.xlu1 %339  ;;  %v1726_v6 = vadd.f32 %v1710_v5, %v3135_v49 }
 0x133   :  { %v3531_v1 = vpop.permute.xlu0 %341 }
 0x134   :  { %774 = vperm.xlu1 %2783, %v3071_v20   ;;  %v3548_v45 = vadd.f32 %v1760_v38, %v1726_v6 }
 0x135   :  { %846 = vperm.xlu0 %2785, %v3449_v58  }
 0x136   :  { %v3535_v36 = vpop.permute.xlu1 %343 }
 0x137   :  { %v3541_v16 = vpop.permute.xlu0 %345 }
 0x138   :  { %782 = vperm.xlu1 %2783, %v3449_v58  }
 0x139   :  { %854 = vperm.xlu0 %2785, %v3456_v62  }
 0x13a   :  { %v3546_v9 = vpop.permute.xlu1 %393 }
 0x13b   :  { %6303 = vst [vmem:[#allocation47_spill] sm:$0xff] %v3546_v9  ;;  %v3550_v31 = vpop.permute.xlu0 %395  ;;  %v6078_v9 = vmov 7  }
 0x13c   :  { %6304 = vst [vmem:[#allocation48_spill] sm:$0xff] %v3550_v31  ;;  %790 = vperm.xlu1 %2783, %v3456_v62  }
 0x13d   :  { %1792 = vrot.lane.b32.xlu0 %v3548_v45, %s2927_s29 }
 0x13e   :  { %v3555_v29 = vpop.permute.xlu1 %397  ;;  %2787 = vset.pattern.permute.xlu0 %v6068_v7 }
 0x13f   :  { %6305 = vst [vmem:[#allocation49_spill] sm:$0xff] %v3555_v29  ;;  %v3558_v49 = vpop.permute.xlu0 %399 }
 0x140   :  { %6306 = vst [vmem:[#allocation50_spill] sm:$0xff] %v3558_v49  ;;  %2784 = vset.pattern.permute.xlu1 %v2933_v35  ;;  %v1708_v49 = vmul.f32 %v3145_v56, %v3108_v30 }
 0x141   :  { %1808 = vrot.lane.b32.xlu0 %v3307_v48, %s2927_s29  ;;  %830 = vperm.xlu1 %2784, %v3063_v19  }
 0x142   :  { %v3563_v6 = vpop.permute.xlu1 %401 }
 0x143   :  { %v3565_v5 = vpop.permute.xlu0 %403 }
 0x145   :  { %958 = vperm.xlu0 %2787, %v3449_v58   ;;  %838 = vperm.xlu1 %2784, %v3071_v20  }
 0x146   :  { %v3569_v38 = vpop.permute.xlu1 %405 }
 0x147   :  { %v3573_v7 = vpop.permute.xlu0 %407 }
 0x149   :  { %1810 = vrot.lane.b32.xlu0 %v3329_v2, %s2927_s29  ;;  %842 = vperm.xlu1 %2784, %v3077_v21   ;;  %v1758_v21 = vmul.f32 %v3164_v63, %v3273_v8 }
 0x14a   :  { %v3576_v35 = vpop.permute.xlu1 %409 }
 0x14b   :  { %6307 = vst [vmem:[#allocation51_spill] sm:$0xff] %v3576_v35  ;;  %v3581_v19 = vpop.permute.xlu0 %411 }
 0x14c   :  { %6308 = vst [vmem:[#allocation52_spill] sm:$0xff] %v3581_v19  ;;  %v1724_v19 = vadd.f32 %v1708_v49, %v3137_v50 }
 0x14d   :  { %1856 = vrot.lane.b32.xlu0 %v3548_v45, %s2928_s30  ;;  %850 = vperm.xlu1 %2784, %v3083_v22  }
 0x14e   :  { %v3586_v20 = vpop.permute.xlu1 %413  ;;  %v3598_v35 = vadd.f32 %v1758_v21, %v1724_v19  ;;  %v1712_v19 = vmul.f32 %v3145_v56, %v3112_v33  ;;  %v1762_v21 = vmul.f32 %v3164_v63, %v3309_v54 }
 0x14f   :  { %6309 = vst [vmem:[#allocation53_spill] sm:$0xff] %v3586_v20  ;;  %v3593_v31 = vpop.permute.xlu0 %415 }
 0x150   :  { %6310 = vst [vmem:[#allocation54_spill] sm:$0xff] %v3593_v31  ;;  %v1728_v31 = vadd.f32 %v1712_v19, %v3155_v60  ;;  %v79_v60 = vld [vmem:[%s6033_s5 + $0x20] sm:$0xff] }
 0x151   :  { %1872 = vrot.lane.b32.xlu0 %v3307_v48, %s2928_s30  ;;  %858 = vperm.xlu1 %2784, %v3089_v23  }
 0x152   :  { %v3600_v42 = vpop.permute.xlu1 %417  ;;  %v3637_v15 = vadd.f32 %v1762_v21, %v1728_v31  ;;  %v44_v31 = vld [vmem:[%s6029_s1] ss:$4 sm:$0x3] }
 0x153   :  { %v420_v30 = vpop.permute.xlu0 %419 }
 0x154   :  { %6316 = vst [vmem:[#allocation58_spill] sm:$0xff] %v3637_v15 }
 0x155   :  { %966 = vperm.xlu0 %2787, %v3456_v62   ;;  %2786 = vset.pattern.permute.xlu1 %v6078_v9  ;;  %v6314_v9 = vmov 8  }
 0x156   :  { %898 = vperm.xlu1 %2786, %v3083_v22   ;;  %v3607_v8 = vpop.permute.xlu1 %421 }
 0x159   :  { %2790 = vset.pattern.permute.xlu0 %v6311_v10 }
 0x15a   :  { %476 = vperm.xlu0 %2790, %v3095_v24   ;;  %1790 = vrot.lane.b32.xlu1 %v3598_v35, %s2927_s29 }
 0x15e   :  { %491 = vperm.xlu0 %2790, %v3449_v58   ;;  %1806 = vrot.lane.b32.xlu1 %v3297_v14, %s2927_s29 }
 0x160   :  { %v3611_v50 = vpop.permute.xlu0 %538 }
 0x161   :  { %6312 = vst [vmem:[#allocation55_spill] sm:$0xff] %v3611_v50 }
 0x162   :  { %501 = vperm.xlu0 %2790, %v3456_v62   ;;  %902 = vperm.xlu1 %2786, %v3456_v62   ;;  %v1714_v62 = vmul.f32 %v3145_v56, %v3110_v32  ;;  %v6318_v56 = vmov 7  }
 0x163   :  { %v3615_v49 = vpop.permute.xlu1 %534 }
 0x164   :  { %6313 = vst [vmem:[#allocation56_spill] sm:$0xff] %v3615_v49  ;;  %v3617_v24 = vpop.permute.xlu0 %546  ;;  %v1764_v49 = vmul.f32 %v3164_v63, %v3311_v12  ;;  %v1730_v54 = vadd.f32 %v1714_v62, %v3153_v59 }
 0x165   :  { %v567_v20 = vmul.f32 %v3617_v24, %v3305_v39 }
 0x166   :  { %1812 = vrot.lane.b32.xlu0 %v3339_v4, %s2927_s29  ;;  %2788 = vset.pattern.permute.xlu1 %v6314_v9  ;;  %v3643_v46 = vadd.f32 %v1764_v49, %v1730_v54  ;;  %v82_v49 = vld [vmem:[%s6033_s5 + $0x38] sm:$0xff]  ;;  %v3682_v54 = vrot.slane %v44_v31, %v3119_v37 }
 0x167   :  { %v3626_v50 = vpop.permute.xlu1 %542  ;;  %962 = vperm.xlu1 %2788, %v3083_v22   ;;  %v6319_v22 = vlaneseq }
 0x168   :  { %v3634_v33 = vpop.permute.xlu0 %554  ;;  %6317 = vst [vmem:[#allocation59_spill] sm:$0xff] %v3643_v46  ;;  %6323 = vst [vmem:[#allocation63_spill] sm:$0xff] %v3682_v54 }
 0x169   :  { %6315 = vst [vmem:[#allocation57_spill] sm:$0xff] %v3634_v33  ;;  %v3653_v59 = vand.u32 127, %v6319_v22  ;;  %v2746_v22 = vld [vmem:[%s6029_s1 + $0x1] ss:$4 sm:$0x3] }
 0x16a   :  { %1874 = vrot.lane.b32.xlu0 %v3329_v2, %s2928_s30 }
 0x16b   :  { %v3641_v52 = vpop.permute.xlu1 %550  ;;  %1794 = vrot.lane.b32.xlu1 %v3637_v15, %s2927_s29  ;;  %vm349_vm0 = vcmp.lt.s32.totalorder %v3653_v59, 1  ;;  %vm425_vm1 = vcmp.lt.s32.totalorder %v3653_v59, 127  ;;  %vm1093_vm2 = vcmp.lt.s32.totalorder %v3653_v59, 16  ;;  %vm1185_vm3 = vcmp.lt.s32.totalorder %v3653_v59, 112 }
 0x16c   :  { %v3647_v32 = vpop.permute.xlu0 %423  ;;  %2789 = vset.pattern.permute.xlu1 %v6318_v56  ;;  %v363_v19 = vsel %vm349_vm0, %v3531_v1, %v3507_v40 }
 0x16e   :  { %1860 = vrot.lane.b32.xlu0 %v3643_v46, %s2928_s30 }
 0x16f   :  { %1854 = vrot.lane.b32.xlu1 %v3598_v35, %s2928_s30 }
 0x170   :  { %v3660_v63 = vpop.permute.xlu0 %594  ;;  %v3662_v12 = vpop.permute.xlu1 %590 }
 0x171   :  { %6320 = vst [vmem:[#allocation60_spill] sm:$0xff] %v3660_v63  ;;  %6321 = vst [vmem:[#allocation61_spill] sm:$0xff] %v3662_v12  ;;  %v355_v63 = vsel %vm349_vm0, %v3507_v40, %v3531_v1  ;;  %v439_v1 = vsel %vm425_vm1, %v420_v30, %v3565_v5 }
 0x172   :  { %1027 = vperm.xlu0 %2790, %v79_v60   ;;  %v3689_v60 = vmul.f32 %v3682_v54, %v363_v19  ;;  %v3707_v19 = vrot.slane %v2746_v22, %v3119_v37 }
 0x173   :  { %1870 = vrot.lane.b32.xlu1 %v3297_v14, %s2928_s30 }
 0x174   :  { %v3677_v21 = vpop.permute.xlu0 %606  ;;  %v3679_v62 = vpop.permute.xlu1 %598  ;;  %6324 = vst [vmem:[#allocation64_spill] sm:$0xff] %v3689_v60 }
 0x175   :  { %6322 = vst [vmem:[#allocation62_spill] sm:$0xff] %v3679_v62  ;;  %v431_v62 = vsel %vm425_vm1, %v3565_v5, %v420_v30 }
 0x176   :  { %1042 = vperm.xlu0 %2790, %v82_v49   ;;  %v3704_v49 = vrot.slane %v44_v31, %v3127_v41  ;;  %v3721_v31 = vrot.slane %v2746_v22, %v3127_v41  ;;  %v3724_v43 = vmul.f32 %v3707_v19, %v431_v62 }
 0x177   :  { %906 = vperm.xlu1 %2789, %v3089_v23  }
 0x178   :  { %v3699_v12 = vpop.permute.xlu0 %614  ;;  %v3701_v29 = vpop.permute.xlu1 %602  ;;  %6326 = vst [vmem:[#allocation66_spill] sm:$0xff] %v3704_v49  ;;  %v3716_v40 = vmul.f32 %v3704_v49, %v355_v63  ;;  %6328 = vst [vmem:[#allocation68_spill] sm:$0xff] %v3724_v43  ;;  %v3732_v30 = vmul.f32 %v3721_v31, %v439_v1  ;;  %v568_v63 = vmul.f32 %v3617_v24, %v3395_v0 }
 0x179   :  { %6325 = vst [vmem:[#allocation65_spill] sm:$0xff] %v3701_v29  ;;  %v519_v29 = vmul.f32 %v3477_v27, %v3689_v60 }
 0x17a   :  { %2793 = vset.pattern.permute.xlu0 %v6318_v56  ;;  %6327 = vst [vmem:[#allocation67_spill] sm:$0xff] %v3716_v40  ;;  %6329 = vst [vmem:[#allocation69_spill] sm:$0xff] %v3732_v30 }
 0x17b   :  { %894 = vperm.xlu0 %2793, %v3449_v58   ;;  %1796 = vrot.lane.b32.xlu1 %v3643_v46, %s2927_s29  ;;  %v583_v62 = vadd.f32 %v567_v20, %v519_v29  ;;  %v520_v58 = vmul.f32 %v3477_v27, %v3716_v40 }
 0x17c   :  { %v3729_v5 = vpop.permute.xlu1 %610  ;;  %2791 = vset.pattern.permute.xlu1 %v6314_v9 }
 0x17d   :  { %v631_v22 = vmul.f32 %v3729_v5, %v3724_v43  ;;  %v3738_v18 = vpop.permute.xlu0 %654  ;;  %v632_v53 = vmul.f32 %v3729_v5, %v3732_v30  ;;  %v584_v29 = vadd.f32 %v568_v63, %v520_v58 }
 0x17e   :  { %6330 = vst [vmem:[#allocation70_spill] sm:$0xff] %v3738_v18 }
 0x17f   :  { %v647_v11 = vadd.f32 %v631_v22, %v583_v62  ;;  %1858 = vrot.lane.b32.xlu1 %v3637_v15, %s2928_s30  ;;  %v648_v20 = vadd.f32 %v632_v53, %v584_v29  ;;  %v81_v53 = vld [vmem:[%s6033_s5 + $0x30] sm:$0xff] }
 0x180   :  { %v3747_v1 = vpop.permute.xlu1 %618 }
 0x181   :  { %6331 = vst [vmem:[#allocation71_spill] sm:$0xff] %v3747_v1  ;;  %v3749_v47 = vpop.permute.xlu0 %666  ;;  %1071 = vrot.lane.b32.xlu0 %v647_v11, %s2936_s24  ;;  %v80_v11 = vld [vmem:[%s6033_s5 + $0x28] sm:$0xff] }
 0x182   :  { %6332 = vst [vmem:[#allocation72_spill] sm:$0xff] %v3749_v47 }
 0x183   :  { %970 = vperm.xlu1 %2791, %v3089_v23  }
 0x185   :  { %v3753_v18 = vpop.permute.xlu0 %674  ;;  %v3755_v9 = vpop.permute.xlu1 %658  ;;  %1087 = vrot.lane.b32.xlu0 %v648_v20, %s2936_s24 }
 0x186   :  { %6333 = vst [vmem:[#allocation73_spill] sm:$0xff] %v3753_v18  ;;  %6334 = vst [vmem:[#allocation74_spill] sm:$0xff] %v3755_v9 }
 0x187   :  { %1876 = vrot.lane.b32.xlu1 %v3339_v4, %s2928_s30 }
 0x188   :  { %2792 = vset.pattern.permute.xlu1 %v6311_v10 }
 0x189   :  { %v3760_v22 = vpop.permute.xlu0 %682  ;;  %v3762_v62 = vpop.permute.xlu1 %662 }
 0x18a   :  { %6335 = vst [vmem:[#allocation75_spill] sm:$0xff] %v3760_v22  ;;  %6336 = vst [vmem:[#allocation76_spill] sm:$0xff] %v3762_v62 }
 0x18b   :  { %1032 = vperm.xlu1 %2792, %v80_v11  }
 0x18d   :  { %v3768_v23 = vpop.permute.xlu1 %670 }
 0x18e   :  { %6337 = vst [vmem:[#allocation77_spill] sm:$0xff] %v3768_v23  ;;  %v3773_v63 = vpop.permute.xlu0 %706 }
 0x18f   :  { %6338 = vst [vmem:[#allocation78_spill] sm:$0xff] %v3773_v63  ;;  %1037 = vperm.xlu1 %2792, %v81_v53  }
 0x191   :  { %v3775_v58 = vpop.permute.xlu1 %678 }
 0x192   :  { %6339 = vst [vmem:[#allocation79_spill] sm:$0xff] %v3775_v58  ;;  %v3777_v29 = vpop.permute.xlu0 %718 }
 0x193   :  { %6340 = vst [vmem:[#allocation80_spill] sm:$0xff] %v3777_v29  ;;  %2794 = vset.pattern.permute.xlu1 %v6318_v56 }
 0x196   :  { %v3780_v20 = vpop.permute.xlu0 %726  ;;  %v3782_v47 = vpop.permute.xlu1 %702 }
 0x197   :  { %6341 = vst [vmem:[#allocation81_spill] sm:$0xff] %v3780_v20  ;;  %6342 = vst [vmem:[#allocation82_spill] sm:$0xff] %v3782_v47 }
 0x19a   :  { %v3784_v11 = vpop.permute.xlu1 %710 }
 0x19b   :  { %6343 = vst [vmem:[#allocation83_spill] sm:$0xff] %v3784_v11  ;;  %v3786_v62 = vpop.permute.xlu0 %766 }
 0x19c   :  { %6344 = vst [vmem:[#allocation84_spill] sm:$0xff] %v3786_v62 }
 0x19e   :  { %v3788_v9 = vpop.permute.xlu1 %714 }
 0x19f   :  { %6345 = vst [vmem:[#allocation85_spill] sm:$0xff] %v3788_v9  ;;  %v3790_v10 = vpop.permute.xlu0 %778 }
 0x1a0   :  { %6346 = vst [vmem:[#allocation86_spill] sm:$0xff] %v3790_v10 }
 0x1a2   :  { %v3792_v63 = vpop.permute.xlu1 %722 }
 0x1a3   :  { %6347 = vst [vmem:[#allocation87_spill] sm:$0xff] %v3792_v63  ;;  %v3794_v53 = vpop.permute.xlu0 %786 }
 0x1a4   :  { %6348 = vst [vmem:[#allocation88_spill] sm:$0xff] %v3794_v53 }
 0x1a6   :  { %v3796_v13 = vpop.permute.xlu1 %730 }
 0x1a7   :  { %6349 = vst [vmem:[#allocation89_spill] sm:$0xff] %v3796_v13  ;;  %v3798_v41 = vpop.permute.xlu0 %794 }
 0x1a8   :  { %6350 = vst [vmem:[#allocation90_spill] sm:$0xff] %v3798_v41 }
 0x1ab   :  { %v3800_v56 = vpop.permute.xlu1 %770 }
 0x1ac   :  { %6351 = vst [vmem:[#allocation91_spill] sm:$0xff] %v3800_v56  ;;  %v3802_v37 = vpop.permute.xlu0 %834 }
 0x1ad   :  { %6352 = vst [vmem:[#allocation92_spill] sm:$0xff] %v3802_v37 }
 0x1af   :  { %v3804_v47 = vpop.permute.xlu1 %774 }
 0x1b0   :  { %6353 = vst [vmem:[#allocation93_spill] sm:$0xff] %v3804_v47  ;;  %v3806_v11 = vpop.permute.xlu0 %846 }
 0x1b1   :  { %6354 = vst [vmem:[#allocation94_spill] sm:$0xff] %v3806_v11 }
 0x1b3   :  { %v3808_v62 = vpop.permute.xlu1 %782 }
 0x1b4   :  { %6355 = vst [vmem:[#allocation95_spill] sm:$0xff] %v3808_v62  ;;  %v3810_v9 = vpop.permute.xlu0 %854 }
 0x1b5   :  { %6356 = vst [vmem:[#allocation96_spill] sm:$0xff] %v3810_v9 }
 0x1b7   :  { %v3812_v10 = vpop.permute.xlu1 %790 }
 0x1b8   :  { %6357 = vst [vmem:[#allocation97_spill] sm:$0xff] %v3812_v10  ;;  %v1793_v61 = vpop.permute.xlu0 %1792 }
 0x1bc   :  { %v1809_v1 = vpop.permute.xlu0 %1808  ;;  %v3814_v3 = vpop.permute.xlu1 %830 }
 0x1bd   :  { %6358 = vst [vmem:[#allocation98_spill] sm:$0xff] %v3814_v3  ;;  %v1819_v37 = vsel %vm349_vm0, %v1793_v61, %v1809_v1  ;;  %v1827_v47 = vsel %vm349_vm0, %v1809_v1, %v1793_v61 }
 0x1be   :  { %v3829_v9 = vmul.f32 %v1827_v47, %v3682_v54  ;;  %v3832_v4 = vmul.f32 %v1819_v37, %v3704_v49  ;;  %v2016_v47 = vmul.f32 %v3548_v45, %v3792_v63  ;;  %v2017_v37 = vmul.f32 %v3307_v48, %v3792_v63 }
 0x1c0   :  { %v3816_v33 = vpop.permute.xlu0 %958  ;;  %v3818_v28 = vpop.permute.xlu1 %838  ;;  %6362 = vst [vmem:[#allocation102_spill] sm:$0xff] %v3829_v9  ;;  %6363 = vst [vmem:[#allocation103_spill] sm:$0xff] %v3832_v4  ;;  %v2001_v10 = vmul.f32 %v3832_v4, %v3753_v18  ;;  %v1920_v61 = vmul.f32 %v3829_v9, %v3477_v27  ;;  %v1921_v63 = vmul.f32 %v3832_v4, %v3477_v27 }
 0x1c1   :  { %6359 = vst [vmem:[#allocation99_spill] sm:$0xff] %v3816_v33  ;;  %6360 = vst [vmem:[#allocation100_spill] sm:$0xff] %v3818_v28  ;;  %v2000_v28 = vmul.f32 %v3829_v9, %v3753_v18  ;;  %v1936_v18 = vmul.f32 %v3548_v45, %v3617_v24 }
 0x1c2   :  { %v2033_v13 = vadd.f32 %v2017_v37, %v2001_v10 }
 0x1c3   :  { %v2032_v46 = vadd.f32 %v2016_v47, %v2000_v28 }
 0x1c4   :  { %v3824_v56 = vpop.permute.xlu0 %1810  ;;  %v3826_v41 = vpop.permute.xlu1 %842 }
 0x1c5   :  { %6361 = vst [vmem:[#allocation101_spill] sm:$0xff] %v3826_v41 }
 0x1c8   :  { %v1857_v3 = vpop.permute.xlu0 %1856  ;;  %v3834_v22 = vpop.permute.xlu1 %850 }
 0x1cc   :  { %v1873_v1 = vpop.permute.xlu0 %1872  ;;  %v3850_v33 = vpop.permute.xlu1 %858 }
 0x1cd   :  { %v1883_v41 = vsel %vm425_vm1, %v1857_v3, %v1873_v1  ;;  %v1891_v58 = vsel %vm425_vm1, %v1873_v1, %v1857_v3  ;;  %6364 = vst [vmem:[#allocation104_spill] sm:$0xff] %v3850_v33 }
 0x1ce   :  { %v3855_v9 = vmul.f32 %v1883_v41, %v3707_v19  ;;  %v3858_v11 = vmul.f32 %v1891_v58, %v3721_v31  ;;  %v1952_v41 = vadd.f32 %v1936_v18, %v1920_v61  ;;  %v1937_v58 = vmul.f32 %v3307_v48, %v3617_v24 }
 0x1cf   :  { %v362_v18 = vsel %vm349_vm0, %v3529_v55, %v3505_v26 }
 0x1d0   :  { %6365 = vst [vmem:[#allocation105_spill] sm:$0xff] %v3858_v11  ;;  %v1968_v20 = vmul.f32 %v3855_v9, %v3729_v5  ;;  %v2048_v3 = vmul.f32 %v3855_v9, %v3794_v53  ;;  %v2049_v1 = vmul.f32 %v3858_v11, %v3794_v53  ;;  %v3868_v33 = vpop.permute.xlu0 %966  ;;  %v1969_v27 = vmul.f32 %v3858_v11, %v3729_v5 }
 0x1d1   :  { %6366 = vst [vmem:[#allocation106_spill] sm:$0xff] %v3868_v33  ;;  %v3874_v28 = vpop.permute.xlu1 %898  ;;  %v1953_v4 = vadd.f32 %v1937_v58, %v1921_v63  ;;  %v356_v5 = vsel %vm349_vm0, %v3511_v25, %v3535_v36 }
 0x1d2   :  { %v1984_v10 = vadd.f32 %v1968_v20, %v1952_v41  ;;  %v3876_v47 = vadd.f32 %v2048_v3, %v2032_v46  ;;  %v3878_v37 = vadd.f32 %v2049_v1, %v2033_v13  ;;  %v354_v46 = vsel %vm349_vm0, %v3505_v26, %v3529_v55 }
 0x1d3   :  { %v1985_v53 = vadd.f32 %v1969_v27, %v1953_v4  ;;  %v3892_v13 = vmul.f32 %v3682_v54, %v362_v18  ;;  %v430_v4 = vsel %vm425_vm1, %v3563_v6, %v3600_v42  ;;  %v3908_v20 = vmul.f32 %v3704_v49, %v354_v46 }
 0x1d4   :  { %6367 = vst [vmem:[#allocation107_spill] sm:$0xff] %v3876_v47  ;;  %6368 = vst [vmem:[#allocation108_spill] sm:$0xff] %v3878_v37  ;;  %2176 = vrot.lane.b32.xlu0 %v1984_v10, %s2936_s24  ;;  %v565_v3 = vmul.f32 %v3626_v50, %v3295_v34  ;;  %v3917_v1 = vmul.f32 %v3704_v49, %v356_v5  ;;  %v438_v41 = vsel %vm425_vm1, %v3600_v42, %v3563_v6 }
 0x1d5   :  { %v3885_v61 = vpop.permute.xlu0 %476  ;;  %v1791_v24 = vpop.permute.xlu1 %1790  ;;  %6370 = vst [vmem:[#allocation110_spill] sm:$0xff] %v3892_v13  ;;  %6371 = vst [vmem:[#allocation111_spill] sm:$0xff] %v3908_v20  ;;  %v3924_v58 = vmul.f32 %v3707_v19, %v430_v4  ;;  %v566_v5 = vmul.f32 %v3626_v50, %v3389_v51  ;;  %v570_v42 = vmul.f32 %v3641_v52, %v3405_v44 }
 0x1d6   :  { %6369 = vst [vmem:[#allocation109_spill] sm:$0xff] %v3885_v61  ;;  %6372 = vst [vmem:[#allocation112_spill] sm:$0xff] %v3917_v1  ;;  %v3944_v37 = vmul.f32 %v3721_v31, %v438_v41  ;;  %v871_v44 = vmul.f32 %v3834_v22, %v3689_v60 }
 0x1d7   :  { %6373 = vst [vmem:[#allocation113_spill] sm:$0xff] %v3924_v58  ;;  %v629_v6 = vmul.f32 %v3677_v21, %v3924_v58 }
 0x1d8   :  { %2192 = vrot.lane.b32.xlu0 %v1985_v53, %s2936_s24  ;;  %v440_v53 = vsel %vm425_vm1, %v3607_v8, %v3569_v38  ;;  %6376 = vst [vmem:[#allocation116_spill] sm:$0xff] %v3944_v37 }
 0x1d9   :  { %v3899_v63 = vpop.permute.xlu0 %491  ;;  %v1807_v26 = vpop.permute.xlu1 %1806  ;;  %v3931_v46 = vmul.f32 %v3721_v31, %v440_v53 }
 0x1da   :  { %v517_v55 = vmul.f32 %v3899_v63, %v3892_v13  ;;  %v518_v27 = vmul.f32 %v3899_v63, %v3908_v20 }
 0x1db   :  { %6374 = vst [vmem:[#allocation114_spill] sm:$0xff] %v3931_v46  ;;  %v634_v53 = vmul.f32 %v3699_v12, %v3931_v46 }
 0x1dc   :  { %v581_v18 = vadd.f32 %v565_v3, %v517_v55  ;;  %v919_v55 = vmul.f32 %v3874_v28, %v3305_v39 }
 0x1dd   :  { %v3928_v10 = vpop.permute.xlu0 %501  ;;  %v3933_v61 = vpop.permute.xlu1 %902 }
 0x1de   :  { %6375 = vst [vmem:[#allocation115_spill] sm:$0xff] %v3933_v61  ;;  %v522_v4 = vmul.f32 %v3928_v10, %v3917_v1  ;;  %v645_v3 = vadd.f32 %v629_v6, %v581_v18  ;;  %v582_v61 = vadd.f32 %v566_v5, %v518_v27  ;;  %v630_v1 = vmul.f32 %v3677_v21, %v3944_v37 }
 0x1df   :  { %v935_v46 = vadd.f32 %v919_v55, %v871_v44  ;;  %v920_v18 = vmul.f32 %v3874_v28, %v3395_v0  ;;  %v872_v6 = vmul.f32 %v3834_v22, %v3716_v40  ;;  %v1826_v44 = vsel %vm349_vm0, %v1807_v26, %v1791_v24 }
 0x1e0   :  { %v586_v33 = vadd.f32 %v570_v42, %v522_v4  ;;  %1069 = vrot.lane.b32.xlu1 %v645_v3, %s2936_s24  ;;  %v646_v27 = vadd.f32 %v630_v1, %v582_v61  ;;  %v1818_v55 = vsel %vm349_vm0, %v1791_v24, %v1807_v26  ;;  %v3979_v61 = vmul.f32 %v1826_v44, %v3682_v54 }
 0x1e1   :  { %v3950_v47 = vpop.permute.xlu0 %1812  ;;  %v364_v24 = vsel %vm349_vm0, %v3535_v36, %v3511_v25  ;;  %v1934_v36 = vmul.f32 %v3598_v35, %v3626_v50 }
 0x1e2   :  { %v3957_v41 = vpop.permute.xlu1 %962  ;;  %v650_v11 = vadd.f32 %v634_v53, %v586_v33  ;;  %v3982_v53 = vmul.f32 %v1818_v55, %v3704_v49  ;;  %v1918_v26 = vmul.f32 %v3979_v61, %v3899_v63  ;;  %v4002_v44 = vmul.f32 %v3682_v54, %v364_v24 }
 0x1e3   :  { %v983_v39 = vmul.f32 %v3957_v41, %v3724_v43  ;;  %v984_v4 = vmul.f32 %v3957_v41, %v3732_v30  ;;  %v2015_v24 = vmul.f32 %v3297_v14, %v3777_v29  ;;  %v1935_v30 = vmul.f32 %v3297_v14, %v3626_v50 }
 0x1e4   :  { %1089 = vrot.lane.b32.xlu0 %v650_v11, %s2936_s24  ;;  %1085 = vrot.lane.b32.xlu1 %v646_v27, %s2936_s24  ;;  %v1998_v27 = vmul.f32 %v3979_v61, %v3768_v23  ;;  %v569_v43 = vmul.f32 %v3641_v52, %v3327_v17 }
 0x1e5   :  { %v3964_v5 = vpop.permute.xlu0 %1874  ;;  %v999_v42 = vadd.f32 %v983_v39, %v935_v46  ;;  %v936_v39 = vadd.f32 %v920_v18, %v872_v6 }
 0x1e6   :  { %v1795_v33 = vpop.permute.xlu1 %1794 }
 0x1e7   :  { %v1000_v46 = vadd.f32 %v984_v4, %v936_v39 }
 0x1e8   :  { %1163 = vrot.lane.b32.xlu0 %v999_v42, %s2937_s28  ;;  %v1999_v42 = vmul.f32 %v3982_v53, %v3768_v23 }
 0x1e9   :  { %v3976_v11 = vpop.permute.xlu0 %1860 }
 0x1ea   :  { %v1855_v1 = vpop.permute.xlu1 %1854 }
 0x1ec   :  { %1179 = vrot.lane.b32.xlu0 %v1000_v46, %s2937_s28  ;;  %v432_v46 = vsel %vm425_vm1, %v3569_v38, %v3607_v8  ;;  %v1950_v38 = vadd.f32 %v1934_v36, %v1918_v26  ;;  %v357_v8 = vsel %vm349_vm0, %v3513_v57, %v3541_v16 }
 0x1ed   :  { %v3985_v3 = vpop.permute.xlu0 %1027 }
 0x1ee   :  { %6377 = vst [vmem:[#allocation117_spill] sm:$0xff] %v3985_v3  ;;  %v1871_v18 = vpop.permute.xlu1 %1870 }
 0x1ef   :  { %v1882_v6 = vsel %vm425_vm1, %v1855_v1, %v1871_v18  ;;  %v1890_v4 = vsel %vm425_vm1, %v1871_v18, %v1855_v1  ;;  %v2014_v1 = vmul.f32 %v3598_v35, %v3777_v29  ;;  %v1919_v18 = vmul.f32 %v3982_v53, %v3899_v63 }
 0x1f0   :  { %v4007_v25 = vmul.f32 %v1882_v6, %v3707_v19  ;;  %v4010_v55 = vmul.f32 %v1890_v4, %v3721_v31  ;;  %v2031_v29 = vadd.f32 %v2015_v24, %v1999_v42  ;;  %v1820_v63 = vsel %vm349_vm0, %v1795_v33, %v3824_v56 }
 0x1f1   :  { %v4012_v39 = vpop.permute.xlu0 %1042  ;;  %v2030_v23 = vadd.f32 %v2014_v1, %v1998_v27  ;;  %v4049_v27 = vsel %vm349_vm0, %v3541_v16, %v3513_v57  ;;  %v4052_v42 = vmul.f32 %v3707_v19, %v432_v46  ;;  %v1951_v57 = vadd.f32 %v1935_v30, %v1919_v18 }
 0x1f2   :  { %6378 = vst [vmem:[#allocation118_spill] sm:$0xff] %v4012_v39  ;;  %v1966_v6 = vmul.f32 %v4007_v25, %v3677_v21  ;;  %v2046_v4 = vmul.f32 %v4007_v25, %v3808_v62  ;;  %v2047_v39 = vmul.f32 %v4010_v55, %v3808_v62  ;;  %v4030_v3 = vpop.permute.xlu1 %906  ;;  %v521_v62 = vmul.f32 %v3928_v10, %v4002_v44 }
 0x1f3   :  { %6379 = vst [vmem:[#allocation119_spill] sm:$0xff] %v4030_v3  ;;  %v1967_v26 = vmul.f32 %v4010_v55, %v3677_v21  ;;  %6380 = vst [vmem:[#allocation120_spill] sm:$0xff] %v4052_v42  ;;  %v1828_v21 = vsel %vm349_vm0, %v3824_v56, %v1795_v33  ;;  %v4070_v46 = vmul.f32 %v3704_v49, %v357_v8  ;;  %v6384_v8 = vld [vmem:[#allocation89_spill] sm:$0xff]  ;;  %v6389_v3 = vld [vmem:[#allocation79_spill] sm:$0xff] }
 0x1f4   :  { %v1982_v36 = vadd.f32 %v1966_v6, %v1950_v38  ;;  %v4056_v24 = vadd.f32 %v2046_v4, %v2030_v23  ;;  %v4058_v50 = vadd.f32 %v2047_v39, %v2031_v29  ;;  %v4066_v6 = vmul.f32 %v1820_v63, %v3704_v49  ;;  %v6383_v4 = vld [vmem:[#allocation81_spill] sm:$0xff]  ;;  %v6385_v63 = vld [vmem:[#allocation59_spill] sm:$0xff] }
 0x1f5   :  { %v4074_v23 = vmul.f32 %v3637_v15, %v3641_v52  ;;  %v1939_v29 = vmul.f32 %v3329_v2, %v3641_v52  ;;  %v4082_v56 = vsel %vm425_vm1, %v3647_v32, %v3573_v7  ;;  %v633_v33 = vmul.f32 %v3699_v12, %v4052_v42 }
 0x1f6   :  { %v4054_v1 = vpop.permute.xlu0 %894  ;;  %6381 = vst [vmem:[#allocation121_spill] sm:$0xff] %v4056_v24  ;;  %6382 = vst [vmem:[#allocation122_spill] sm:$0xff] %v4058_v50  ;;  %v1797_v16 = vpop.permute.xlu1 %1796  ;;  %2174 = vrot.lane.b32.xlu1 %v1982_v36, %s2936_s24  ;;  %v1983_v39 = vadd.f32 %v1967_v26, %v1951_v57  ;;  %v585_v18 = vadd.f32 %v569_v43, %v521_v62  ;;  %v2018_v38 = vmul.f32 %v3637_v15, %v6383_v4  ;;  %v6386_v24 = vld [vmem:[#allocation94_spill] sm:$0xff] }
 0x1f7   :  { %v917_v30 = vmul.f32 %v4054_v1, %v3295_v34  ;;  %v2019_v52 = vmul.f32 %v3329_v2, %v6383_v4  ;;  %v4094_v36 = vmul.f32 %v6385_v63, %v6384_v8  ;;  %v4097_v50 = vmul.f32 %v1828_v21, %v3682_v54  ;;  %v6388_v15 = vld [vmem:[#allocation102_spill] sm:$0xff] }
 0x1f8   :  { %v869_v40 = vmul.f32 %v6386_v24, %v3892_v13  ;;  %v2096_v26 = vmul.f32 %v3548_v45, %v3874_v28  ;;  %v1923_v43 = vmul.f32 %v4066_v6, %v3928_v10  ;;  %v918_v62 = vmul.f32 %v4054_v1, %v3389_v51 }
 0x1f9   :  { %v1821_v21 = vsel %vm349_vm0, %v1797_v16, %v3950_v47  ;;  %v1829_v4 = vsel %vm349_vm0, %v3950_v47, %v1797_v16  ;;  %v649_v34 = vadd.f32 %v633_v33, %v585_v18  ;;  %v870_v0 = vmul.f32 %v6386_v24, %v3908_v20  ;;  %v6387_v47 = vld [vmem:[#allocation99_spill] sm:$0xff] }
 0x1fa   :  { %v1859_v57 = vpop.permute.xlu1 %1858  ;;  %2190 = vrot.lane.b32.xlu1 %v1983_v39, %s2936_s24  ;;  %v933_v60 = vadd.f32 %v917_v30, %v869_v40  ;;  %v981_v16 = vmul.f32 %v6387_v47, %v3924_v58  ;;  %v2080_v63 = vmul.f32 %v6388_v15, %v3834_v22  ;;  %v4140_v40 = vmul.f32 %v1821_v21, %v3704_v49 }
 0x1fb   :  { %v1884_v45 = vsel %vm425_vm1, %v1859_v57, %v3964_v5  ;;  %v1892_v13 = vsel %vm425_vm1, %v3964_v5, %v1859_v57  ;;  %v2002_v5 = vmul.f32 %v4097_v50, %v6389_v3  ;;  %v2003_v57 = vmul.f32 %v4066_v6, %v6389_v3 }
 0x1fc   :  { %v4121_v51 = vmul.f32 %v1884_v45, %v3707_v19  ;;  %v4124_v39 = vmul.f32 %v1892_v13, %v3721_v31  ;;  %v4137_v13 = vmul.f32 %v1829_v4, %v3682_v54  ;;  %v982_v15 = vmul.f32 %v6387_v47, %v3944_v37  ;;  %v6391_v4 = vld [vmem:[#allocation97_spill] sm:$0xff] }
 0x1fd   :  { %v2097_v18 = vmul.f32 %v3307_v48, %v3874_v28  ;;  %v1955_v45 = vadd.f32 %v1939_v29, %v1923_v43  ;;  %v934_v3 = vadd.f32 %v918_v62, %v870_v0  ;;  %v997_v49 = vadd.f32 %v981_v16, %v933_v60  ;;  %v6392_v0 = vld [vmem:[#allocation75_spill] sm:$0xff] }
 0x1fe   :  { %v1971_v33 = vmul.f32 %v4124_v39, %v3699_v12  ;;  %v4144_v30 = vpop.permute.xlu1 %970  ;;  %1073 = vrot.lane.b32.xlu1 %v649_v34, %s2936_s24  ;;  %v2050_v58 = vmul.f32 %v4121_v51, %v6391_v4  ;;  %v2051_v21 = vmul.f32 %v4124_v39, %v6391_v4  ;;  %v2112_v20 = vadd.f32 %v2096_v26, %v2080_v63  ;;  %v6393_v26 = vld [vmem:[#allocation24_spill] sm:$0xff]  ;;  %v6394_v62 = vld [vmem:[#allocation103_spill] sm:$0xff] }
 0x1ff   :  { %6390 = vst [vmem:[#allocation89_spill] sm:$0xff] %v4144_v30  ;;  %v2128_v30 = vmul.f32 %v3855_v9, %v3957_v41  ;;  %v1922_v34 = vmul.f32 %v4097_v50, %v3928_v10  ;;  %v2034_v37 = vadd.f32 %v2018_v38, %v2002_v5  ;;  %v2035_v2 = vadd.f32 %v2019_v52, %v2003_v57  ;;  %v6396_v57 = vld [vmem:[#allocation90_spill] sm:$0xff] }
 0x200   :  { %v1987_v42 = vadd.f32 %v1971_v33, %v1955_v45  ;;  %v2094_v48 = vmul.f32 %v3598_v35, %v4054_v1  ;;  %v2004_v28 = vmul.f32 %v4137_v13, %v6392_v0  ;;  %v2005_v29 = vmul.f32 %v4140_v40, %v6392_v0 }
 0x201   :  { %v1970_v9 = vmul.f32 %v4121_v51, %v3699_v12  ;;  %v998_v38 = vadd.f32 %v982_v15, %v934_v3  ;;  %v4183_v12 = vadd.f32 %v2051_v21, %v2035_v2  ;;  %v2021_v43 = vmul.f32 %v6393_v26, %v6384_v8  ;;  %v6398_v15 = vld [vmem:[#allocation57_spill] sm:$0xff] }
 0x202   :  { %v1877_v60 = vpop.permute.xlu1 %1876  ;;  %1161 = vrot.lane.b32.xlu1 %v997_v49, %s2937_s28  ;;  %2194 = vrot.lane.b32.xlu0 %v1987_v42, %s2936_s24  ;;  %v4181_v49 = vadd.f32 %v2050_v58, %v2034_v37  ;;  %v2081_v16 = vmul.f32 %v6394_v62, %v3834_v22  ;;  %v2144_v3 = vadd.f32 %v2128_v30, %v2112_v20  ;;  %v6397_v58 = vld [vmem:[#allocation32_spill] sm:$0xff] }
 0x203   :  { %v1885_v10 = vsel %vm425_vm1, %v3976_v11, %v1877_v60  ;;  %v1893_v35 = vsel %vm425_vm1, %v1877_v60, %v3976_v11  ;;  %v6395_v11 = vld [vmem:[#allocation105_spill] sm:$0xff]  ;;  %v2078_v5 = vmul.f32 %v3979_v61, %v6386_v24  ;;  %v1954_v37 = vadd.f32 %v4074_v23, %v1922_v34  ;;  %v6399_v23 = vld [vmem:[#allocation36_spill] sm:$0xff] }
 0x204   :  { %v4176_v52 = vmul.f32 %v1885_v10, %v3707_v19  ;;  %v4179_v63 = vmul.f32 %v1893_v35, %v3721_v31  ;;  %v2129_v42 = vmul.f32 %v6395_v11, %v3957_v41  ;;  %v572_v22 = vmul.f32 %v6398_v15, %v6397_v58  ;;  %v6400_v10 = vld [vmem:[#allocation71_spill] sm:$0xff] }
 0x205   :  { %v4203_v41 = vmul.f32 %v3721_v31, %v4082_v56  ;;  %v2095_v20 = vmul.f32 %v3297_v14, %v4054_v1  ;;  %v2113_v61 = vadd.f32 %v2097_v18, %v2081_v16  ;;  %v2036_v30 = vadd.f32 %v4094_v36, %v2004_v28  ;;  %v6402_v56 = vld [vmem:[#allocation115_spill] sm:$0xff]  ;;  %v6403_v28 = vld [vmem:[#allocation112_spill] sm:$0xff] }
 0x206   :  { %v2052_v33 = vmul.f32 %v4176_v52, %v6396_v57  ;;  %v2053_v2 = vmul.f32 %v4179_v63, %v6396_v57  ;;  %1177 = vrot.lane.b32.xlu1 %v998_v38, %s2937_s28  ;;  %2256 = vrot.lane.b32.xlu0 %v2144_v3, %s2937_s28  ;;  %v2037_v45 = vadd.f32 %v2021_v43, %v2005_v29  ;;  %v6401_v38 = vld [vmem:[#allocation31_spill] sm:$0xff]  ;;  %v6404_v29 = vld [vmem:[#allocation96_spill] sm:$0xff] }
 0x207   :  { %v1986_v21 = vadd.f32 %v1970_v9, %v1954_v37  ;;  %v2110_v60 = vadd.f32 %v2094_v48, %v2078_v5  ;;  %v524_v34 = vmul.f32 %v6399_v23, %v4070_v46  ;;  %v636_v35 = vmul.f32 %v6400_v10, %v4203_v41  ;;  %v6405_v3 = vld [vmem:[#allocation23_spill] sm:$0xff] }
 0x208   :  { %v922_v62 = vmul.f32 %v6402_v56, %v6401_v38  ;;  %v2145_v11 = vadd.f32 %v2129_v42, %v2113_v61  ;;  %v2079_v14 = vmul.f32 %v3982_v53, %v6386_v24  ;;  %v2126_v1 = vmul.f32 %v4007_v25, %v6387_v47 }
 0x209   :  { %v4220_v36 = vadd.f32 %v2052_v33, %v2036_v30  ;;  %v4222_v18 = vadd.f32 %v2053_v2, %v2037_v45  ;;  %v433_v48 = vsel %vm425_vm1, %v3573_v7, %v3647_v32  ;;  %v874_v9 = vmul.f32 %v6404_v29, %v6403_v28  ;;  %v6406_v32 = vld [vmem:[#allocation114_spill] sm:$0xff] }
 0x20a   :  { %2178 = vrot.lane.b32.xlu1 %v1986_v21, %s2936_s24  ;;  %2272 = vrot.lane.b32.xlu0 %v2145_v11, %s2937_s28  ;;  %v588_v53 = vadd.f32 %v572_v22, %v524_v34  ;;  %v4233_v25 = vmul.f32 %v3682_v54, %v4049_v27  ;;  %v2142_v24 = vadd.f32 %v2126_v1, %v2110_v60  ;;  %v6407_v2 = vld [vmem:[#allocation106_spill] sm:$0xff] }
 0x20b   :  { %v2111_v43 = vadd.f32 %v2095_v20, %v2079_v14  ;;  %v938_v42 = vadd.f32 %v922_v62, %v874_v9  ;;  %v571_v5 = vmul.f32 %v6398_v15, %v6405_v3  ;;  %v4238_v33 = vmul.f32 %v3707_v19, %v433_v48  ;;  %v6408_v14 = vld [vmem:[#allocation22_spill] sm:$0xff] }
 0x20c   :  { %v652_v16 = vadd.f32 %v636_v35, %v588_v53  ;;  %v2127_v7 = vmul.f32 %v4010_v55, %v6387_v47  ;;  %v986_v37 = vmul.f32 %v6407_v2, %v6406_v32  ;;  %v1925_v27 = vmul.f32 %v4140_v40, %v6399_v23  ;;  %v6409_v53 = vld [vmem:[#allocation120_spill] sm:$0xff] }
 0x20d   :  { %v523_v22 = vmul.f32 %v6399_v23, %v4233_v25  ;;  %v635_v20 = vmul.f32 %v6400_v10, %v4238_v33  ;;  %v921_v61 = vmul.f32 %v6402_v56, %v3327_v17  ;;  %v1941_v47 = vmul.f32 %v6393_v26, %v6398_v15 }
 0x20e   :  { %2254 = vrot.lane.b32.xlu1 %v2142_v24, %s2937_s28  ;;  %1091 = vrot.lane.b32.xlu0 %v652_v16, %s2936_s24  ;;  %v2143_v55 = vadd.f32 %v2127_v7, %v2111_v43  ;;  %v1973_v30 = vmul.f32 %v4179_v63, %v6400_v10  ;;  %v1002_v45 = vadd.f32 %v986_v37, %v938_v42 }
 0x20f   :  { %v873_v21 = vmul.f32 %v6404_v29, %v4002_v44  ;;  %v587_v60 = vadd.f32 %v571_v5, %v523_v22  ;;  %v2083_v34 = vmul.f32 %v4066_v6, %v6404_v29  ;;  %v1957_v35 = vadd.f32 %v1941_v47, %v1925_v27  ;;  %v6410_v6 = vld [vmem:[#allocation119_spill] sm:$0xff]  ;;  %v6412_v27 = vld [vmem:[#allocation104_spill] sm:$0xff] }
 0x210   :  { %v2099_v1 = vmul.f32 %v6408_v14, %v6402_v56  ;;  %v2131_v48 = vmul.f32 %v4124_v39, %v6407_v2  ;;  %v985_v24 = vmul.f32 %v6407_v2, %v6409_v53  ;;  %v1924_v43 = vmul.f32 %v4137_v13, %v6399_v23  ;;  %v6411_v5 = vld [vmem:[#allocation59_spill] sm:$0xff]  ;;  %v6413_v23 = vld [vmem:[#allocation89_spill] sm:$0xff] }
 0x211   :  { %v651_v62 = vadd.f32 %v635_v20, %v587_v60  ;;  %v937_v11 = vadd.f32 %v921_v61, %v873_v21  ;;  %v1989_v9 = vadd.f32 %v1973_v30, %v1957_v35  ;;  %v924_v16 = vmul.f32 %v6410_v6, %v6397_v58  ;;  %v6414_v30 = vld [vmem:[#allocation58_spill] sm:$0xff] }
 0x212   :  { %2270 = vrot.lane.b32.xlu1 %v2143_v55, %s2937_s28  ;;  %1181 = vrot.lane.b32.xlu0 %v1002_v45, %s2937_s28  ;;  %v2115_v42 = vadd.f32 %v2099_v1, %v2083_v34  ;;  %v1940_v7 = vmul.f32 %v6411_v5, %v6398_v15  ;;  %v1972_v39 = vmul.f32 %v4176_v52, %v6400_v10 }
 0x213   :  { %v1001_v37 = vadd.f32 %v985_v24, %v937_v11  ;;  %v876_v22 = vmul.f32 %v6412_v27, %v4070_v46  ;;  %v988_v20 = vmul.f32 %v6413_v23, %v4203_v41  ;;  %v2082_v55 = vmul.f32 %v4097_v50, %v6404_v29 }
 0x214   :  { %v2147_v61 = vadd.f32 %v2131_v48, %v2115_v42  ;;  %v1956_v47 = vadd.f32 %v1940_v7, %v1924_v43  ;;  %v2085_v15 = vmul.f32 %v4140_v40, %v6412_v27  ;;  %v2098_v45 = vmul.f32 %v6414_v30, %v6402_v56  ;;  %v1072_v43 = vpop.permute.xlu0 %1071  ;;  %v6415_v42 = vld [vmem:[#allocation21_spill] sm:$0xff]  ;;  %v6416_v7 = vld [vmem:[#allocation87_spill] sm:$0xff]  ;;  %v6421_v30 = vld [vmem:[#allocation68_spill] sm:$0xff] }
 0x215   :  { %v940_v10 = vadd.f32 %v924_v16, %v876_v22  ;;  %v2130_v21 = vmul.f32 %v4121_v51, %v6407_v2  ;;  %v2101_v34 = vmul.f32 %v6393_v26, %v6410_v6  ;;  %v2133_v50 = vmul.f32 %v4179_v63, %v6413_v23  ;;  %v6419_v22 = vld [vmem:[#allocation73_spill] sm:$0xff] }
 0x216   :  { %1075 = vrot.lane.b32.xlu1 %v651_v62, %s2936_s24  ;;  %2196 = vrot.lane.b32.xlu0 %v1989_v9, %s2936_s24  ;;  %v1988_v60 = vadd.f32 %v1972_v39, %v1956_v47  ;;  %v923_v40 = vmul.f32 %v6410_v6, %v6405_v3  ;;  %v2114_v35 = vadd.f32 %v2098_v45, %v2082_v55  ;;  %v6422_v45 = vld [vmem:[#allocation88_spill] sm:$0xff] }
 0x217   :  { %v1004_v29 = vadd.f32 %v988_v20, %v940_v10  ;;  %v2117_v56 = vadd.f32 %v2101_v34, %v2085_v15  ;;  %v875_v51 = vmul.f32 %v6412_v27, %v4233_v25  ;;  %v987_v2 = vmul.f32 %v6413_v23, %v4238_v33  ;;  %v2747_v10 = vld [vmem:[%s6029_s1 + $0x2] ss:$4 sm:$0x3] }
 0x218   :  { %v2146_v26 = vadd.f32 %v2130_v21, %v2114_v35  ;;  %v2084_v63 = vmul.f32 %v4137_v13, %v6412_v27  ;;  %v2100_v14 = vmul.f32 %v6411_v5, %v6410_v6  ;;  %v2132_v1 = vmul.f32 %v4176_v52, %v6413_v23  ;;  %v1088_v13 = vpop.permute.xlu0 %1087  ;;  %v6418_v5 = vld [vmem:[#allocation64_spill] sm:$0xff]  ;;  %v6420_v23 = vld [vmem:[#allocation67_spill] sm:$0xff] }
 0x219   :  { %v2149_v62 = vadd.f32 %v2133_v50, %v2117_v56  ;;  %v939_v11 = vadd.f32 %v923_v40, %v875_v51  ;;  %v743_v39 = vmul.f32 %v6416_v7, %v6415_v42  ;;  %v695_v52 = vmul.f32 %v6419_v22, %v6418_v5  ;;  %v2748_v50 = vld [vmem:[%s6029_s1 + $0x3] ss:$4 sm:$0x3]  ;;  %v6426_v35 = vld [vmem:[#allocation7_spill] sm:$0xff] }
 0x21a   :  { %1165 = vrot.lane.b32.xlu1 %v1001_v37, %s2937_s28  ;;  %2274 = vrot.lane.b32.xlu0 %v2147_v61, %s2937_s28  ;;  %v2116_v9 = vadd.f32 %v2100_v14, %v2084_v63  ;;  %v6417_v37 = vld [vmem:[#allocation30_spill] sm:$0xff]  ;;  %v696_v20 = vmul.f32 %v6419_v22, %v6420_v23  ;;  %v4324_v61 = vpop.permute.xlu1 %1032  ;;  %v807_v21 = vmul.f32 %v6422_v45, %v6421_v30  ;;  %v6432_v30 = vld [vmem:[#allocation20_spill] sm:$0xff] }
 0x21b   :  { %v1003_v48 = vadd.f32 %v987_v2, %v939_v11  ;;  %v744_v27 = vmul.f32 %v6416_v7, %v6417_v37  ;;  %v759_v55 = vadd.f32 %v743_v39, %v695_v52  ;;  %v4343_v56 = vrot.slane %v2747_v10, %v6426_v35 }
 0x21c   :  { %v2148_v24 = vadd.f32 %v2132_v1, %v2116_v9  ;;  %v1099_v63 = vsel %vm1093_vm2, %v1072_v43, %v1088_v13  ;;  %v1107_v11 = vsel %vm1093_vm2, %v1088_v13, %v1072_v43  ;;  %v4358_v9 = vrot.slane %v2748_v50, %v6426_v35  ;;  %v6435_v35 = vld [vmem:[#allocation110_spill] sm:$0xff] }
 0x21d   :  { %v760_v47 = vadd.f32 %v744_v27, %v696_v20  ;;  %6427 = vst [vmem:[#allocation99_spill] sm:$0xff] %v4343_v56  ;;  %v823_v51 = vadd.f32 %v807_v21, %v759_v55  ;;  %v1132_v42 = vmul.f32 %v4343_v56, %v1099_v63 }
 0x21e   :  { %2180 = vrot.lane.b32.xlu1 %v1988_v60, %s2936_s24  ;;  %1183 = vrot.lane.b32.xlu0 %v1004_v29, %s2937_s28  ;;  %v6423_v60 = vld [vmem:[#allocation69_spill] sm:$0xff]  ;;  %v6424_v29 = vld [vmem:[#allocation6_spill] sm:$0xff]  ;;  %6429 = vst [vmem:[#allocation97_spill] sm:$0xff] %v4358_v9 }
 0x21f   :  { %v808_v34 = vmul.f32 %v6422_v45, %v6423_v60  ;;  %v4340_v40 = vrot.slane %v2747_v10, %v6424_v29  ;;  %v1055_v14 = vadd.f32 %v4324_v61, %v823_v51  ;;  %v6433_v45 = vld [vmem:[#allocation80_spill] sm:$0xff]  ;;  %v6434_v60 = vld [vmem:[#allocation29_spill] sm:$0xff] }
 0x220   :  { %v741_v21 = vmul.f32 %v6433_v45, %v6432_v30  ;;  %v6436_v51 = vld [vmem:[#allocation77_spill] sm:$0xff] }
 0x221   :  { %6425 = vst [vmem:[#allocation94_spill] sm:$0xff] %v4340_v40  ;;  %v824_v2 = vadd.f32 %v808_v34, %v760_v47  ;;  %v742_v34 = vmul.f32 %v6433_v45, %v6434_v60 }
 0x222   :  { %2258 = vrot.lane.b32.xlu1 %v2146_v26, %s2937_s28  ;;  %2276 = vrot.lane.b32.xlu0 %v2149_v62, %s2937_s28  ;;  %v4345_v26 = vpop.permute.xlu1 %1037 }
 0x223   :  { %v1056_v1 = vadd.f32 %v4324_v61, %v824_v2  ;;  %v693_v2 = vmul.f32 %v6436_v51, %v6435_v35 }
 0x225   :  { %v1148_v27 = vadd.f32 %v1132_v42, %v1056_v1 }
 0x226   :  { %1167 = vrot.lane.b32.xlu1 %v1003_v48, %s2937_s28  ;;  %v4355_v48 = vrot.slane %v2748_v50, %v6424_v29 }
 0x228   :  { %6428 = vst [vmem:[#allocation102_spill] sm:$0xff] %v4355_v48 }
 0x22a   :  { %2260 = vrot.lane.b32.xlu1 %v2148_v24, %s2937_s28  ;;  %v1131_v24 = vmul.f32 %v4340_v40, %v1107_v11  ;;  %v6438_v11 = vld [vmem:[#allocation113_spill] sm:$0xff] }
 0x22c   :  { %v1147_v13 = vadd.f32 %v1131_v24, %v1055_v14  ;;  %v6439_v14 = vld [vmem:[#allocation95_spill] sm:$0xff]  ;;  %v6440_v24 = vld [vmem:[#allocation116_spill] sm:$0xff] }
 0x22d   :  { %v805_v1 = vmul.f32 %v6439_v14, %v6438_v11  ;;  %v806_v42 = vmul.f32 %v6439_v14, %v6440_v24  ;;  %v6442_v24 = vld [vmem:[#allocation107_spill] sm:$0xff] }
 0x246   :  { %v2177_v16 = vpop.permute.xlu0 %2176 }
 0x24a   :  { %v2193_v6 = vpop.permute.xlu0 %2192 }
 0x24b   :  { %v2203_v30 = vsel %vm1093_vm2, %v2177_v16, %v2193_v6  ;;  %v2211_v45 = vsel %vm1093_vm2, %v2193_v6, %v2177_v16 }
 0x252   :  { %v1070_v7 = vpop.permute.xlu1 %1069 }
 0x256   :  { %v4326_v15 = vpop.permute.xlu0 %1089  ;;  %v1086_v20 = vpop.permute.xlu1 %1085 }
 0x25a   :  { %v1164_v62 = vpop.permute.xlu0 %1163 }
 0x25e   :  { %v1180_v39 = vpop.permute.xlu0 %1179 }
 0x25f   :  { %v1191_v37 = vsel %vm1185_vm3, %v1164_v62, %v1180_v39  ;;  %v1199_v43 = vsel %vm1185_vm3, %v1180_v39, %v1164_v62  ;;  %v6437_v62 = vld [vmem:[#allocation111_spill] sm:$0xff]  ;;  %v757_v39 = vadd.f32 %v741_v21, %v693_v2  ;;  %v2225_v2 = vmul.f32 %v2203_v30, %v4343_v56 }
 0x260   :  { %v1223_v5 = vmul.f32 %v4355_v48, %v1191_v37  ;;  %v1224_v22 = vmul.f32 %v4358_v9, %v1199_v43  ;;  %v694_v63 = vmul.f32 %v6436_v51, %v6437_v62  ;;  %v1098_v43 = vsel %vm1093_vm2, %v1070_v7, %v1086_v20 }
 0x261   :  { %v1130_v60 = vmul.f32 %v4343_v56, %v1098_v43 }
 0x262   :  { %v4368_v52 = vadd.f32 %v1223_v5, %v1147_v13  ;;  %v4370_v23 = vadd.f32 %v1224_v22, %v1148_v27  ;;  %v758_v37 = vadd.f32 %v742_v34, %v694_v63  ;;  %v1106_v13 = vsel %vm1093_vm2, %v1086_v20, %v1070_v7  ;;  %v6441_v34 = vld [vmem:[#allocation117_spill] sm:$0xff] }
 0x263   :  { %v821_v5 = vadd.f32 %v805_v1, %v757_v39  ;;  %v1129_v21 = vmul.f32 %v4340_v40, %v1106_v13  ;;  %v2224_v20 = vmul.f32 %v2211_v45, %v4340_v40  ;;  %v6443_v39 = vld [vmem:[#allocation108_spill] sm:$0xff] }
 0x264   :  { %6430 = vst [vmem:[#allocation75_spill] sm:$0xff] %v4368_v52  ;;  %6431 = vst [vmem:[#allocation24_spill] sm:$0xff] %v4370_v23  ;;  %v1248_v55 = vadd.f32 %v4370_v23, %v4368_v52  ;;  %v822_v22 = vadd.f32 %v806_v42, %v758_v37  ;;  %v2160_v42 = vadd.f32 %v6442_v24, %v4324_v61 }
 0x265   :  { %v1053_v35 = vadd.f32 %v6441_v34, %v821_v5  ;;  %v2161_v37 = vadd.f32 %v6443_v39, %v4324_v61 }
 0x266   :  { %1249 = vadd.xlane.f32.xlu0 %v1248_v55  ;;  %v1054_v51 = vadd.f32 %v6441_v34, %v822_v22  ;;  %v2240_v22 = vadd.f32 %v2224_v20, %v2160_v42 }
 0x267   :  { %v1145_v6 = vadd.f32 %v1129_v21, %v1053_v35  ;;  %v2241_v30 = vadd.f32 %v2225_v2, %v2161_v37 }
 0x268   :  { %v2175_v47 = vpop.permute.xlu1 %2174  ;;  %v1146_v11 = vadd.f32 %v1130_v60, %v1054_v51 }
 0x26c   :  { %v2191_v10 = vpop.permute.xlu1 %2190 }
 0x26d   :  { %v2210_v45 = vsel %vm1093_vm2, %v2191_v10, %v2175_v47  ;;  %v2202_v61 = vsel %vm1093_vm2, %v2175_v47, %v2191_v10  ;;  %v6448_v47 = vld [vmem:[#allocation79_spill] sm:$0xff] }
 0x26e   :  { %v2222_v2 = vmul.f32 %v2210_v45, %v4340_v40  ;;  %v697_v10 = vmul.f32 %v6448_v47, %v4002_v44  ;;  %v698_v39 = vmul.f32 %v6448_v47, %v6403_v28  ;;  %v6451_v44 = vld [vmem:[#allocation122_spill] sm:$0xff] }
 0x270   :  { %v4378_v50 = vpop.permute.xlu1 %1073 }
 0x274   :  { %v1162_v27 = vpop.permute.xlu1 %1161  ;;  %v4392_v55 = vpop.permute.xlu0 %2194 }
 0x278   :  { %v1178_v7 = vpop.permute.xlu1 %1177  ;;  %v2257_v62 = vpop.permute.xlu0 %2256 }
 0x279   :  { %v1190_v63 = vsel %vm1185_vm3, %v1162_v27, %v1178_v7  ;;  %v1198_v16 = vsel %vm1185_vm3, %v1178_v7, %v1162_v27 }
 0x27a   :  { %v1221_v14 = vmul.f32 %v4355_v48, %v1190_v63  ;;  %v1222_v1 = vmul.f32 %v4358_v9, %v1198_v16 }
 0x27c   :  { %v4414_v43 = vpop.permute.xlu1 %2178  ;;  %v4416_v13 = vadd.f32 %v1221_v14, %v1145_v6  ;;  %v4418_v5 = vadd.f32 %v1222_v1, %v1146_v11  ;;  %v2273_v27 = vpop.permute.xlu0 %2272  ;;  %v6449_v11 = vld [vmem:[#allocation81_spill] sm:$0xff] }
 0x27d   :  { %v2283_v21 = vsel %vm1185_vm3, %v2257_v62, %v2273_v27  ;;  %v2291_v60 = vsel %vm1185_vm3, %v2273_v27, %v2257_v62  ;;  %v2223_v62 = vmul.f32 %v2202_v61, %v4343_v56  ;;  %v745_v14 = vmul.f32 %v6449_v11, %v3327_v17  ;;  %v6450_v1 = vld [vmem:[#allocation121_spill] sm:$0xff] }
 0x27e   :  { %6444 = vst [vmem:[#allocation103_spill] sm:$0xff] %v4416_v13  ;;  %6445 = vst [vmem:[#allocation105_spill] sm:$0xff] %v4418_v5  ;;  %v2304_v35 = vmul.f32 %v2283_v21, %v4355_v48  ;;  %v2305_v51 = vmul.f32 %v2291_v60, %v4358_v9  ;;  %v1245_v7 = vadd.f32 %v4418_v5, %v4416_v13 }
 0x27f   :  { %v2158_v24 = vadd.f32 %v6450_v1, %v6441_v34  ;;  %v746_v37 = vmul.f32 %v6449_v11, %v6401_v38  ;;  %v2159_v27 = vadd.f32 %v6451_v44, %v6441_v34  ;;  %v810_v17 = vmul.f32 %v6391_v4, %v6406_v32 }
 0x280   :  { %v2255_v20 = vpop.permute.xlu1 %2254  ;;  %v4433_v63 = vadd.f32 %v2304_v35, %v2240_v22  ;;  %v4435_v16 = vadd.f32 %v2305_v51, %v2241_v30  ;;  %v4437_v6 = vpop.permute.xlu0 %1091  ;;  %1246 = vadd.xlane.f32.xlu1 %v1245_v7  ;;  %v809_v22 = vmul.f32 %v6391_v4, %v6409_v53  ;;  %v1108_v53 = vsel %vm1093_vm2, %v4326_v15, %v4378_v50 }
 0x281   :  { %v2238_v45 = vadd.f32 %v2222_v2, %v2158_v24  ;;  %v2239_v38 = vadd.f32 %v2223_v62, %v2159_v27  ;;  %v761_v4 = vadd.f32 %v745_v14, %v697_v10  ;;  %v1100_v32 = vsel %vm1093_vm2, %v4378_v50, %v4326_v15 }
 0x282   :  { %6446 = vst [vmem:[#allocation90_spill] sm:$0xff] %v4433_v63  ;;  %6447 = vst [vmem:[#allocation32_spill] sm:$0xff] %v4435_v16  ;;  %v2329_v42 = vadd.f32 %v4435_v16, %v4433_v63  ;;  %v762_v35 = vadd.f32 %v746_v37, %v698_v39  ;;  %v747_v2 = vmul.f32 %v6384_v8, %v6405_v3 }
 0x283   :  { %v825_v62 = vadd.f32 %v809_v22, %v761_v4  ;;  %v1133_v47 = vmul.f32 %v4340_v40, %v1108_v53  ;;  %v1134_v10 = vmul.f32 %v4343_v56, %v1100_v32  ;;  %v699_v15 = vmul.f32 %v6392_v0, %v4233_v25  ;;  %v6456_v32 = vld [vmem:[#allocation118_spill] sm:$0xff] }
 0x284   :  { %v2271_v30 = vpop.permute.xlu1 %2270  ;;  %v1182_v21 = vpop.permute.xlu0 %1181  ;;  %2330 = vadd.xlane.f32.xlu1 %v2329_v42  ;;  %v826_v11 = vadd.f32 %v810_v17, %v762_v35  ;;  %v700_v24 = vmul.f32 %v6392_v0, %v4070_v46  ;;  %v748_v3 = vmul.f32 %v6384_v8, %v6397_v58  ;;  %v2212_v46 = vsel %vm1093_vm2, %v4392_v55, %v4414_v43 }
 0x285   :  { %v2282_v60 = vsel %vm1185_vm3, %v2255_v20, %v2271_v30  ;;  %v2290_v28 = vsel %vm1185_vm3, %v2271_v30, %v2255_v20  ;;  %v1057_v50 = vadd.f32 %v4345_v26, %v825_v62  ;;  %v763_v37 = vadd.f32 %v747_v2, %v699_v15 }
 0x286   :  { %v2302_v34 = vmul.f32 %v2282_v60, %v4355_v48  ;;  %v2303_v61 = vmul.f32 %v2290_v28, %v4358_v9  ;;  %v1058_v42 = vadd.f32 %v4345_v26, %v826_v11  ;;  %v2204_v58 = vsel %vm1093_vm2, %v4414_v43, %v4392_v55 }
 0x287   :  { %v1149_v22 = vadd.f32 %v1133_v47, %v1057_v50  ;;  %v764_v30 = vadd.f32 %v748_v3, %v700_v24  ;;  %v811_v17 = vmul.f32 %v6396_v57, %v4238_v33  ;;  %v2226_v53 = vmul.f32 %v2212_v46, %v4340_v40 }
 0x288   :  { %v1076_v51 = vpop.permute.xlu1 %1075  ;;  %v4472_v7 = vadd.f32 %v2302_v34, %v2238_v45  ;;  %v4474_v20 = vadd.f32 %v2303_v61, %v2239_v38  ;;  %v2197_v14 = vpop.permute.xlu0 %2196  ;;  %v1150_v27 = vadd.f32 %v1134_v10, %v1058_v42  ;;  %v812_v38 = vmul.f32 %v6396_v57, %v4203_v41 }
 0x289   :  { %v1109_v34 = vsel %vm1093_vm2, %v4437_v6, %v1076_v51  ;;  %v2227_v55 = vmul.f32 %v2204_v58, %v4343_v56  ;;  %v827_v43 = vadd.f32 %v811_v17, %v763_v37  ;;  %v1101_v33 = vsel %vm1093_vm2, %v1076_v51, %v4437_v6 }
 0x28a   :  { %6452 = vst [vmem:[#allocation57_spill] sm:$0xff] %v4472_v7  ;;  %6453 = vst [vmem:[#allocation36_spill] sm:$0xff] %v4474_v20  ;;  %v2326_v1 = vadd.f32 %v4474_v20, %v4472_v7  ;;  %v2162_v4 = vadd.f32 %v4181_v49, %v4345_v26  ;;  %v2163_v57 = vadd.f32 %v4183_v12, %v4345_v26  ;;  %v6495_v7 = vld [vmem:[#allocation43_spill] sm:$0xff] }
 0x28b   :  { %v828_v41 = vadd.f32 %v812_v38, %v764_v30  ;;  %v1059_v35 = vadd.f32 %v6456_v32, %v827_v43  ;;  %v1135_v2 = vmul.f32 %v4340_v40, %v1109_v34  ;;  %v1136_v11 = vmul.f32 %v4343_v56, %v1101_v33 }
 0x28c   :  { %2327 = vadd.xlane.f32.xlu0 %v2326_v1  ;;  %v1166_v39 = vpop.permute.xlu1 %1165  ;;  %v2275_v45 = vpop.permute.xlu0 %2274  ;;  %v2242_v47 = vadd.f32 %v2226_v53, %v2162_v4  ;;  %v2243_v49 = vadd.f32 %v2227_v55, %v2163_v57  ;;  %v2165_v58 = vadd.f32 %v4222_v18, %v6456_v32  ;;  %v2895_v57 = vld [vmem:[%s6032_s4 + $0x8] sm:$0xff] }
 0x28d   :  { %v1192_v44 = vsel %vm1185_vm3, %v1166_v39, %v1182_v21  ;;  %v1200_v25 = vsel %vm1185_vm3, %v1182_v21, %v1166_v39  ;;  %v1060_v15 = vadd.f32 %v6456_v32, %v828_v41  ;;  %v1151_v24 = vadd.f32 %v1135_v2, %v1059_v35  ;;  %v2896_v41 = vld [vmem:[%s6032_s4] sm:$0xff] }
 0x28e   :  { %v1225_v8 = vmul.f32 %v4355_v48, %v1192_v44  ;;  %v1226_v0 = vmul.f32 %v4358_v9, %v1200_v25  ;;  %v6463_v35 = vld [vmem:[#allocation13_spill] sm:$0xff]  ;;  %v6464_v2 = vmov 8  }
 0x28f   :  { %v1152_v37 = vadd.f32 %v1136_v11, %v1060_v15  ;;  %v6466_v11 = vld [vmem:[#allocation12_spill] sm:$0xff] }
 0x290   :  { %v2181_v21 = vpop.permute.xlu1 %2180  ;;  %v4506_v60 = vadd.f32 %v1225_v8, %v1149_v22  ;;  %v4508_v28 = vadd.f32 %v1226_v0, %v1150_v27  ;;  %v1184_v10 = vpop.permute.xlu0 %1183  ;;  %v2164_v0 = vadd.f32 %v4220_v36, %v6456_v32  ;;  %v2897_v32 = vld [vmem:[%s6032_s4 + $0x10] sm:$0xff] }
 0x291   :  { %v2213_v12 = vsel %vm1093_vm2, %v2197_v14, %v2181_v21  ;;  %v2205_v50 = vsel %vm1093_vm2, %v2181_v21, %v2197_v14 }
 0x292   :  { %6454 = vst [vmem:[#allocation71_spill] sm:$0xff] %v4506_v60  ;;  %6455 = vst [vmem:[#allocation31_spill] sm:$0xff] %v4508_v28  ;;  %v1251_v61 = vadd.f32 %v4508_v28, %v4506_v60  ;;  %v2228_v22 = vmul.f32 %v2213_v12, %v4340_v40  ;;  %v2229_v27 = vmul.f32 %v2205_v50, %v4343_v56  ;;  %v6471_v12 = vld [vmem:[#allocation16_spill] sm:$0xff] }
 0x294   :  { %1252 = vadd.xlane.f32.xlu0 %v1251_v61  ;;  %v2259_v62 = vpop.permute.xlu1 %2258  ;;  %v2277_v30 = vpop.permute.xlu0 %2276  ;;  %v2244_v38 = vadd.f32 %v2228_v22, %v2164_v0  ;;  %v2245_v55 = vadd.f32 %v2229_v27, %v2165_v58  ;;  %v84_v27 = vld [vmem:[%s6034_s6 + $0x8] sm:$0xff] }
 0x295   :  { %v2284_v6 = vsel %vm1185_vm3, %v2259_v62, %v2275_v45  ;;  %v2292_v51 = vsel %vm1185_vm3, %v2275_v45, %v2259_v62  ;;  %v2898_v62 = vld [vmem:[%s6032_s4 + $0x18] sm:$0xff] }
 0x296   :  { %v2306_v26 = vmul.f32 %v2284_v6, %v4355_v48  ;;  %v2307_v1 = vmul.f32 %v2292_v51, %v4358_v9  ;;  %v6467_v6 = vld [vmem:[#allocation18_spill] sm:$0xff]  ;;  %v6468_v51 = vmov 0  }
 0x298   :  { %v1168_v3 = vpop.permute.xlu1 %1167  ;;  %v4540_v42 = vadd.f32 %v2306_v26, %v2242_v47  ;;  %v4542_v39 = vadd.f32 %v2307_v1, %v2243_v49  ;;  %v6465_v47 = vld [vmem:[#allocation15_spill] sm:$0xff]  ;;  %v6469_v49 = vld [vmem:[#allocation9_spill] sm:$0xff] }
 0x299   :  { %v1193_v44 = vsel %vm1185_vm3, %v1168_v3, %v1184_v10  ;;  %v1201_v25 = vsel %vm1185_vm3, %v1184_v10, %v1168_v3  ;;  %v6470_v10 = vld [vmem:[#allocation10_spill] sm:$0xff]  ;;  %v6472_v26 = vld [vmem:[#allocation19_spill] sm:$0xff]  ;;  %v75_v1 = vld [vmem:[%s6033_s5] sm:$0xff] }
 0x29a   :  { %6457 = vst [vmem:[#allocation115_spill] sm:$0xff] %v4540_v42  ;;  %6458 = vst [vmem:[#allocation112_spill] sm:$0xff] %v4542_v39  ;;  %v1227_v46 = vmul.f32 %v4355_v48, %v1193_v44  ;;  %v1228_v14 = vmul.f32 %v4358_v9, %v1201_v25  ;;  %v2332_v8 = vadd.f32 %v4542_v39, %v4540_v42  ;;  %v83_v25 = vld [vmem:[%s6034_s6] sm:$0xff] }
 0x29c   :  { %2333 = vadd.xlane.f32.xlu1 %v2332_v8  ;;  %v2261_v17 = vpop.permute.xlu1 %2260  ;;  %v4558_v45 = vadd.f32 %v1227_v46, %v1151_v24  ;;  %v4560_v21 = vadd.f32 %v1228_v14, %v1152_v37  ;;  %v85_v14 = vld [vmem:[%s6034_s6 + $0x10] sm:$0xff] }
 0x29d   :  { %v2285_v53 = vsel %vm1185_vm3, %v2261_v17, %v2277_v30  ;;  %v2293_v34 = vsel %vm1185_vm3, %v2277_v30, %v2261_v17 }
 0x29e   :  { %6459 = vst [vmem:[#allocation96_spill] sm:$0xff] %v4558_v45  ;;  %6460 = vst [vmem:[#allocation23_spill] sm:$0xff] %v4560_v21  ;;  %v2308_v36 = vmul.f32 %v2285_v53, %v4355_v48  ;;  %v2309_v43 = vmul.f32 %v2293_v34, %v4358_v9  ;;  %v1254_v18 = vadd.f32 %v4560_v21, %v4558_v45  ;;  %v6496_v9 = vld [vmem:[#allocation40_spill] sm:$0xff] }
 0x2a0   :  { %1255 = vadd.xlane.f32.xlu0 %v1254_v18  ;;  %v4570_v33 = vadd.f32 %v2308_v36, %v2244_v38  ;;  %v4572_v61 = vadd.f32 %v2309_v43, %v2245_v55  ;;  %v86_v43 = vld [vmem:[%s6034_s6 + $0x18] sm:$0xff] }
 0x2a2   :  { %6461 = vst [vmem:[#allocation114_spill] sm:$0xff] %v4570_v33  ;;  %6462 = vst [vmem:[#allocation106_spill] sm:$0xff] %v4572_v61  ;;  %v2335_v4 = vadd.f32 %v4572_v61, %v4570_v33 }
 0x2a4   :  { %2336 = vadd.xlane.f32.xlu1 %v2335_v4 }
 0x2b5   :  { %882 = vperm.xlu1 %2794, %v2895_v57  }
 0x2b6   :  { %878 = vperm.xlu0 %2793, %v2896_v41  }
 0x2b9   :  { %886 = vperm.xlu1 %2794, %v2897_v32  }
 0x2ba   :  { %1798 = vrot.lane.b32.xlu0 %v6463_v35, %s2927_s29 }
 0x2bb   :  { %2796 = vset.pattern.permute.xlu0 %v6464_v2 }
 0x2bd   :  { %890 = vperm.xlu1 %2794, %v2898_v62  }
 0x2be   :  { %1786 = vrot.lane.b32.xlu0 %v6465_v47, %s2927_s29 }
 0x2c1   :  { %2795 = vset.pattern.permute.xlu1 %v6464_v2 }
 0x2c2   :  { %1846 = vrot.lane.b32.xlu0 %v6466_v11, %s2928_s30  ;;  %942 = vperm.xlu1 %2795, %v2896_v41  }
 0x2c6   :  { %1862 = vrot.lane.b32.xlu0 %v6463_v35, %s2928_s30  ;;  %946 = vperm.xlu1 %2795, %v2895_v57  }
 0x2ca   :  { %1788 = vrot.lane.b32.xlu0 %v6467_v6, %s2927_s29  ;;  %950 = vperm.xlu1 %2795, %v2897_v32  }
 0x2ce   :  { %1850 = vrot.lane.b32.xlu0 %v6465_v47, %s2928_s30  ;;  %1782 = vrot.lane.b32.xlu1 %v6466_v11, %s2927_s29 }
 0x2cf   :  { %2797 = vset.pattern.permute.xlu1 %v6468_v51 }
 0x2d2   :  { %954 = vperm.xlu0 %2796, %v2898_v62   ;;  %1784 = vrot.lane.b32.xlu1 %v6469_v49, %s2927_s29 }
 0x2d6   :  { %1800 = vrot.lane.b32.xlu1 %v6470_v10, %s2927_s29  ;;  %2798 = vset.pattern.permute.xlu0 %v6468_v51 }
 0x2da   :  { %1802 = vrot.lane.b32.xlu1 %v6471_v12, %s2927_s29 }
 0x2de   :  { %1848 = vrot.lane.b32.xlu1 %v6469_v49, %s2928_s30 }
 0x2e2   :  { %1864 = vrot.lane.b32.xlu1 %v6470_v10, %s2928_s30 }
 0x2e6   :  { %1804 = vrot.lane.b32.xlu1 %v6472_v26, %s2927_s29 }
 0x2ea   :  { %1866 = vrot.lane.b32.xlu1 %v6471_v12, %s2928_s30 }
 0x2ee   :  { %1852 = vrot.lane.b32.xlu1 %v6467_v6, %s2928_s30 }
 0x2ef   :  { %v1250_v15 = vpop.xlane.xlu0 %1249 }
 0x2f0   :  { %v1259_v22 = vmul.f32 0.00390625, %v1250_v15 }
 0x2f2   :  { %1868 = vrot.lane.b32.xlu1 %v6472_v26, %s2928_s30  ;;  %v1263_v58 = vmul.f32 %v1259_v22, %v84_v27 }
 0x2f4   :  { %v1268_v36 = vsel %vm1266_vm4, %v1263_v58, 0.0 }
 0x2f6   :  { %1007 = vperm.xlu1 %2797, %v75_v1  }
 0x309   :  { %v1247_v50 = vpop.xlane.xlu1 %1246 }
 0x30a   :  { %v1258_v37 = vmul.f32 0.00390625, %v1247_v50 }
 0x30c   :  { %v1262_v8 = vmul.f32 %v1258_v37, %v83_v25 }
 0x30d   :  { %v2331_v44 = vpop.xlane.xlu1 %2330 }
 0x30e   :  { %v2339_v17 = vmul.f32 0.00390625, %v2331_v44  ;;  %v1267_v34 = vsel %vm1266_vm4, %v1262_v8, 0.0 }
 0x30f   :  { %v1269_v2 = vadd.f32 %v1268_v36, %v1267_v34 }
 0x310   :  { %v2343_v4 = vmul.f32 %v2339_v17, %v84_v27 }
 0x312   :  { %v2347_v50 = vsel %vm1266_vm4, %v2343_v4, 0.0 }
 0x315   :  { %v2328_v24 = vpop.xlane.xlu0 %2327 }
 0x316   :  { %v2338_v0 = vmul.f32 0.00390625, %v2328_v24 }
 0x318   :  { %v2342_v55 = vmul.f32 %v2338_v0, %v83_v25 }
 0x31a   :  { %v2346_v62 = vsel %vm1266_vm4, %v2342_v55, 0.0 }
 0x31b   :  { %v2348_v22 = vadd.f32 %v2347_v50, %v2346_v62  ;;  %v6476_v62 = vld [vmem:[#allocation41_spill] sm:$0xff] }
 0x31d   :  { %v1253_v3 = vpop.xlane.xlu0 %1252 }
 0x31e   :  { %v1260_v46 = vmul.f32 0.00390625, %v1253_v3 }
 0x320   :  { %v1264_v38 = vmul.f32 %v1260_v46, %v85_v14 }
 0x322   :  { %v1270_v57 = vsel %vm1266_vm4, %v1264_v38, 0.0 }
 0x323   :  { %v1271_v1 = vadd.f32 %v1270_v57, %v1269_v2 }
 0x325   :  { %v2334_v30 = vpop.xlane.xlu1 %2333 }
 0x326   :  { %v2340_v53 = vmul.f32 0.00390625, %v2334_v30 }
 0x328   :  { %v2344_v41 = vmul.f32 %v2340_v53, %v85_v14 }
 0x329   :  { %v1256_v18 = vpop.xlane.xlu0 %1255 }
 0x32a   :  { %v1261_v32 = vmul.f32 0.00390625, %v1256_v18  ;;  %v2349_v24 = vsel %vm1266_vm4, %v2344_v41, 0.0  ;;  %v87_v41 = vld [vmem:[%s6035_s7] sm:$0x1] }
 0x32b   :  { %v2350_v27 = vadd.f32 %v2349_v24, %v2348_v22 }
 0x32c   :  { %v1265_v51 = vmul.f32 %v1261_v32, %v86_v43 }
 0x32d   :  { %v2337_v15 = vpop.xlane.xlu1 %2336 }
 0x32e   :  { %v1272_v3 = vsel %vm1266_vm4, %v1265_v51, 0.0  ;;  %v2341_v37 = vmul.f32 0.00390625, %v2337_v15  ;;  %v6477_v51 = vld [vmem:[#allocation45_spill] sm:$0xff] }
 0x32f   :  { %v1273_v44 = vadd.f32 %v1272_v3, %v1271_v1  ;;  %v360_v1 = vsel %vm349_vm0, %v6477_v51, %v6476_v62 }
 0x330   :  { %v2345_v25 = vmul.f32 %v2341_v37, %v86_v43 }
 0x331   :  { %v1274_v46 = vrot.slane %v1273_v44, 4  ;;  %v4646_v14 = vpop.permute.xlu0 %878  ;;  %v4648_v8 = vpop.permute.xlu1 %882 }
 0x332   :  { %6473 = vst [vmem:[#allocation22_spill] sm:$0xff] %v4646_v14  ;;  %v2351_v0 = vsel %vm1266_vm4, %v2345_v25, 0.0  ;;  %v89_v25 = vld [vmem:[%s6036_s8 + $0x8] sm:$0xff] }
 0x333   :  { %v1275_v58 = vadd.f32 %v1274_v46, %v1273_v44  ;;  %v2352_v30 = vadd.f32 %v2351_v0, %v2350_v27  ;;  %v4667_v44 = vmul.f32 %v3682_v54, %v360_v1  ;;  %v88_v27 = vld [vmem:[%s6036_s8] sm:$0xff] }
 0x334   :  { %v6480_v46 = vld [vmem:[#allocation53_spill] sm:$0xff] }
 0x335   :  { %v1276_v17 = vrot.slane %v1275_v58, 2  ;;  %v2353_v38 = vrot.slane %v2352_v30, 4  ;;  %v1799_v53 = vpop.permute.xlu0 %1798  ;;  %v4651_v34 = vpop.permute.xlu1 %886  ;;  %6479 = vst [vmem:[#allocation104_spill] sm:$0xff] %v4667_v44  ;;  %v6481_v0 = vld [vmem:[#allocation49_spill] sm:$0xff] }
 0x336   :  { %6474 = vst [vmem:[#allocation120_spill] sm:$0xff] %v4651_v34 }
 0x337   :  { %v1277_v55 = vadd.f32 %v1276_v17, %v1275_v58  ;;  %v2354_v36 = vadd.f32 %v2353_v38, %v2352_v30  ;;  %v428_v58 = vsel %vm425_vm1, %v6481_v0, %v6480_v46  ;;  %v6482_v17 = vld [vmem:[#allocation14_spill] sm:$0xff] }
 0x338   :  { %v913_v38 = vmul.f32 %v4651_v34, %v6482_v17 }
 0x339   :  { %v1278_v18 = vrot.slane %v1277_v55, 1  ;;  %v2355_v4 = vrot.slane %v2354_v36, 2  ;;  %v4653_v43 = vpop.permute.xlu0 %1786  ;;  %v4655_v57 = vpop.permute.xlu1 %890 }
 0x33a   :  { %6475 = vst [vmem:[#allocation119_spill] sm:$0xff] %v4655_v57  ;;  %v6514_v57 = vld [vmem:[#allocation74_spill] sm:$0xff] }
 0x33b   :  { %v1279_v32 = vadd.f32 %v1278_v18, %v1277_v55  ;;  %v2356_v2 = vadd.f32 %v2355_v4, %v2354_v36  ;;  %v6484_v18 = vld [vmem:[#allocation100_spill] sm:$0xff] }
 0x33c   :  { %v865_v4 = vmul.f32 %v6484_v18, %v4667_v44 }
 0x33d   :  { %v1280_v15 = vadd.f32 %v1279_v32, %v87_v41  ;;  %v2357_v50 = vrot.slane %v2356_v2, 1  ;;  %v1847_v24 = vpop.permute.xlu0 %1846  ;;  %v4664_v3 = vpop.permute.xlu1 %942 }
 0x33e   :  { %6478 = vst [vmem:[#allocation59_spill] sm:$0xff] %v4664_v3 }
 0x33f   :  { %v2358_v37 = vadd.f32 %v2357_v50, %v2356_v2  ;;  %v1281_v22 = vmax.f32 %v1280_v15, 0.0  ;;  %v90_v15 = vld [vmem:[%s6036_s8 + $0x10] sm:$0xff]  ;;  %v4690_v50 = vmul.f32 %v3707_v19, %v428_v58 }
 0x341   :  { %v2359_v30 = vadd.f32 %v2358_v37, %v87_v41  ;;  %v4681_v55 = vpop.permute.xlu1 %946  ;;  %v1285_v36 = vrot.slane %v1281_v22, %v6424_v29  ;;  %v1863_v32 = vpop.permute.xlu0 %1862  ;;  %6485 = vst [vmem:[#allocation58_spill] sm:$0xff] %v4690_v50  ;;  %v929_v37 = vadd.f32 %v913_v38, %v865_v4 }
 0x342   :  { %6483 = vst [vmem:[#allocation89_spill] sm:$0xff] %v4681_v55  ;;  %v1878_v22 = vsel %vm425_vm1, %v1847_v24, %v1863_v32  ;;  %v1886_v33 = vsel %vm425_vm1, %v1863_v32, %v1847_v24 }
 0x343   :  { %v1287_v2 = vmul.f32 %v1285_v36, %v89_v25  ;;  %v1286_v1 = vmul.f32 %v1285_v36, %v88_v27  ;;  %v2360_v41 = vmax.f32 %v2359_v30, 0.0  ;;  %v1288_v45 = vmul.f32 %v1285_v36, %v90_v15  ;;  %v91_v30 = vld [vmem:[%s6036_s8 + $0x18] sm:$0xff] }
 0x344   :  { %v4709_v24 = vmul.f32 %v1878_v22, %v3707_v19  ;;  %v4712_v4 = vmul.f32 %v1886_v33, %v3721_v31 }
 0x345   :  { %v4692_v61 = vpop.permute.xlu1 %950  ;;  %v1293_v28 = vsel %vm1266_vm4, %v1287_v2, 0.0  ;;  %v1290_v60 = vsel %vm1266_vm4, %v1286_v1, 0.0  ;;  %v2364_v58 = vrot.slane %v2360_v41, %v6424_v29  ;;  %v1296_v29 = vsel %vm1266_vm4, %v1288_v45, 0.0  ;;  %v1789_v14 = vpop.permute.xlu0 %1788 }
 0x346   :  { %6486 = vst [vmem:[#allocation21_spill] sm:$0xff] %v4692_v61  ;;  %v977_v21 = vmul.f32 %v4692_v61, %v4690_v50  ;;  %1294 = vadd.xlane.f32.xlu1 %v1293_v28  ;;  %1291 = vadd.xlane.f32.xlu0 %v1290_v60  ;;  %6488 = vst [vmem:[#allocation30_spill] sm:$0xff] %v4712_v4  ;;  %v1289_v28 = vmul.f32 %v1285_v36, %v91_v30 }
 0x347   :  { %v2365_v2 = vmul.f32 %v2364_v58, %v88_v27  ;;  %v2366_v22 = vmul.f32 %v2364_v58, %v89_v25  ;;  %v6490_v27 = vld [vmem:[#allocation82_spill] sm:$0xff]  ;;  %v2367_v52 = vmul.f32 %v2364_v58, %v90_v15  ;;  %v2368_v20 = vmul.f32 %v2364_v58, %v91_v30  ;;  %v6498_v58 = vld [vmem:[#allocation37_spill] sm:$0xff] }
 0x348   :  { %v4706_v38 = vadd.f32 %v977_v21, %v929_v37  ;;  %v6489_v21 = vld [vmem:[#allocation66_spill] sm:$0xff]  ;;  %v2006_v39 = vmul.f32 %v6466_v11, %v6490_v27  ;;  %v1299_v25 = vsel %vm1266_vm4, %v1289_v28, 0.0  ;;  %v358_v15 = vsel %vm349_vm0, %v6495_v7, %v6496_v9 }
 0x349   :  { %v1783_v32 = vpop.permute.xlu1 %1782  ;;  %v2369_v33 = vsel %vm1266_vm4, %v2365_v2, 0.0  ;;  %v2372_v23 = vsel %vm1266_vm4, %v2366_v22, 0.0  ;;  %v2375_v13 = vsel %vm1266_vm4, %v2367_v52, 0.0  ;;  %v6497_v52 = vld [vmem:[#allocation11_spill] sm:$0xff]  ;;  %v2378_v30 = vsel %vm1266_vm4, %v2368_v20, 0.0 }
 0x34a   :  { %6487 = vst [vmem:[#allocation87_spill] sm:$0xff] %v4706_v38  ;;  %v1814_v1 = vsel %vm349_vm0, %v1783_v32, %v1799_v53  ;;  %v1822_v41 = vsel %vm349_vm0, %v1799_v53, %v1783_v32  ;;  %1297 = vadd.xlane.f32.xlu1 %v1296_v29  ;;  %2370 = vadd.xlane.f32.xlu0 %v2369_v33  ;;  %v6491_v32 = vld [vmem:[#allocation70_spill] sm:$0xff]  ;;  %v6512_v38 = vld [vmem:[#allocation48_spill] sm:$0xff] }
 0x34b   :  { %v4720_v60 = vmul.f32 %v1822_v41, %v3682_v54  ;;  %v4723_v37 = vmul.f32 %v1814_v1, %v6489_v21  ;;  %v2007_v53 = vmul.f32 %v6463_v35, %v6490_v27  ;;  %v6492_v1 = vld [vmem:[#allocation84_spill] sm:$0xff]  ;;  %v4761_v22 = vmul.f32 %v3682_v54, %v358_v15  ;;  %v6505_v15 = vld [vmem:[#allocation38_spill] sm:$0xff] }
 0x34c   :  { %v2038_v42 = vmul.f32 %v4709_v24, %v6492_v1  ;;  %v2039_v29 = vmul.f32 %v4712_v4, %v6492_v1  ;;  %v6510_v1 = vld [vmem:[#allocation33_spill] sm:$0xff]  ;;  %v6511_v27 = vld [vmem:[#allocation52_spill] sm:$0xff] }
 0x34d   :  { %v1990_v45 = vmul.f32 %v4720_v60, %v6491_v32  ;;  %v1991_v36 = vmul.f32 %v4723_v37, %v6491_v32  ;;  %v1785_v41 = vpop.permute.xlu1 %1784  ;;  %6499 = vst [vmem:[#allocation67_spill] sm:$0xff] %v4761_v22  ;;  %v509_v56 = vmul.f32 %v6510_v1, %v4761_v22 }
 0x34e   :  { %1300 = vadd.xlane.f32.xlu1 %v1299_v25  ;;  %2373 = vadd.xlane.f32.xlu0 %v2372_v23 }
 0x34f   :  { %v2022_v2 = vadd.f32 %v2006_v39, %v1990_v45  ;;  %v2023_v33 = vadd.f32 %v2007_v53, %v1991_v36  ;;  %v350_v39 = vsel %vm349_vm0, %v6496_v9, %v6495_v7  ;;  %v6501_v45 = vld [vmem:[#allocation44_spill] sm:$0xff]  ;;  %v6502_v9 = vld [vmem:[#allocation39_spill] sm:$0xff]  ;;  %v6503_v36 = vld [vmem:[#allocation25_spill] sm:$0xff] }
 0x350   :  { %v4764_v53 = vmul.f32 %v6489_v21, %v350_v39  ;;  %v351_v7 = vsel %vm349_vm0, %v6502_v9, %v6501_v45  ;;  %v558_v20 = vmul.f32 %v6498_v58, %v6503_v36  ;;  %v6504_v39 = vld [vmem:[#allocation8_spill] sm:$0xff] }
 0x351   :  { %v1801_v16 = vpop.permute.xlu1 %1800  ;;  %v4740_v63 = vadd.f32 %v2038_v42, %v2022_v2  ;;  %v4742_v5 = vadd.f32 %v2039_v29, %v2023_v33  ;;  %v4788_v33 = vmul.f32 %v6466_v11, %v6498_v58  ;;  %v4812_v48 = vmul.f32 %v6489_v21, %v351_v7 }
 0x352   :  { %2376 = vadd.xlane.f32.xlu0 %v2375_v13  ;;  %v1815_v42 = vsel %vm349_vm0, %v1785_v41, %v1801_v16  ;;  %v1823_v28 = vsel %vm349_vm0, %v1801_v16, %v1785_v41  ;;  %v557_v13 = vmul.f32 %v6498_v58, %v6497_v52  ;;  %6500 = vst [vmem:[#allocation68_spill] sm:$0xff] %v4764_v53  ;;  %v6517_v52 = vld [vmem:[#allocation78_spill] sm:$0xff] }
 0x353   :  { %6493 = vst [vmem:[#allocation64_spill] sm:$0xff] %v4740_v63  ;;  %6494 = vst [vmem:[#allocation73_spill] sm:$0xff] %v4742_v5  ;;  %v359_v16 = vsel %vm349_vm0, %v6501_v45, %v6502_v9  ;;  %v352_v41 = vsel %vm349_vm0, %v6476_v62, %v6477_v51  ;;  %v4781_v29 = vmul.f32 %v1823_v28, %v3682_v54  ;;  %v6506_v45 = vld [vmem:[#allocation26_spill] sm:$0xff]  ;;  %v6507_v5 = vld [vmem:[#allocation51_spill] sm:$0xff] }
 0x354   :  { %v4784_v25 = vmul.f32 %v1815_v42, %v6489_v21  ;;  %v4794_v9 = vmul.f32 %v6505_v15, %v6506_v45  ;;  %v6508_v62 = vld [vmem:[#allocation47_spill] sm:$0xff]  ;;  %v4802_v42 = vmul.f32 %v6469_v49, %v6505_v15  ;;  %v4806_v28 = vmul.f32 %v6470_v10, %v6505_v15 }
 0x355   :  { %v1803_v23 = vpop.permute.xlu1 %1802  ;;  %v426_v51 = vsel %vm425_vm1, %v6508_v62, %v6507_v5  ;;  %v4809_v63 = vmul.f32 %v3682_v54, %v359_v16  ;;  %v510_v40 = vmul.f32 %v6510_v1, %v4764_v53  ;;  %v4819_v32 = vmul.f32 %v6489_v21, %v352_v41 }
 0x356   :  { %2379 = vadd.xlane.f32.xlu0 %v2378_v30  ;;  %v559_v30 = vmul.f32 %v6505_v15, %v6504_v39  ;;  %v427_v15 = vsel %vm425_vm1, %v6512_v38, %v6511_v27  ;;  %v434_v7 = vsel %vm425_vm1, %v6507_v5, %v6508_v62  ;;  %v4830_v16 = vmul.f32 %v3707_v19, %v426_v51  ;;  %v77_v51 = vld [vmem:[%s6033_s5 + $0x10] sm:$0xff] }
 0x357   :  { %6509 = vst [vmem:[#allocation88_spill] sm:$0xff] %v4809_v63  ;;  %v1992_v11 = vmul.f32 %v4781_v29, %v6514_v57  ;;  %v1993_v41 = vmul.f32 %v4784_v25, %v6514_v57  ;;  %v1816_v36 = vsel %vm349_vm0, %v4653_v43, %v1803_v23  ;;  %v1824_v3 = vsel %vm349_vm0, %v1803_v23, %v4653_v43 }
 0x358   :  { %6513 = vst [vmem:[#allocation69_spill] sm:$0xff] %v4830_v16  ;;  %v435_v57 = vsel %vm425_vm1, %v6511_v27, %v6512_v38  ;;  %v4854_v22 = vmul.f32 %v3707_v19, %v427_v15  ;;  %v2008_v50 = vmul.f32 %v6469_v49, %v6517_v52  ;;  %v2009_v44 = vmul.f32 %v6470_v10, %v6517_v52  ;;  %v6518_v38 = vld [vmem:[#allocation109_spill] sm:$0xff] }
 0x359   :  { %v1849_v2 = vpop.permute.xlu1 %1848  ;;  %v511_v27 = vmul.f32 %v6518_v38, %v4809_v63  ;;  %v4871_v15 = vmul.f32 %v1824_v3, %v3682_v54  ;;  %v4881_v4 = vmul.f32 %v3721_v31, %v434_v7  ;;  %v78_v3 = vld [vmem:[%s6033_s5 + $0x18] sm:$0xff]  ;;  %v573_v17 = vadd.f32 %v557_v13, %v509_v56 }
 0x35a   :  { %6515 = vst [vmem:[#allocation7_spill] sm:$0xff] %v4854_v22  ;;  %v2024_v52 = vadd.f32 %v2008_v50, %v1992_v11  ;;  %v2025_v10 = vadd.f32 %v2009_v44, %v1993_v41  ;;  %v574_v55 = vadd.f32 %v558_v20, %v510_v40  ;;  %v1851_v41 = vpop.permute.xlu0 %1850  ;;  %v6526_v63 = vld [vmem:[#allocation76_spill] sm:$0xff] }
 0x35b   :  { %6520 = vst [vmem:[#allocation20_spill] sm:$0xff] %v4881_v4  ;;  %v575_v44 = vadd.f32 %v559_v30, %v511_v27 }
 0x35d   :  { %v1865_v53 = vpop.permute.xlu1 %1864 }
 0x35e   :  { %v1879_v5 = vsel %vm425_vm1, %v1849_v2, %v1865_v53  ;;  %v1887_v62 = vsel %vm425_vm1, %v1865_v53, %v1849_v2  ;;  %v6516_v53 = vld [vmem:[#allocation61_spill] sm:$0xff] }
 0x35f   :  { %v4857_v43 = vmul.f32 %v1879_v5, %v3707_v19  ;;  %v4860_v23 = vmul.f32 %v1887_v62, %v3721_v31  ;;  %v621_v2 = vmul.f32 %v6516_v53, %v4830_v16  ;;  %v4874_v5 = vmul.f32 %v1816_v36, %v6489_v21  ;;  %v6519_v62 = vld [vmem:[#allocation91_spill] sm:$0xff]  ;;  %1017 = vperm.xlu1 %2797, %v77_v51   ;;  %v6522_v51 = vld [vmem:[#allocation60_spill] sm:$0xff] }
 0x360   :  { %v4887_v36 = vmul.f32 %v3721_v31, %v435_v57  ;;  %v623_v7 = vmul.f32 %v6522_v51, %v4854_v22  ;;  %v622_v11 = vmul.f32 %v6516_v53, %v4881_v4  ;;  %v6525_v57 = vld [vmem:[#allocation83_spill] sm:$0xff] }
 0x361   :  { %v2040_v45 = vmul.f32 %v4857_v43, %v6519_v62  ;;  %v2041_v16 = vmul.f32 %v4860_v23, %v6519_v62  ;;  %v1805_v49 = vpop.permute.xlu1 %1804  ;;  %v4893_v62 = vsel %vm425_vm1, %v6480_v46, %v6481_v0  ;;  %v2010_v13 = vmul.f32 %v6465_v47, %v6525_v57 }
 0x362   :  { %6521 = vst [vmem:[#allocation80_spill] sm:$0xff] %v4887_v36  ;;  %v1994_v46 = vmul.f32 %v4871_v15, %v6526_v63  ;;  %v1995_v0 = vmul.f32 %v4874_v5, %v6526_v63  ;;  %v637_v20 = vadd.f32 %v621_v2, %v573_v17  ;;  %v2011_v30 = vmul.f32 %v6471_v12, %v6525_v57 }
 0x363   :  { %v4899_v50 = vadd.f32 %v2040_v45, %v2024_v52  ;;  %v4901_v56 = vadd.f32 %v2041_v16, %v2025_v10  ;;  %1022 = vperm.xlu1 %2797, %v78_v3   ;;  %v512_v10 = vmul.f32 %v6518_v38, %v4812_v48  ;;  %v2074_v16 = vmul.f32 %v4871_v15, %v6484_v18 }
 0x364   :  { %v2075_v27 = vmul.f32 %v4874_v5, %v6484_v18  ;;  %v1817_v17 = vsel %vm349_vm0, %v1789_v14, %v1805_v49  ;;  %v1825_v2 = vsel %vm349_vm0, %v1805_v49, %v1789_v14  ;;  %v2090_v3 = vmul.f32 %v6465_v47, %v4651_v34 }
 0x365   :  { %6523 = vst [vmem:[#allocation29_spill] sm:$0xff] %v4899_v50  ;;  %6524 = vst [vmem:[#allocation110_spill] sm:$0xff] %v4901_v56  ;;  %v1867_v40 = vpop.permute.xlu1 %1866  ;;  %v2091_v50 = vmul.f32 %v6471_v12, %v4651_v34  ;;  %v1912_v57 = vmul.f32 %v4781_v29, %v6518_v38  ;;  %v2026_v63 = vadd.f32 %v2010_v13, %v1994_v46 }
 0x366   :  { %v1880_v52 = vsel %vm425_vm1, %v1851_v41, %v1867_v40  ;;  %v1888_v45 = vsel %vm425_vm1, %v1867_v40, %v1851_v41  ;;  %v639_v40 = vadd.f32 %v623_v7, %v575_v44  ;;  %v2027_v18 = vadd.f32 %v2011_v30, %v1995_v0  ;;  %v76_v0 = vld [vmem:[%s6033_s5 + $0x8] sm:$0xff] }
 0x367   :  { %v4928_v56 = vmul.f32 %v1880_v52, %v3707_v19  ;;  %v4931_v41 = vmul.f32 %v1888_v45, %v3721_v31  ;;  %1061 = vrot.lane.b32.xlu1 %v637_v20, %s2936_s24  ;;  %v4939_v14 = vmul.f32 %v1825_v2, %v3682_v54  ;;  %v4942_v52 = vmul.f32 %v1817_v17, %v6489_v21  ;;  %v6527_v45 = vld [vmem:[#allocation93_spill] sm:$0xff] }
 0x368   :  { %v2106_v34 = vadd.f32 %v2090_v3, %v2074_v16  ;;  %v2107_v47 = vadd.f32 %v2091_v50, %v2075_v27  ;;  %v1960_v20 = vmul.f32 %v4857_v43, %v6522_v51  ;;  %v638_v30 = vadd.f32 %v622_v11, %v574_v55  ;;  %v6532_v11 = vld [vmem:[#allocation85_spill] sm:$0xff] }
 0x369   :  { %v1853_v49 = vpop.permute.xlu1 %1852  ;;  %v2042_v7 = vmul.f32 %v4928_v56, %v6527_v45  ;;  %v2043_v44 = vmul.f32 %v4931_v41, %v6527_v45  ;;  %v2122_v13 = vmul.f32 %v4928_v56, %v4692_v61  ;;  %v2123_v46 = vmul.f32 %v4931_v41, %v4692_v61  ;;  %v6531_v61 = vld [vmem:[#allocation72_spill] sm:$0xff] }
 0x36a   :  { %v1913_v50 = vmul.f32 %v4784_v25, %v6518_v38  ;;  %v1944_v16 = vadd.f32 %v4802_v42, %v1912_v57  ;;  %v1996_v54 = vmul.f32 %v4939_v14, %v6531_v61  ;;  %v1910_v42 = vmul.f32 %v4720_v60, %v6510_v1 }
 0x36b   :  { %v4957_v17 = vadd.f32 %v2042_v7, %v2026_v63  ;;  %v4959_v2 = vadd.f32 %v2043_v44, %v2027_v18  ;;  %1063 = vrot.lane.b32.xlu1 %v639_v40, %s2936_s24  ;;  %v4965_v3 = vadd.f32 %v2123_v46, %v2107_v47  ;;  %v4967_v45 = vadd.f32 %v2122_v13, %v2106_v34  ;;  %v6533_v46 = vld [vmem:[#allocation86_spill] sm:$0xff] }
 0x36c   :  { %v1997_v63 = vmul.f32 %v4942_v52, %v6531_v61  ;;  %1012 = vperm.xlu0 %2798, %v76_v0   ;;  %v576_v38 = vadd.f32 %v4794_v9, %v512_v10  ;;  %v2012_v57 = vmul.f32 %v6467_v6, %v6532_v11  ;;  %v2013_v40 = vmul.f32 %v6472_v26, %v6532_v11  ;;  %v6534_v0 = vld [vmem:[#allocation27_spill] sm:$0xff] }
 0x36d   :  { %6528 = vst [vmem:[#allocation77_spill] sm:$0xff] %v4957_v17  ;;  %6529 = vst [vmem:[#allocation111_spill] sm:$0xff] %v4959_v2  ;;  %v1869_v27 = vpop.permute.xlu1 %1868  ;;  %v1976_v7 = vadd.f32 %v1960_v20, %v1944_v16  ;;  %v4994_v44 = vmul.f32 %v3721_v31, %v4893_v62  ;;  %v624_v13 = vmul.f32 %v6522_v51, %v4887_v36  ;;  %v6536_v62 = vld [vmem:[#allocation34_spill] sm:$0xff] }
 0x36e   :  { %6530 = vst [vmem:[#allocation113_spill] sm:$0xff] %v4967_v45  ;;  %v1881_v55 = vsel %vm425_vm1, %v1853_v49, %v1869_v27  ;;  %v1889_v18 = vsel %vm425_vm1, %v1869_v27, %v1853_v49  ;;  %v1961_v49 = vmul.f32 %v4860_v23, %v6522_v51  ;;  %v6535_v27 = vld [vmem:[#allocation56_spill] sm:$0xff]  ;;  %v1945_v20 = vadd.f32 %v4806_v28, %v1913_v50 }
 0x36f   :  { %v4980_v47 = vmul.f32 %v1881_v55, %v3707_v19  ;;  %v4983_v34 = vmul.f32 %v1889_v18, %v3721_v31  ;;  %1077 = vrot.lane.b32.xlu1 %v638_v30, %s2936_s24  ;;  %v562_v55 = vmul.f32 %v6535_v27, %v6534_v0  ;;  %v2028_v16 = vadd.f32 %v2012_v57, %v1996_v54  ;;  %v6537_v30 = vld [vmem:[#allocation62_spill] sm:$0xff]  ;;  %v6539_v57 = vld [vmem:[#allocation92_spill] sm:$0xff] }
 0x370   :  { %v2029_v18 = vadd.f32 %v2013_v40, %v1997_v63  ;;  %2168 = vrot.lane.b32.xlu0 %v1976_v7, %s2936_s24  ;;  %v514_v51 = vmul.f32 %v6536_v62, %v4819_v32  ;;  %v1911_v11 = vmul.f32 %v4723_v37, %v6510_v1  ;;  %v1942_v61 = vadd.f32 %v4788_v33, %v1910_v42 }
 0x371   :  { %v2044_v9 = vmul.f32 %v4980_v47, %v6533_v46  ;;  %v2045_v10 = vmul.f32 %v4983_v34, %v6533_v46  ;;  %v640_v46 = vadd.f32 %v624_v13, %v576_v38  ;;  %v626_v2 = vmul.f32 %v6537_v30, %v4994_v44  ;;  %v6538_v38 = vld [vmem:[#allocation88_spill] sm:$0xff]  ;;  %v6541_v13 = vld [vmem:[#allocation14_spill] sm:$0xff] }
 0x372   :  { %v1977_v17 = vadd.f32 %v1961_v49, %v1945_v20  ;;  %v1927_v54 = vmul.f32 %v6463_v35, %v6498_v58  ;;  %v1958_v50 = vmul.f32 %v4709_v24, %v6516_v53  ;;  %v911_v1 = vmul.f32 %v4648_v8, %v6504_v39  ;;  %v6540_v49 = vld [vmem:[#allocation89_spill] sm:$0xff]  ;;  %v6543_v20 = vld [vmem:[#allocation26_spill] sm:$0xff] }
 0x373   :  { %v5014_v45 = vadd.f32 %v2044_v9, %v2028_v16  ;;  %v5016_v28 = vadd.f32 %v2045_v10, %v2029_v18  ;;  %1079 = vrot.lane.b32.xlu1 %v640_v46, %s2936_s24  ;;  %v578_v33 = vadd.f32 %v562_v55, %v514_v51  ;;  %v863_v40 = vmul.f32 %v6539_v57, %v6538_v38  ;;  %v6542_v46 = vld [vmem:[#allocation30_spill] sm:$0xff] }
 0x374   :  { %2184 = vrot.lane.b32.xlu0 %v1977_v17, %s2936_s24  ;;  %v1943_v63 = vadd.f32 %v1927_v54, %v1911_v11  ;;  %v1974_v42 = vadd.f32 %v1958_v50, %v1942_v61  ;;  %v975_v7 = vmul.f32 %v6540_v49, %v4854_v22  ;;  %v561_v9 = vmul.f32 %v6535_v27, %v6541_v13  ;;  %v6544_v61 = vld [vmem:[#allocation104_spill] sm:$0xff]  ;;  %v6545_v16 = vld [vmem:[#allocation58_spill] sm:$0xff]  ;;  %v6546_v50 = vld [vmem:[#allocation11_spill] sm:$0xff] }
 0x375   :  { %v642_v58 = vadd.f32 %v626_v2, %v578_v33  ;;  %v1959_v10 = vmul.f32 %v6542_v46, %v6516_v53  ;;  %v912_v17 = vmul.f32 %v4648_v8, %v6543_v20  ;;  %v927_v11 = vadd.f32 %v911_v1, %v863_v40  ;;  %v6547_v33 = vld [vmem:[#allocation22_spill] sm:$0xff]  ;;  %v6550_v13 = vld [vmem:[#allocation69_spill] sm:$0xff] }
 0x376   :  { %v513_v55 = vmul.f32 %v6536_v62, %v6544_v61  ;;  %v625_v2 = vmul.f32 %v6537_v30, %v6545_v16  ;;  %v864_v51 = vmul.f32 %v6539_v57, %v4812_v48  ;;  %v976_v53 = vmul.f32 %v6540_v49, %v4887_v36  ;;  %v6551_v61 = vld [vmem:[#allocation59_spill] sm:$0xff] }
 0x377   :  { %2166 = vrot.lane.b32.xlu1 %v1974_v42, %s2936_s24  ;;  %v1975_v18 = vadd.f32 %v1959_v10, %v1943_v63  ;;  %v991_v54 = vadd.f32 %v975_v7, %v927_v11  ;;  %v909_v42 = vmul.f32 %v6547_v33, %v6546_v50  ;;  %v6548_v63 = vld [vmem:[#allocation67_spill] sm:$0xff]  ;;  %v6549_v10 = vld [vmem:[#allocation98_spill] sm:$0xff]  ;;  %v973_v22 = vmul.f32 %v6551_v61, %v6550_v13 }
 0x378   :  { %1081 = vrot.lane.b32.xlu0 %v642_v58, %s2936_s24  ;;  %v577_v1 = vadd.f32 %v561_v9, %v513_v55  ;;  %v928_v40 = vadd.f32 %v912_v17, %v864_v51  ;;  %v1915_v58 = vmul.f32 %v4874_v5, %v6536_v62  ;;  %v861_v16 = vmul.f32 %v6549_v10, %v6548_v63  ;;  %v6552_v17 = vld [vmem:[#allocation25_spill] sm:$0xff] }
 0x379   :  { %v1931_v7 = vmul.f32 %v6471_v12, %v6535_v27  ;;  %v1963_v11 = vmul.f32 %v4931_v41, %v6537_v30  ;;  %v910_v55 = vmul.f32 %v6547_v33, %v6552_v17  ;;  %v974_v12 = vmul.f32 %v6551_v61, %v4881_v4 }
 0x37a   :  { %v641_v36 = vadd.f32 %v625_v2, %v577_v1  ;;  %v992_v9 = vadd.f32 %v976_v53, %v928_v40  ;;  %v925_v5 = vadd.f32 %v909_v42, %v861_v16  ;;  %v6553_v2 = vld [vmem:[#allocation68_spill] sm:$0xff]  ;;  %v6554_v53 = vld [vmem:[#allocation9_spill] sm:$0xff]  ;;  %v2120_v16 = vmul.f32 %v4857_v43, %v6540_v49  ;;  %v6555_v42 = vld [vmem:[#allocation46_spill] sm:$0xff] }
 0x37b   :  { %2182 = vrot.lane.b32.xlu1 %v1975_v18, %s2936_s24  ;;  %v2072_v18 = vmul.f32 %v4781_v29, %v6539_v57  ;;  %v1947_v51 = vadd.f32 %v1931_v7, %v1915_v58  ;;  %v2088_v1 = vmul.f32 %v6554_v53, %v4648_v8  ;;  %v6556_v40 = vld [vmem:[#allocation42_spill] sm:$0xff]  ;;  %v1914_v7 = vmul.f32 %v4871_v15, %v6536_v62 }
 0x37c   :  { %1155 = vrot.lane.b32.xlu0 %v991_v54, %s2937_s28  ;;  %v862_v54 = vmul.f32 %v6549_v10, %v6553_v2  ;;  %v989_v41 = vadd.f32 %v973_v22, %v925_v5  ;;  %v353_v29 = vsel %vm349_vm0, %v6556_v40, %v6555_v42  ;;  %v6558_v22 = vld [vmem:[#allocation54_spill] sm:$0xff]  ;;  %v2073_v43 = vmul.f32 %v4784_v25, %v6539_v57 }
 0x37d   :  { %v1962_v15 = vmul.f32 %v4928_v56, %v6537_v30  ;;  %v2121_v25 = vmul.f32 %v4860_v23, %v6540_v49  ;;  %v6562_v56 = vld [vmem:[#allocation28_spill] sm:$0xff]  ;;  %v6563_v30 = vld [vmem:[#allocation55_spill] sm:$0xff] }
 0x37e   :  { %v926_v58 = vadd.f32 %v910_v55, %v862_v54  ;;  %v2070_v55 = vmul.f32 %v4720_v60, %v6549_v10  ;;  %v5095_v54 = vmul.f32 %v6489_v21, %v353_v29  ;;  %v564_v21 = vmul.f32 %v6563_v30, %v6562_v56  ;;  %v6565_v29 = vld [vmem:[#allocation65_spill] sm:$0xff] }
 0x37f   :  { %1065 = vrot.lane.b32.xlu1 %v641_v36, %s2936_s24  ;;  %v1979_v36 = vadd.f32 %v1963_v11, %v1947_v51  ;;  %v2104_v11 = vadd.f32 %v2088_v1, %v2072_v18  ;;  %v6559_v51 = vld [vmem:[#allocation15_spill] sm:$0xff]  ;;  %v6561_v18 = vld [vmem:[#allocation12_spill] sm:$0xff] }
 0x380   :  { %1171 = vrot.lane.b32.xlu0 %v992_v9, %s2937_s28  ;;  %v6557_v9 = vld [vmem:[#allocation50_spill] sm:$0xff]  ;;  %v1930_v53 = vmul.f32 %v6559_v51, %v6535_v27  ;;  %v990_v62 = vadd.f32 %v974_v12, %v926_v58  ;;  %v2086_v27 = vmul.f32 %v6561_v18, %v6547_v33 }
 0x381   :  { %v437_v5 = vsel %vm425_vm1, %v6558_v22, %v6557_v9  ;;  %v2136_v57 = vadd.f32 %v2120_v16, %v2104_v11  ;;  %v361_v16 = vsel %vm349_vm0, %v6555_v42, %v6556_v40  ;;  %v6566_v42 = vld [vmem:[#allocation120_spill] sm:$0xff] }
 0x382   :  { %v1946_v1 = vadd.f32 %v1930_v53, %v1914_v7  ;;  %v5105_v60 = vmul.f32 %v3721_v31, %v437_v5  ;;  %v2102_v23 = vadd.f32 %v2086_v27, %v2070_v55  ;;  %v914_v40 = vmul.f32 %v6566_v42, %v6534_v0  ;;  %v6569_v53 = vld [vmem:[#allocation21_spill] sm:$0xff] }
 0x383   :  { %1153 = vrot.lane.b32.xlu1 %v989_v41, %s2937_s28  ;;  %v6560_v41 = vld [vmem:[#allocation10_spill] sm:$0xff]  ;;  %v978_v55 = vmul.f32 %v6569_v53, %v4994_v44 }
 0x384   :  { %2186 = vrot.lane.b32.xlu0 %v1979_v36, %s2936_s24  ;;  %v2089_v4 = vmul.f32 %v6560_v41, %v4648_v8  ;;  %v2071_v8 = vmul.f32 %v4723_v37, %v6549_v10  ;;  %v1978_v49 = vadd.f32 %v1962_v15, %v1946_v1  ;;  %v6564_v36 = vld [vmem:[#allocation35_spill] sm:$0xff]  ;;  %v628_v58 = vmul.f32 %v6565_v29, %v5105_v60 }
 0x385   :  { %v516_v31 = vmul.f32 %v6564_v36, %v5095_v54  ;;  %v2118_v37 = vmul.f32 %v4709_v24, %v6551_v61  ;;  %v429_v10 = vsel %vm425_vm1, %v6557_v9, %v6558_v22  ;;  %v6568_v24 = vld [vmem:[#allocation100_spill] sm:$0xff]  ;;  %v6570_v22 = vld [vmem:[#allocation17_spill] sm:$0xff]  ;;  %v2119_v41 = vmul.f32 %v6542_v46, %v6551_v61 }
 0x386   :  { %v2105_v12 = vadd.f32 %v2089_v4, %v2073_v43  ;;  %v2087_v4 = vmul.f32 %v6463_v35, %v6547_v33  ;;  %v6567_v43 = vld [vmem:[#allocation63_spill] sm:$0xff]  ;;  %v866_v51 = vmul.f32 %v6568_v24, %v4819_v32  ;;  %v5140_v9 = vmul.f32 %v3707_v19, %v429_v10 }
 0x387   :  { %1169 = vrot.lane.b32.xlu1 %v990_v62, %s2937_s28  ;;  %v580_v5 = vadd.f32 %v564_v21, %v516_v31  ;;  %v5133_v11 = vmul.f32 %v6567_v43, %v361_v16  ;;  %v2134_v33 = vadd.f32 %v2118_v37, %v2102_v23  ;;  %v563_v62 = vmul.f32 %v6563_v30, %v6570_v22  ;;  %v6571_v31 = vld [vmem:[#allocation119_spill] sm:$0xff]  ;;  %v6572_v37 = vld [vmem:[#allocation101_spill] sm:$0xff] }
 0x388   :  { %2248 = vrot.lane.b32.xlu0 %v2136_v57, %s2937_s28  ;;  %v2137_v7 = vadd.f32 %v2121_v25, %v2105_v12  ;;  %v2103_v35 = vadd.f32 %v2087_v4, %v2071_v8  ;;  %v930_v25 = vadd.f32 %v914_v40, %v866_v51  ;;  %v1917_v57 = vmul.f32 %v4942_v52, %v6564_v36 }
 0x389   :  { %v644_v15 = vadd.f32 %v628_v58, %v580_v5  ;;  %v515_v18 = vmul.f32 %v6564_v36, %v5133_v11  ;;  %v627_v19 = vmul.f32 %v6565_v29, %v5140_v9  ;;  %v1933_v1 = vmul.f32 %v6472_v26, %v6563_v30 }
 0x38a   :  { %v2135_v27 = vadd.f32 %v2119_v41, %v2103_v35  ;;  %v1965_v46 = vmul.f32 %v4983_v34, %v6565_v29  ;;  %v994_v61 = vadd.f32 %v978_v55, %v930_v25  ;;  %v1916_v16 = vmul.f32 %v4939_v14, %v6564_v36  ;;  %v6573_v36 = vld [vmem:[#allocation87_spill] sm:$0xff]  ;;  %v96_v25 = vld [vmem:[%s6038_s10] sm:$0xff] }
 0x38b   :  { %2170 = vrot.lane.b32.xlu1 %v1978_v49, %s2936_s24  ;;  %v579_v21 = vadd.f32 %v563_v62, %v515_v18  ;;  %v1949_v12 = vadd.f32 %v1933_v1, %v1917_v57  ;;  %v955_v49 = vpop.permute.xlu0 %954  ;;  %v916_v58 = vmul.f32 %v6571_v31, %v6562_v56  ;;  %v1964_v4 = vmul.f32 %v4980_v47, %v6565_v29  ;;  %v97_v18 = vld [vmem:[%s6038_s10 + $0x8] sm:$0xff] }
 0x38c   :  { %2264 = vrot.lane.b32.xlu0 %v2137_v7, %s2937_s28  ;;  %v1932_v7 = vmul.f32 %v6467_v6, %v6563_v30  ;;  %v868_v10 = vmul.f32 %v6572_v37, %v5095_v54  ;;  %v980_v42 = vmul.f32 %v955_v49, %v5105_v60  ;;  %v2077_v43 = vmul.f32 %v4942_v52, %v6572_v37 }
 0x38d   :  { %v643_v8 = vadd.f32 %v627_v19, %v579_v21  ;;  %v1981_v23 = vadd.f32 %v1965_v46, %v1949_v12  ;;  %v2093_v29 = vmul.f32 %v6472_v26, %v6571_v31  ;;  %v2125_v35 = vmul.f32 %v4983_v34, %v955_v49  ;;  %v6574_v34 = vld [vmem:[#allocation113_spill] sm:$0xff]  ;;  %v94_v21 = vld [vmem:[%s6037_s9 + $0x10] sm:$0xff] }
 0x38e   :  { %v1948_v40 = vadd.f32 %v1932_v7, %v1916_v16  ;;  %v932_v5 = vadd.f32 %v916_v58, %v868_v10  ;;  %v915_v24 = vmul.f32 %v6571_v31, %v6570_v22  ;;  %v867_v52 = vmul.f32 %v6572_v37, %v5133_v11  ;;  %v93_v19 = vld [vmem:[%s6037_s9 + $0x8] sm:$0xff] }
 0x38f   :  { %2246 = vrot.lane.b32.xlu1 %v2134_v33, %s2937_s28  ;;  %v2109_v51 = vadd.f32 %v2093_v29, %v2077_v43  ;;  %v2076_v26 = vmul.f32 %v4939_v14, %v6572_v37  ;;  %v2124_v62 = vmul.f32 %v4980_v47, %v955_v49  ;;  %v92_v47 = vld [vmem:[%s6037_s9] sm:$0xff] }
 0x390   :  { %1083 = vrot.lane.b32.xlu0 %v644_v15, %s2936_s24  ;;  %v1980_v30 = vadd.f32 %v1964_v4, %v1948_v40  ;;  %v996_v33 = vadd.f32 %v980_v42, %v932_v5  ;;  %v931_v55 = vadd.f32 %v915_v24, %v867_v52  ;;  %v2092_v15 = vmul.f32 %v6467_v6, %v6571_v31  ;;  %v5205_v6 = vpop.permute.xlu1 %1007  ;;  %v95_v4 = vld [vmem:[%s6037_s9 + $0x18] sm:$0xff] }
 0x391   :  { %v2141_v53 = vadd.f32 %v2125_v35, %v2109_v51 }
 0x392   :  { %v2108_v57 = vadd.f32 %v2092_v15, %v2076_v26  ;;  %v6576_v26 = vld [vmem:[#allocation111_spill] sm:$0xff] }
 0x393   :  { %2262 = vrot.lane.b32.xlu1 %v2135_v27, %s2937_s28 }
 0x394   :  { %1173 = vrot.lane.b32.xlu0 %v994_v61, %s2937_s28  ;;  %v2140_v14 = vadd.f32 %v2124_v62, %v2108_v57 }
 0x397   :  { %1067 = vrot.lane.b32.xlu1 %v643_v8, %s2936_s24 }
 0x398   :  { %2188 = vrot.lane.b32.xlu0 %v1981_v23, %s2936_s24 }
 0x39b   :  { %1157 = vrot.lane.b32.xlu1 %v6573_v36, %s2937_s28 }
 0x39c   :  { %2266 = vrot.lane.b32.xlu0 %v4965_v3, %s2937_s28  ;;  %v979_v3 = vmul.f32 %v955_v49, %v5140_v9 }
 0x39e   :  { %v995_v41 = vadd.f32 %v979_v3, %v931_v55 }
 0x39f   :  { %2172 = vrot.lane.b32.xlu1 %v1980_v30, %s2936_s24 }
 0x3a0   :  { %1175 = vrot.lane.b32.xlu0 %v996_v33, %s2937_s28 }
 0x3a3   :  { %2250 = vrot.lane.b32.xlu1 %v6574_v34, %s2937_s28 }
 0x3a4   :  { %2268 = vrot.lane.b32.xlu0 %v2141_v53, %s2937_s28  ;;  %v6575_v53 = vld [vmem:[#allocation77_spill] sm:$0xff] }
 0x3a7   :  { %1159 = vrot.lane.b32.xlu1 %v995_v41, %s2937_s28 }
 0x3a8   :  { %1600 = vperm.xlu0 %2798, %v96_v25  }
 0x3ab   :  { %2252 = vrot.lane.b32.xlu1 %v2140_v14, %s2937_s28 }
 0x3af   :  { %1605 = vperm.xlu1 %2797, %v97_v18  }
 0x3cf   :  { %v1292_v27 = vpop.xlane.xlu0 %1291  ;;  %v1295_v1 = vpop.xlane.xlu1 %1294 }
 0x3d0   :  { %v1302_v46 = vadd.f32 %v1292_v27, %v92_v47  ;;  %v1303_v61 = vadd.f32 %v1295_v1, %v93_v19 }
 0x3d2   :  { %v1306_v12 = vsub.f32 0.0, %v1302_v46  ;;  %v1307_v8 = vsub.f32 0.0, %v1303_v61 }
 0x3d3   :  { %v2371_v23 = vpop.xlane.xlu0 %2370  ;;  %v1298_v49 = vpop.xlane.xlu1 %1297 }
 0x3d4   :  { %v1310_v16 = vmul.f32 1.442695, %v1306_v12  ;;  %v1312_v31 = vmul.f32 1.442695, %v1307_v8  ;;  %v2381_v58 = vadd.f32 %v2371_v23, %v92_v47  ;;  %v1304_v7 = vadd.f32 %v1298_v49, %v94_v21 }
 0x3d6   :  { %2799 = vpow2.f32 %v1310_v16  ;;  %v2385_v37 = vsub.f32 0.0, %v2381_v58  ;;  %v1308_v10 = vsub.f32 0.0, %v1304_v7 }
 0x3d7   :  { %2801 = vpow2.f32 %v1312_v31  ;;  %v2374_v42 = vpop.xlane.xlu0 %2373  ;;  %v1301_v40 = vpop.xlane.xlu1 %1300 }
 0x3d8   :  { %v2389_v36 = vmul.f32 1.442695, %v2385_v37  ;;  %v1314_v5 = vmul.f32 1.442695, %v1308_v10  ;;  %v2382_v43 = vadd.f32 %v2374_v42, %v93_v19  ;;  %v1305_v30 = vadd.f32 %v1301_v40, %v95_v4 }
 0x3da   :  { %2803 = vpow2.f32 %v2389_v36  ;;  %v2386_v29 = vsub.f32 0.0, %v2382_v43  ;;  %v1309_v35 = vsub.f32 0.0, %v1305_v30  ;;  %v6577_v43 = vld [vmem:[#allocation78_spill] sm:$0xff] }
 0x3db   :  { %2805 = vpow2.f32 %v1314_v5  ;;  %v2377_v33 = vpop.xlane.xlu0 %2376  ;;  %v5219_v24 = vpop.permute.xlu1 %1017  ;;  %v735_v30 = vmul.f32 %v6577_v43, %v6504_v39 }
 0x3dc   :  { %v2391_v51 = vmul.f32 1.442695, %v2386_v29  ;;  %v1316_v52 = vmul.f32 1.442695, %v1309_v35  ;;  %v2383_v3 = vadd.f32 %v2377_v33, %v94_v21  ;;  %v5223_v55 = vadd.f32 %v6575_v53, %v5219_v24 }
 0x3dd   :  { %v5227_v34 = vadd.f32 %v6576_v26, %v5219_v24  ;;  %v736_v29 = vmul.f32 %v6577_v43, %v6543_v20 }
 0x3de   :  { %2807 = vpow2.f32 %v2391_v51  ;;  %v2387_v15 = vsub.f32 0.0, %v2383_v3  ;;  %v6578_v3 = vld [vmem:[#allocation74_spill] sm:$0xff] }
 0x3df   :  { %2809 = vpow2.f32 %v1316_v52  ;;  %v2380_v62 = vpop.xlane.xlu0 %2379  ;;  %v5229_v41 = vpop.permute.xlu1 %1022  ;;  %v687_v53 = vmul.f32 %v6578_v3, %v6538_v38  ;;  %v688_v26 = vmul.f32 %v6578_v3, %v4812_v48  ;;  %v6583_v48 = vld [vmem:[#allocation70_spill] sm:$0xff] }
 0x3e0   :  { %v2393_v25 = vmul.f32 1.442695, %v2387_v15  ;;  %v2384_v57 = vadd.f32 %v2380_v62, %v95_v4  ;;  %v5233_v14 = vadd.f32 %v5014_v45, %v5229_v41  ;;  %v5237_v18 = vadd.f32 %v5016_v28, %v5229_v41  ;;  %v6579_v15 = vld [vmem:[#allocation7_spill] sm:$0xff] }
 0x3e1   :  { %v6580_v62 = vld [vmem:[#allocation91_spill] sm:$0xff] }
 0x3e2   :  { %2811 = vpow2.f32 %v2393_v25  ;;  %v2388_v47 = vsub.f32 0.0, %v2384_v57  ;;  %v799_v39 = vmul.f32 %v6580_v62, %v6579_v15  ;;  %v6581_v25 = vld [vmem:[#allocation80_spill] sm:$0xff]  ;;  %v6582_v57 = vld [vmem:[#allocation82_spill] sm:$0xff] }
 0x3e3   :  { %v2800_v19 = vpop.eup %2799  ;;  %v5239_v27 = vpop.permute.xlu1 %1061  ;;  %v800_v20 = vmul.f32 %v6580_v62, %v6581_v25 }
 0x3e4   :  { %v2802_v1 = vpop.eup %2801  ;;  %v1318_v46 = vadd.f32 1.0, %v2800_v19  ;;  %v2395_v61 = vmul.f32 1.442695, %v2388_v47  ;;  %v734_v47 = vmul.f32 %v6582_v57, %v6552_v17  ;;  %v6584_v17 = vld [vmem:[#allocation72_spill] sm:$0xff] }
 0x3e5   :  { %v1319_v21 = vadd.f32 1.0, %v2802_v1 }
 0x3e6   :  { %2813 = vrcp.f32 %v1318_v46 }
 0x3e7   :  { %v2804_v12 = vpop.eup %2803  ;;  %2815 = vrcp.f32 %v1319_v21  ;;  %v5241_v8 = vpop.permute.xlu0 %1012  ;;  %v752_v21 = vadd.f32 %v736_v29, %v688_v26  ;;  %v6590_v29 = vld [vmem:[#allocation83_spill] sm:$0xff] }
 0x3e8   :  { %v1064_v45 = vpop.permute.xlu1 %1063  ;;  %v2806_v23 = vpop.eup %2805  ;;  %v2397_v49 = vadd.f32 1.0, %v2804_v12  ;;  %2817 = vpow2.f32 %v2395_v61  ;;  %v685_v61 = vmul.f32 %v6583_v48, %v6548_v63  ;;  %v751_v12 = vadd.f32 %v735_v30, %v687_v53  ;;  %v6589_v30 = vld [vmem:[#allocation14_spill] sm:$0xff]  ;;  %v6591_v53 = vld [vmem:[#allocation84_spill] sm:$0xff] }
 0x3e9   :  { %v1320_v16 = vadd.f32 1.0, %v2806_v23  ;;  %v738_v3 = vmul.f32 %v6590_v29, %v6534_v0  ;;  %v797_v26 = vmul.f32 %v6591_v53, %v6550_v13 }
 0x3ea   :  { %2819 = vrcp.f32 %v2397_v49 }
 0x3eb   :  { %v2808_v28 = vpop.eup %2807  ;;  %v5243_v31 = vpop.permute.xlu0 %2168 }
 0x3ec   :  { %v5245_v58 = vpop.permute.xlu1 %1077  ;;  %v2810_v7 = vpop.eup %2809  ;;  %v2398_v4 = vadd.f32 1.0, %v2808_v28  ;;  %v686_v28 = vmul.f32 %v6583_v48, %v6553_v2  ;;  %v733_v2 = vmul.f32 %v6582_v57, %v6546_v50  ;;  %v6592_v50 = vld [vmem:[#allocation20_spill] sm:$0xff]  ;;  %v6593_v57 = vld [vmem:[#allocation85_spill] sm:$0xff] }
 0x3ed   :  { %v1321_v10 = vadd.f32 1.0, %v2810_v7  ;;  %v6585_v7 = vld [vmem:[#allocation104_spill] sm:$0xff]  ;;  %v6595_v48 = vld [vmem:[#allocation97_spill] sm:$0xff] }
 0x3ee   :  { %2821 = vrcp.f32 %v2398_v4  ;;  %v6586_v4 = vld [vmem:[#allocation76_spill] sm:$0xff] }
 0x3ef   :  { %v2812_v37 = vpop.eup %2811  ;;  %2823 = vrcp.f32 %v1320_v16  ;;  %v5247_v42 = vpop.permute.xlu0 %2184  ;;  %v692_v16 = vmul.f32 %v6584_v17, %v5095_v54  ;;  %v690_v43 = vmul.f32 %v6586_v4, %v4819_v32  ;;  %v737_v54 = vmul.f32 %v6590_v29, %v6589_v30 }
 0x3f0   :  { %v1080_v40 = vpop.permute.xlu1 %1079  ;;  %v2399_v36 = vadd.f32 1.0, %v2812_v37  ;;  %v689_v37 = vmul.f32 %v6586_v4, %v6585_v7  ;;  %v691_v4 = vmul.f32 %v6584_v17, %v5133_v11 }
 0x3f1   :  { %v1095_v1 = vsel %vm1093_vm2, %v1064_v45, %v1080_v40  ;;  %v1103_v38 = vsel %vm1093_vm2, %v1080_v40, %v1064_v45  ;;  %v816_v45 = vadd.f32 %v800_v20, %v752_v21  ;;  %v6587_v40 = vld [vmem:[#allocation94_spill] sm:$0xff]  ;;  %v798_v20 = vmul.f32 %v6591_v53, %v6592_v50 }
 0x3f2   :  { %2825 = vrcp.f32 %v2399_v36  ;;  %v1123_v63 = vmul.f32 %v6587_v40, %v1103_v38  ;;  %v6588_v36 = vld [vmem:[#allocation99_spill] sm:$0xff]  ;;  %v6594_v38 = vld [vmem:[#allocation102_spill] sm:$0xff]  ;;  %v753_v29 = vadd.f32 %v737_v54, %v689_v37 }
 0x3f3   :  { %v2814_v5 = vpop.eup %2813  ;;  %2827 = vrcp.f32 %v1321_v10  ;;  %v5253_v35 = vpop.permute.xlu0 %1081  ;;  %v815_v10 = vadd.f32 %v799_v39, %v751_v12  ;;  %v1048_v62 = vadd.f32 %v5241_v8, %v816_v45  ;;  %v739_v12 = vmul.f32 %v6593_v57, %v6570_v22  ;;  %v98_v54 = vld [vmem:[%s6038_s10 + $0x10] sm:$0xff] }
 0x3f4   :  { %v5255_v33 = vpop.permute.xlu1 %2166  ;;  %v2816_v51 = vpop.eup %2815  ;;  %1564 = vperm.xlu1 %2797, %v2814_v5   ;;  %v1124_v5 = vmul.f32 %v6588_v36, %v1095_v1  ;;  %v754_v45 = vadd.f32 %v738_v3, %v690_v43  ;;  %v6596_v43 = vld [vmem:[#allocation86_spill] sm:$0xff] }
 0x3f5   :  { %v2818_v52 = vpop.eup %2817  ;;  %1569 = vperm.xlu0 %2798, %v2816_v51   ;;  %v750_v51 = vadd.f32 %v734_v47, %v686_v28  ;;  %v1047_v15 = vadd.f32 %v5241_v8, %v815_v10  ;;  %v740_v47 = vmul.f32 %v6593_v57, %v6562_v56  ;;  %v749_v28 = vadd.f32 %v733_v2, %v685_v61 }
 0x3f6   :  { %v2400_v19 = vadd.f32 1.0, %v2818_v52  ;;  %v1140_v1 = vadd.f32 %v1124_v5, %v1048_v62  ;;  %v1094_v56 = vsel %vm1093_vm2, %v5239_v27, %v5245_v58  ;;  %v803_v3 = vmul.f32 %v6596_v43, %v5140_v9 }
 0x3f7   :  { %v2820_v46 = vpop.eup %2819  ;;  %v1156_v23 = vpop.permute.xlu0 %1155  ;;  %v814_v2 = vadd.f32 %v798_v20, %v750_v51  ;;  %v813_v30 = vadd.f32 %v797_v26, %v749_v28  ;;  %v804_v51 = vmul.f32 %v6596_v43, %v5105_v60  ;;  %v755_v37 = vadd.f32 %v739_v12, %v691_v4  ;;  %v100_v28 = vld [vmem:[#allocation2] sm:$0x1] }
 0x3f8   :  { %v5273_v49 = vpop.permute.xlu1 %2182  ;;  %2829 = vrcp.f32 %v2400_v19  ;;  %2643 = vperm.xlu1 %2797, %v2820_v46   ;;  %v1139_v19 = vadd.f32 %v1123_v63, %v1047_v15  ;;  %v2207_v26 = vsel %vm1093_vm2, %v5247_v42, %v5243_v31 }
 0x3f9   :  { %v1046_v53 = vadd.f32 %v5205_v6, %v814_v2  ;;  %v99_v2 = vld [vmem:[%s6038_s10 + $0x18] sm:$0xff] }
 0x3fb   :  { %v2822_v52 = vpop.eup %2821  ;;  %v1172_v39 = vpop.permute.xlu0 %1171 }
 0x3fc   :  { %v5295_v32 = vpop.permute.xlu1 %1065  ;;  %v2824_v25 = vpop.eup %2823  ;;  %v1187_v0 = vsel %vm1185_vm3, %v1156_v23, %v1172_v39  ;;  %v1195_v13 = vsel %vm1185_vm3, %v1172_v39, %v1156_v23  ;;  %2648 = vperm.xlu0 %2798, %v2822_v52   ;;  %v1102_v23 = vsel %vm1093_vm2, %v5245_v58, %v5239_v27  ;;  %v756_v52 = vadd.f32 %v740_v47, %v692_v16  ;;  %v6597_v47 = vld [vmem:[#allocation58_spill] sm:$0xff] }
 0x3fd   :  { %v1215_v46 = vmul.f32 %v6594_v38, %v1187_v0  ;;  %v1216_v21 = vmul.f32 %v6595_v48, %v1195_v13  ;;  %1574 = vperm.xlu1 %2797, %v2824_v25   ;;  %v1121_v27 = vmul.f32 %v6587_v40, %v1102_v23  ;;  %v1122_v58 = vmul.f32 %v6588_v36, %v1094_v56  ;;  %v6598_v0 = vld [vmem:[#allocation93_spill] sm:$0xff] }
 0x3fe   :  { %v1045_v16 = vadd.f32 %v5205_v6, %v813_v30  ;;  %v5348_v39 = vadd.f32 %v804_v51, %v756_v52  ;;  %v2199_v25 = vsel %vm1093_vm2, %v5243_v31, %v5247_v42  ;;  %v801_v13 = vmul.f32 %v6598_v0, %v6597_v47  ;;  %v6599_v23 = vld [vmem:[#allocation29_spill] sm:$0xff]  ;;  %v6600_v51 = vld [vmem:[#allocation110_spill] sm:$0xff] }
 0x3ff   :  { %v2826_v7 = vpop.eup %2825  ;;  %v5319_v10 = vadd.f32 %v1215_v46, %v1139_v19  ;;  %v5321_v63 = vadd.f32 %v1216_v21, %v1140_v1  ;;  %v5323_v22 = vpop.permute.xlu0 %2186  ;;  %v802_v19 = vmul.f32 %v6598_v0, %v4994_v44  ;;  %v1138_v46 = vadd.f32 %v1122_v58, %v1046_v53 }
 0x400   :  { %v1154_v61 = vpop.permute.xlu1 %1153  ;;  %v2828_v5 = vpop.eup %2827  ;;  %2653 = vperm.xlu0 %2798, %v2826_v7   ;;  %v1137_v1 = vadd.f32 %v1121_v27, %v1045_v16  ;;  %v2216_v21 = vmul.f32 %v2207_v26, %v6587_v40  ;;  %v819_v56 = vadd.f32 %v803_v3, %v755_v37  ;;  %v2152_v7 = vadd.f32 %v6599_v23, %v5241_v8 }
 0x401   :  { %v5328_v11 = vmul.f32 0.70710677, %v5319_v10  ;;  %v5331_v17 = vmul.f32 0.70710677, %v5321_v63  ;;  %1579 = vperm.xlu1 %2797, %v2828_v5   ;;  %v2217_v4 = vmul.f32 %v2199_v25, %v6588_v36  ;;  %v818_v43 = vadd.f32 %v802_v19, %v754_v45 }
 0x402   :  { %v817_v3 = vadd.f32 %v801_v13, %v753_v29  ;;  %v2153_v16 = vadd.f32 %v6600_v51, %v5241_v8  ;;  %v2198_v47 = vsel %vm1093_vm2, %v5255_v33, %v5273_v49  ;;  %v2206_v0 = vsel %vm1093_vm2, %v5273_v49, %v5255_v33 }
 0x403   :  { %v1364_v15 = vand.u32 2147483647, %v5328_v11  ;;  %v1365_v9 = vand.u32 2147483647, %v5331_v17  ;;  %v2249_v62 = vpop.permute.xlu0 %2248  ;;  %v1096_v13 = vsel %vm1093_vm2, %v5295_v32, %v5253_v35  ;;  %v1104_v19 = vsel %vm1093_vm2, %v5253_v35, %v5295_v32  ;;  %v6602_v32 = vld [vmem:[#allocation73_spill] sm:$0xff] }
 0x404   :  { %v1170_v60 = vpop.permute.xlu1 %1169  ;;  %v1125_v23 = vmul.f32 %v6587_v40, %v1104_v19  ;;  %vm1348_vm5 = vcmp.ge.f32.partialorder %v5328_v11, 0.0  ;;  %vm1349_vm6 = vcmp.ge.f32.partialorder %v5331_v17, 0.0 }
 0x405   :  { %v1186_v50 = vsel %vm1185_vm3, %v1154_v61, %v1170_v60  ;;  %v1194_v20 = vsel %vm1185_vm3, %v1170_v60, %v1154_v61  ;;  %v2830_v57 = vpop.eup %2829  ;;  %1610 = vperm.xlu1 %2797, %v98_v54   ;;  %v1372_v12 = vmul.f32 0.3275911, %v1364_v15  ;;  %v1373_v61 = vmul.f32 0.3275911, %v1365_v9 }
 0x406   :  { %v1213_v31 = vmul.f32 %v6594_v38, %v1186_v50  ;;  %v1214_v42 = vmul.f32 %v6595_v48, %v1194_v20  ;;  %2658 = vperm.xlu0 %2798, %v2830_v57   ;;  %v2232_v54 = vadd.f32 %v2216_v21, %v2152_v7  ;;  %v1492_v26 = vsub.f32 0.0, %v1364_v15 }
 0x407   :  { %v2265_v44 = vpop.permute.xlu0 %2264  ;;  %v5384_v53 = vadd.f32 1.0, %v1372_v12  ;;  %v5389_v25 = vadd.f32 1.0, %v1373_v61  ;;  %v1493_v50 = vsub.f32 0.0, %v1365_v9  ;;  %v2233_v57 = vadd.f32 %v2217_v4, %v2153_v16 }
 0x408   :  { %v5368_v5 = vpop.permute.xlu1 %2170  ;;  %v5373_v30 = vadd.f32 %v1213_v31, %v1137_v1  ;;  %v5375_v52 = vadd.f32 %v1214_v42, %v1138_v46  ;;  %v2279_v27 = vsel %vm1185_vm3, %v2249_v62, %v2265_v44  ;;  %v2287_v58 = vsel %vm1185_vm3, %v2265_v44, %v2249_v62  ;;  %v6601_v62 = vld [vmem:[#allocation64_spill] sm:$0xff] }
 0x409   :  { %v2296_v37 = vmul.f32 %v2279_v27, %v6594_v38  ;;  %1646 = vperm.xlu1 %2797, %v100_v28   ;;  %v2297_v29 = vmul.f32 %v2287_v58, %v6595_v48  ;;  %v2150_v20 = vadd.f32 %v6601_v62, %v5205_v6  ;;  %2831 = vrcp.f32 %v5384_v53 }
 0x40a   :  { %v5387_v60 = vmul.f32 0.70710677, %v5373_v30  ;;  %1615 = vperm.xlu0 %2798, %v99_v2   ;;  %v5392_v45 = vmul.f32 0.70710677, %v5375_v52  ;;  %v1500_v21 = vmul.f32 %v1492_v26, %v1364_v15  ;;  %v2214_v12 = vmul.f32 %v2206_v0, %v6587_v40 }
 0x40b   :  { %v5416_v46 = vadd.f32 %v2296_v37, %v2232_v54  ;;  %v5420_v49 = vadd.f32 %v2297_v29, %v2233_v57  ;;  %v2215_v31 = vmul.f32 %v2198_v47, %v6588_v36  ;;  %2833 = vrcp.f32 %v5389_v25 }
 0x40c   :  { %v2247_v8 = vpop.permute.xlu1 %2246  ;;  %v5414_v1 = vand.u32 2147483647, %v5387_v60  ;;  %v1363_v33 = vand.u32 2147483647, %v5392_v45  ;;  %v1501_v42 = vmul.f32 %v1493_v50, %v1365_v9  ;;  %v2151_v28 = vadd.f32 %v6602_v32, %v5205_v6 }
 0x40d   :  { %v1126_v7 = vmul.f32 %v6588_v36, %v1096_v13  ;;  %v1049_v15 = vadd.f32 %v5219_v24, %v817_v3  ;;  %v1050_v4 = vadd.f32 %v5219_v24, %v818_v43  ;;  %v5433_v44 = vmul.f32 0.70710677, %v5416_v46  ;;  %v5445_v43 = vpop.permute.xlu0 %1083 }
 0x40e   :  { %v1370_v61 = vmul.f32 0.3275911, %v5414_v1  ;;  %v5436_v2 = vadd.f32 %v5229_v41, %v819_v56  ;;  %v1510_v9 = vmul.f32 1.442695, %v1500_v21  ;;  %v1371_v27 = vmul.f32 0.3275911, %v1363_v33 }
 0x40f   :  { %v5439_v6 = vmul.f32 0.70710677, %v5420_v49  ;;  %v5443_v58 = vadd.f32 %v5229_v41, %v5348_v39  ;;  %v2230_v3 = vadd.f32 %v2214_v12, %v2150_v20  ;;  %v2231_v51 = vadd.f32 %v2215_v31, %v2151_v28 }
 0x410   :  { %v2263_v35 = vpop.permute.xlu1 %2262  ;;  %v1512_v24 = vmul.f32 1.442695, %v1501_v42  ;;  %v5451_v56 = vadd.f32 %v1125_v23, %v1049_v15  ;;  %v5453_v37 = vadd.f32 %v1126_v7, %v1050_v4  ;;  %v5456_v54 = vmul.f32 0.5, %v5319_v10 }
 0x411   :  { %v5459_v41 = vmul.f32 0.5, %v5321_v63  ;;  %v5461_v39 = vadd.f32 1.0, %v1370_v61  ;;  %v2443_v26 = vand.u32 2147483647, %v5433_v44  ;;  %2835 = vpow2.f32 %v1510_v9  ;;  %v1174_v11 = vpop.permute.xlu0 %1173 }
 0x412   :  { %v5464_v50 = vadd.f32 1.0, %v1371_v27  ;;  %v2444_v29 = vand.u32 2147483647, %v5439_v6  ;;  %v2278_v62 = vsel %vm1185_vm3, %v2247_v8, %v2263_v35  ;;  %2837 = vpow2.f32 %v1512_v24 }
 0x413   :  { %6603 = vst [vmem:[#allocation95_spill] sm:$0xff] %v5459_v41  ;;  %v5470_v20 = vmul.f32 0.5, %v5373_v30  ;;  %v6256_v57 = vmov -1.0   ;;  %v1490_v0 = vsub.f32 0.0, %v5414_v1  ;;  %v1491_v13 = vsub.f32 0.0, %v1363_v33 }
 0x414   :  { %v5447_v16 = vpop.permute.xlu1 %1067  ;;  %v5475_v63 = vsel %vm1348_vm5, 1.0, %v6256_v57  ;;  %v5480_v47 = vsel %vm1349_vm6, 1.0, %v6256_v57  ;;  %v2286_v19 = vsel %vm1185_vm3, %v2263_v35, %v2247_v8  ;;  %v2294_v30 = vmul.f32 %v2278_v62, %v6594_v38 }
 0x415   :  { %6604 = vst [vmem:[#allocation116_spill] sm:$0xff] %v5470_v20  ;;  %2839 = vrcp.f32 %v5461_v39  ;;  %v2451_v21 = vmul.f32 0.3275911, %v2443_v26  ;;  %v2571_v12 = vsub.f32 0.0, %v2443_v26  ;;  %v2295_v31 = vmul.f32 %v2286_v19, %v6595_v48 }
 0x416   :  { %v5489_v42 = vmul.f32 0.5, %v5375_v52  ;;  %2841 = vrcp.f32 %v5464_v50  ;;  %v2452_v17 = vmul.f32 0.3275911, %v2444_v29  ;;  %v2310_v32 = vadd.f32 %v2294_v30, %v2230_v3  ;;  %v2832_v28 = vpop.eup %2831 }
 0x417   :  { %v2572_v23 = vsub.f32 0.0, %v2444_v29  ;;  %v2200_v8 = vsel %vm1093_vm2, %v5368_v5, %v5323_v22  ;;  %v5496_v35 = vadd.f32 %v2295_v31, %v2231_v51  ;;  %v1498_v52 = vmul.f32 %v1490_v0, %v5414_v1 }
 0x418   :  { %v1158_v10 = vpop.permute.xlu1 %1157  ;;  %6605 = vst [vmem:[#allocation117_spill] sm:$0xff] %v5489_v42  ;;  %v2834_v15 = vpop.eup %2833  ;;  %v1499_v4 = vmul.f32 %v1491_v13, %v1363_v33  ;;  %v2208_v61 = vsel %vm1093_vm2, %v5323_v22, %v5368_v5  ;;  %v5505_v9 = vmul.f32 0.70710677, %v2310_v32  ;;  %v5507_v27 = vadd.f32 1.0, %v2451_v21 }
 0x419   :  { %v1188_v7 = vsel %vm1185_vm3, %v1158_v10, %v1174_v11  ;;  %v2579_v3 = vmul.f32 %v2571_v12, %v2443_v26  ;;  %v5510_v51 = vmul.f32 0.70710677, %v5496_v35  ;;  %v1196_v24 = vsel %vm1185_vm3, %v1174_v11, %v1158_v10  ;;  %v5528_v10 = vpop.permute.xlu0 %2188 }
 0x41a   :  { %v5516_v1 = vadd.f32 1.0, %v2452_v17  ;;  %v5519_v33 = vand.u32 2147483647, %v5505_v9  ;;  %v1217_v22 = vmul.f32 %v6594_v38, %v1188_v7  ;;  %v1218_v5 = vmul.f32 %v6595_v48, %v1196_v24 }
 0x41b   :  { %v1396_v0 = vmul.f32 %v2832_v28, %v5384_v53  ;;  %v1397_v26 = vmul.f32 %v2834_v15, %v5389_v25  ;;  %v2580_v13 = vmul.f32 %v2572_v23, %v2444_v29  ;;  %v5526_v19 = vand.u32 2147483647, %v5510_v51 }
 0x41c   :  { %v5514_v62 = vpop.permute.xlu1 %2172  ;;  %v1506_v30 = vmul.f32 1.442695, %v1498_v52  ;;  %v1508_v21 = vmul.f32 1.442695, %v1499_v4  ;;  %v2218_v12 = vmul.f32 %v2208_v61, %v6587_v40  ;;  %v2449_v11 = vmul.f32 0.3275911, %v5519_v33 }
 0x41d   :  { %2843 = vrcp.f32 %v5507_v27  ;;  %v2589_v31 = vmul.f32 1.442695, %v2579_v3  ;;  %v2219_v17 = vmul.f32 %v2200_v8, %v6588_v36  ;;  %v1097_v53 = vsel %vm1093_vm2, %v5447_v16, %v5445_v43 }
 0x41e   :  { %2845 = vrcp.f32 %v5516_v1  ;;  %v1105_v25 = vsel %vm1093_vm2, %v5445_v43, %v5447_v16  ;;  %v1233_v29 = vadd.f32 %v1217_v22, %v5451_v56  ;;  %v5545_v23 = vadd.f32 %v1218_v5, %v5453_v37  ;;  %v5547_v7 = vpop.eup %2835  ;;  %v2267_v5 = vpop.permute.xlu0 %2266 }
 0x41f   :  { %v1404_v8 = vsub.f32 2.0, %v1396_v0  ;;  %v1405_v52 = vsub.f32 2.0, %v1397_v26  ;;  %v2591_v4 = vmul.f32 1.442695, %v2580_v13  ;;  %v2450_v61 = vmul.f32 0.3275911, %v5526_v19  ;;  %v5550_v24 = vpop.eup %2837 }
 0x420   :  { %v2251_v3 = vpop.permute.xlu1 %2250  ;;  %2847 = vpow2.f32 %v1506_v30  ;;  %v5553_v57 = vmul.f32 0.5, %v5416_v46  ;;  %v5555_v43 = vadd.f32 1.0, %v2449_v11  ;;  %v1128_v16 = vmul.f32 %v6588_v36, %v1097_v53 }
 0x421   :  { %2849 = vpow2.f32 %v1508_v21  ;;  %v5559_v56 = vmul.f32 0.5, %v5420_v49  ;;  %v2234_v37 = vadd.f32 %v2218_v12, %v5223_v55  ;;  %v1127_v22 = vmul.f32 %v6587_v40, %v1105_v25 }
 0x422   :  { %6606 = vst [vmem:[#allocation107_spill] sm:$0xff] %v5553_v57  ;;  %v2840_v0 = vpop.eup %2839  ;;  %2851 = vpow2.f32 %v2589_v31  ;;  %v2235_v26 = vadd.f32 %v2219_v17, %v5227_v34  ;;  %v5564_v13 = vmul.f32 0.70710677, %v1233_v29  ;;  %v5567_v46 = vmul.f32 0.70710677, %v5545_v23 }
 0x423   :  { %6607 = vst [vmem:[#allocation108_spill] sm:$0xff] %v5559_v56  ;;  %v2842_v30 = vpop.eup %2841  ;;  %v5569_v11 = vmul.f32 %v2832_v28, %v1404_v8  ;;  %v5571_v21 = vmul.f32 %v2834_v15, %v1405_v52  ;;  %2853 = vpow2.f32 %v2591_v4  ;;  %v5573_v49 = vadd.f32 1.0, %v2450_v61 }
 0x424   :  { %v5575_v55 = vmul.f32 0.5, %v2310_v32  ;;  %2855 = vrcp.f32 %v5555_v43  ;;  %v1144_v12 = vadd.f32 %v1128_v16, %v5443_v58  ;;  %v1366_v34 = vand.u32 2147483647, %v5564_v13  ;;  %v1160_v53 = vpop.permute.xlu1 %1159 }
 0x425   :  { %v1394_v31 = vmul.f32 %v2840_v0, %v5461_v39  ;;  %v5582_v17 = vmul.f32 0.5, %v5496_v35  ;;  %v2569_v28 = vsub.f32 0.0, %v5519_v33  ;;  %v1143_v15 = vadd.f32 %v1127_v22, %v5436_v2  ;;  %v1176_v35 = vpop.permute.xlu0 %1175 }
 0x426   :  { %6608 = vst [vmem:[#allocation79_spill] sm:$0xff] %v5575_v55  ;;  %v1395_v25 = vmul.f32 %v2842_v30, %v5464_v50  ;;  %v1367_v32 = vand.u32 2147483647, %v5567_v46  ;;  %v2280_v8 = vsel %vm1185_vm3, %v2251_v3, %v2267_v5  ;;  %v2288_v58 = vsel %vm1185_vm3, %v2267_v5, %v2251_v3 }
 0x427   :  { %6609 = vst [vmem:[#allocation81_spill] sm:$0xff] %v5582_v17  ;;  %2857 = vrcp.f32 %v5573_v49  ;;  %v1374_v39 = vmul.f32 0.3275911, %v1366_v34  ;;  %v2298_v52 = vmul.f32 %v2280_v8, %v6594_v38  ;;  %v2299_v4 = vmul.f32 %v2288_v58, %v6595_v48 }
 0x428   :  { %v2570_v2 = vsub.f32 0.0, %v5526_v19  ;;  %v2201_v50 = vsel %vm1093_vm2, %v5514_v62, %v5528_v10  ;;  %v1189_v61 = vsel %vm1185_vm3, %v1160_v53, %v1176_v35  ;;  %v1197_v3 = vsel %vm1185_vm3, %v1176_v35, %v1160_v53 }
 0x429   :  { %v2577_v16 = vmul.f32 %v2569_v28, %v5519_v33  ;;  %v2209_v22 = vsel %vm1093_vm2, %v5528_v10, %v5514_v62  ;;  %v5609_v5 = vadd.f32 %v2298_v52, %v2234_v37  ;;  %v5611_v8 = vadd.f32 %v2299_v4, %v2235_v26 }
 0x42a   :  { %v2844_v58 = vpop.eup %2843  ;;  %v1402_v56 = vsub.f32 2.0, %v1394_v31  ;;  %v1375_v57 = vmul.f32 0.3275911, %v1367_v32  ;;  %v1219_v17 = vmul.f32 %v6594_v38, %v1189_v61  ;;  %v1220_v55 = vmul.f32 %v6595_v48, %v1197_v3 }
 0x42b   :  { %v2846_v42 = vpop.eup %2845  ;;  %v1403_v53 = vsub.f32 2.0, %v1395_v25  ;;  %v5615_v35 = vmul.f32 0.5, %v1233_v29  ;;  %v5617_v33 = vadd.f32 1.0, %v1374_v39  ;;  %v1494_v28 = vsub.f32 0.0, %v1366_v34 }
 0x42c   :  { %v2578_v62 = vmul.f32 %v2570_v2, %v5526_v19  ;;  %v5621_v10 = vmul.f32 0.5, %v5545_v23  ;;  %v5624_v37 = vmul.f32 0.70710677, %v5609_v5  ;;  %v5626_v26 = vadd.f32 %v1219_v17, %v1143_v15 }
 0x42d   :  { %6610 = vst [vmem:[#allocation121_spill] sm:$0xff] %v5615_v35  ;;  %v5628_v31 = vpop.eup %2847  ;;  %v2475_v52 = vmul.f32 %v2844_v58, %v5507_v27  ;;  %v2585_v25 = vmul.f32 1.442695, %v2577_v16  ;;  %v5632_v29 = vmul.f32 0.70710677, %v5611_v8  ;;  %v1236_v39 = vadd.f32 %v1220_v55, %v1144_v12  ;;  %v2253_v16 = vpop.permute.xlu1 %2252 }
 0x42e   :  { %6611 = vst [vmem:[#allocation122_spill] sm:$0xff] %v5621_v10  ;;  %v5634_v4 = vpop.eup %2849  ;;  %v5636_v19 = vmul.f32 %v2840_v0, %v1402_v56  ;;  %v2476_v23 = vmul.f32 %v2846_v42, %v5516_v1  ;;  %v5639_v2 = vadd.f32 1.0, %v1375_v57  ;;  %v1495_v61 = vsub.f32 0.0, %v1367_v32  ;;  %v2269_v35 = vpop.permute.xlu0 %2268 }
 0x42f   :  { %v5641_v17 = vpop.eup %2851  ;;  %2859 = vrcp.f32 %v5617_v33  ;;  %v1502_v15 = vmul.f32 %v1494_v28, %v1366_v34  ;;  %v2220_v27 = vmul.f32 %v2209_v22, %v6587_v40  ;;  %v2221_v3 = vmul.f32 %v2201_v50, %v6588_v36 }
 0x430   :  { %v5646_v55 = vpop.eup %2853  ;;  %v5648_v12 = vmul.f32 %v2842_v30, %v1403_v53  ;;  %v2587_v56 = vmul.f32 1.442695, %v2578_v62  ;;  %v2445_v1 = vand.u32 2147483647, %v5624_v37  ;;  %v5652_v57 = vmul.f32 0.70710677, %v5626_v26 }
 0x431   :  { %6612 = vst [vmem:[#allocation118_spill] sm:$0xff] %v5646_v55  ;;  %v2856_v0 = vpop.eup %2855  ;;  %v2483_v10 = vsub.f32 2.0, %v2475_v52  ;;  %2861 = vpow2.f32 %v2585_v25  ;;  %v2446_v34 = vand.u32 2147483647, %v5632_v29  ;;  %v5655_v40 = vmul.f32 0.70710677, %v1236_v39 }
 0x432   :  { %2863 = vrcp.f32 %v5639_v2  ;;  %v1503_v36 = vmul.f32 %v1495_v61, %v1367_v32  ;;  %v2281_v30 = vsel %vm1185_vm3, %v2253_v16, %v2269_v35  ;;  %v2289_v50 = vsel %vm1185_vm3, %v2269_v35, %v2253_v16 }
 0x433   :  { %v2484_v22 = vsub.f32 2.0, %v2476_v23  ;;  %v1514_v53 = vmul.f32 1.442695, %v1502_v15  ;;  %v2236_v28 = vadd.f32 %v2220_v27, %v5233_v14  ;;  %v2237_v62 = vadd.f32 %v2221_v3, %v5237_v18 }
 0x434   :  { %v5664_v52 = vpop.eup %2857  ;;  %v2473_v25 = vmul.f32 %v2856_v0, %v5555_v43  ;;  %v2453_v20 = vmul.f32 0.3275911, %v2445_v1  ;;  %v2573_v41 = vsub.f32 0.0, %v2445_v1  ;;  %v1368_v32 = vand.u32 2147483647, %v5652_v57 }
 0x435   :  { %v2574_v61 = vsub.f32 0.0, %v2446_v34  ;;  %v1369_v55 = vand.u32 2147483647, %v5655_v40  ;;  %v2300_v59 = vmul.f32 %v2281_v30, %v6594_v38  ;;  %v2301_v35 = vmul.f32 %v2289_v50, %v6595_v48 }
 0x436   :  { %v5671_v23 = vmul.f32 %v2844_v58, %v2483_v10  ;;  %2865 = vpow2.f32 %v2587_v56  ;;  %v1516_v14 = vmul.f32 1.442695, %v1503_v36  ;;  %v2454_v18 = vmul.f32 0.3275911, %v2446_v34 }
 0x437   :  { %v5673_v15 = vmul.f32 %v2846_v42, %v2484_v22  ;;  %v2474_v43 = vmul.f32 %v5664_v52, %v5573_v49  ;;  %v5677_v27 = vadd.f32 %v2300_v59, %v2236_v28  ;;  %v5679_v3 = vadd.f32 %v2301_v35, %v2237_v62 }
 0x438   :  { %v5682_v16 = vmul.f32 0.5, %v5609_v5  ;;  %v5684_v38 = vadd.f32 1.0, %v2453_v20  ;;  %v2581_v48 = vmul.f32 %v2573_v41, %v2445_v1  ;;  %v1376_v58 = vmul.f32 0.3275911, %v1368_v32 }
 0x439   :  { %6613 = vst [vmem:[#allocation13_spill] sm:$0xff] %v5677_v27  ;;  %6614 = vst [vmem:[#allocation18_spill] sm:$0xff] %v5679_v3  ;;  %v2481_v10 = vsub.f32 2.0, %v2473_v25  ;;  %2867 = vpow2.f32 %v1514_v53  ;;  %v2582_v56 = vmul.f32 %v2574_v61, %v2446_v34  ;;  %v1377_v36 = vmul.f32 0.3275911, %v1369_v55 }
 0x43a   :  { %6615 = vst [vmem:[#allocation16_spill] sm:$0xff] %v5682_v16  ;;  %2869 = vpow2.f32 %v1516_v14  ;;  %v5687_v42 = vmul.f32 0.5, %v5611_v8  ;;  %v5689_v49 = vadd.f32 1.0, %v2454_v18  ;;  %v5692_v30 = vmul.f32 0.70710677, %v5677_v27 }
 0x43b   :  { %v2482_v50 = vsub.f32 2.0, %v2474_v43  ;;  %v5695_v5 = vmul.f32 0.5, %v5626_v26  ;;  %v5697_v20 = vmul.f32 0.5, %v1236_v39  ;;  %v5700_v41 = vmul.f32 0.70710677, %v5679_v3 }
 0x43c   :  { %6616 = vst [vmem:[#allocation19_spill] sm:$0xff] %v5687_v42  ;;  %6617 = vst [vmem:[#allocation41_spill] sm:$0xff] %v5692_v30  ;;  %v2860_v1 = vpop.eup %2859  ;;  %2871 = vrcp.f32 %v5684_v38  ;;  %v2593_v34 = vmul.f32 1.442695, %v2581_v48  ;;  %v5703_v8 = vadd.f32 1.0, %v1376_v58  ;;  %v5706_v53 = vmul.f32 %v2856_v0, %v2481_v10 }
 0x43d   :  { %6618 = vst [vmem:[#allocation45_spill] sm:$0xff] %v5695_v5  ;;  %6619 = vst [vmem:[#allocation53_spill] sm:$0xff] %v5697_v20  ;;  %v2447_v22 = vand.u32 2147483647, %v5692_v30  ;;  %v2595_v28 = vmul.f32 1.442695, %v2582_v56  ;;  %2873 = vrcp.f32 %v5689_v49  ;;  %v1398_v14 = vmul.f32 %v2860_v1, %v5617_v33 }
 0x43e   :  { %6620 = vst [vmem:[#allocation49_spill] sm:$0xff] %v5700_v41  ;;  %v5708_v62 = vadd.f32 1.0, %v1377_v36  ;;  %v5711_v26 = vand.u32 2147483647, %v5700_v41  ;;  %v5713_v39 = vpop.eup %2861  ;;  %v1496_v25 = vsub.f32 0.0, %v1368_v32  ;;  %v1497_v0 = vsub.f32 0.0, %v1369_v55 }
 0x43f   :  { %v2455_v61 = vmul.f32 0.3275911, %v2447_v22  ;;  %v1420_v59 = vmul.f32 1.0614054, %v5569_v11  ;;  %v5717_v35 = vpop.eup %2863  ;;  %v1421_v43 = vmul.f32 1.0614054, %v5571_v21  ;;  %2875 = vrcp.f32 %v5703_v8 }
 0x440   :  { %v2456_v18 = vmul.f32 0.3275911, %v5711_v26  ;;  %v1418_v10 = vmul.f32 1.0614054, %v5636_v19  ;;  %2877 = vrcp.f32 %v5708_v62  ;;  %v1419_v3 = vmul.f32 1.0614054, %v5648_v12 }
 0x441   :  { %v5723_v48 = vadd.f32 1.0, %v2455_v61  ;;  %v1428_v58 = vadd.f32 -1.4531521, %v1420_v59  ;;  %v1429_v36 = vadd.f32 -1.4531521, %v1421_v43  ;;  %v1399_v33 = vmul.f32 %v5717_v35, %v5639_v2 }
 0x442   :  { %v5727_v56 = vadd.f32 1.0, %v2456_v18  ;;  %2879 = vpow2.f32 %v2593_v34  ;;  %v1504_v27 = vmul.f32 %v1496_v25, %v1368_v32  ;;  %v5736_v61 = vmul.f32 %v5664_v52, %v2482_v50 }
 0x443   :  { %v1436_v41 = vmul.f32 %v1428_v58, %v5569_v11  ;;  %v5733_v30 = vpop.eup %2865  ;;  %2881 = vpow2.f32 %v2595_v28  ;;  %v1505_v59 = vmul.f32 %v1497_v0, %v1369_v55  ;;  %v1437_v18 = vmul.f32 %v1429_v36, %v5571_v21 }
 0x444   :  { %v1406_v20 = vsub.f32 2.0, %v1398_v14  ;;  %2883 = vrcp.f32 %v5723_v48  ;;  %v1426_v5 = vadd.f32 -1.4531521, %v1418_v10  ;;  %vm1346_vm7 = vcmp.ge.f32.partialorder %v5387_v60, 0.0 }
 0x445   :  { %v1444_v43 = vadd.f32 1.4214138, %v1436_v41  ;;  %2885 = vrcp.f32 %v5727_v56  ;;  %v2575_v2 = vsub.f32 0.0, %v2447_v22  ;;  %v1445_v32 = vadd.f32 1.4214138, %v1437_v18 }
 0x446   :  { %v1427_v34 = vadd.f32 -1.4531521, %v1419_v3  ;;  %v5742_v25 = vpop.eup %2867  ;;  %vm1347_vm8 = vcmp.ge.f32.partialorder %v5392_v45, 0.0  ;;  %v1407_v52 = vsub.f32 2.0, %v1399_v33  ;;  %v1518_v55 = vmul.f32 1.442695, %v1504_v27 }
 0x447   :  { %6621 = vst [vmem:[#allocation66_spill] sm:$0xff] %v5742_v25  ;;  %v1452_v50 = vmul.f32 %v1444_v43, %v5569_v11  ;;  %v1434_v28 = vmul.f32 %v1426_v5, %v5636_v19  ;;  %v5747_v14 = vpop.eup %2869  ;;  %v1520_v41 = vmul.f32 1.442695, %v1505_v59  ;;  %v2576_v0 = vsub.f32 0.0, %v5711_v26 }
 0x448   :  { %6622 = vst [vmem:[#allocation43_spill] sm:$0xff] %v5747_v14  ;;  %v1453_v58 = vmul.f32 %v1445_v32, %v5571_v21  ;;  %v1435_v10 = vmul.f32 %v1427_v34, %v5648_v12  ;;  %v5752_v3 = vmul.f32 %v2860_v1, %v1406_v20  ;;  %v2497_v33 = vmul.f32 1.0614054, %v5706_v53 }
 0x449   :  { %v1460_v36 = vadd.f32 -0.28449672, %v1452_v50  ;;  %v1442_v18 = vadd.f32 1.4214138, %v1434_v28  ;;  %v2872_v27 = vpop.eup %2871  ;;  %v2583_v42 = vmul.f32 %v2575_v2, %v2447_v22  ;;  %v2498_v5 = vmul.f32 1.0614054, %v5736_v61 }
 0x44a   :  { %v1461_v43 = vadd.f32 -0.28449672, %v1453_v58  ;;  %v1443_v16 = vadd.f32 1.4214138, %v1435_v10  ;;  %vm2425_vm9 = vcmp.ge.f32.partialorder %v5505_v9, 0.0  ;;  %2887 = vpow2.f32 %v1518_v55  ;;  %v2874_v20 = vpop.eup %2873 }
 0x44b   :  { %v1468_v59 = vmul.f32 %v1460_v36, %v5569_v11  ;;  %v1450_v32 = vmul.f32 %v1442_v18, %v5636_v19  ;;  %v2505_v34 = vadd.f32 -1.4531521, %v2497_v33  ;;  %v2584_v1 = vmul.f32 %v2576_v0, %v5711_v26 }
 0x44c   :  { %v1469_v50 = vmul.f32 %v1461_v43, %v5571_v21  ;;  %v1451_v28 = vmul.f32 %v1443_v16, %v5648_v12  ;;  %v2506_v22 = vadd.f32 -1.4531521, %v2498_v5  ;;  %vm2426_vm10 = vcmp.ge.f32.partialorder %v5510_v51, 0.0  ;;  %v2876_v36 = vpop.eup %2875 }
 0x44d   :  { %v2477_v2 = vmul.f32 %v2872_v27, %v5684_v38  ;;  %v1476_v58 = vadd.f32 0.2548296, %v1468_v59  ;;  %v1458_v10 = vadd.f32 -0.28449672, %v1450_v32  ;;  %v2513_v55 = vmul.f32 %v2505_v34, %v5706_v53  ;;  %v2878_v0 = vpop.eup %2877 }
 0x44e   :  { %v5766_v18 = vmul.f32 %v5717_v35, %v1407_v52  ;;  %2889 = vpow2.f32 %v1520_v41  ;;  %v2597_v33 = vmul.f32 1.442695, %v2583_v42  ;;  %v2514_v26 = vmul.f32 %v2506_v22, %v5736_v61 }
 0x44f   :  { %v2478_v16 = vmul.f32 %v2874_v20, %v5689_v49  ;;  %v1477_v43 = vadd.f32 0.2548296, %v1469_v50  ;;  %v1459_v5 = vadd.f32 -0.28449672, %v1451_v28  ;;  %v2521_v14 = vadd.f32 1.4214138, %v2513_v55  ;;  %v5770_v25 = vpop.eup %2879 }
 0x450   :  { %vm2427_vm11 = vcmp.ge.f32.partialorder %v5433_v44, 0.0  ;;  %v2599_v38 = vmul.f32 1.442695, %v2584_v1  ;;  %v1484_v59 = vmul.f32 %v1476_v58, %v5569_v11  ;;  %v1466_v35 = vmul.f32 %v1458_v10, %v5636_v19  ;;  %v5775_v41 = vpop.eup %2881 }
 0x451   :  { %v2522_v52 = vadd.f32 1.4214138, %v2514_v26  ;;  %6623 = vst [vmem:[#allocation40_spill] sm:$0xff] %v5775_v41  ;;  %vm2428_vm12 = vcmp.ge.f32.partialorder %v5439_v6, 0.0  ;;  %v2485_v42 = vsub.f32 2.0, %v2477_v2  ;;  %v1400_v49 = vmul.f32 %v2876_v36, %v5703_v8  ;;  %v2884_v1 = vpop.eup %2883 }
 0x452   :  { %v6624_v32 = vmov -1.0   ;;  %v2529_v50 = vmul.f32 %v2521_v14, %v5706_v53  ;;  %v1401_v11 = vmul.f32 %v2878_v0, %v5708_v62  ;;  %2891 = vpow2.f32 %v2597_v33  ;;  %v2886_v2 = vpop.eup %2885 }
 0x453   :  { %v5782_v34 = vsel %vm1346_vm7, 1.0, %v6624_v32  ;;  %v5789_v28 = vsel %vm1347_vm8, 1.0, %v6624_v32  ;;  %v2530_v22 = vmul.f32 %v2522_v52, %v5736_v61  ;;  %v2486_v8 = vsub.f32 2.0, %v2478_v16 }
 0x454   :  { %v1485_v58 = vmul.f32 %v1477_v43, %v5571_v21  ;;  %v1467_v60 = vmul.f32 %v1459_v5, %v5648_v12  ;;  %v2537_v10 = vadd.f32 -0.28449672, %v2529_v50  ;;  %2893 = vpow2.f32 %v2599_v38 }
 0x455   :  { %v1524_v14 = vmul.f32 %v5547_v7, %v1484_v59  ;;  %v1474_v55 = vadd.f32 0.2548296, %v1466_v35  ;;  %v2538_v62 = vadd.f32 -0.28449672, %v2530_v22  ;;  %v5795_v33 = vmul.f32 %v2872_v27, %v2485_v42 }
 0x456   :  { %v1408_v26 = vsub.f32 2.0, %v1400_v49  ;;  %v2479_v45 = vmul.f32 %v2884_v1, %v5723_v48  ;;  %v2545_v41 = vmul.f32 %v2537_v10, %v5706_v53  ;;  %v1409_v52 = vsub.f32 2.0, %v1401_v11 }
 0x457   :  { %v2480_v16 = vmul.f32 %v2886_v2, %v5727_v56  ;;  %v5803_v21 = vsel %vm2425_vm9, 1.0, %v6624_v32  ;;  %v2546_v43 = vmul.f32 %v2538_v62, %v5736_v61  ;;  %v5806_v7 = vmul.f32 %v2874_v20, %v2486_v8  ;;  %v5810_v48 = vpop.eup %2887 }
 0x458   :  { %v1525_v27 = vmul.f32 %v5550_v24, %v1485_v58  ;;  %v1475_v5 = vadd.f32 0.2548296, %v1467_v60  ;;  %v2499_v38 = vmul.f32 1.0614054, %v5671_v23  ;;  %v1532_v59 = vsub.f32 1.0, %v1524_v14 }
 0x459   :  { %v1482_v35 = vmul.f32 %v1474_v55, %v5636_v19  ;;  %v5816_v9 = vsel %vm2426_vm10, 1.0, %v6624_v32  ;;  %v2500_v56 = vmul.f32 1.0614054, %v5673_v15  ;;  %v5819_v42 = vmul.f32 %v2876_v36, %v1408_v26 }
 0x45a   :  { %v2487_v20 = vsub.f32 2.0, %v2479_v45  ;;  %v2553_v49 = vadd.f32 0.2548296, %v2545_v41  ;;  %v2507_v24 = vadd.f32 -1.4531521, %v2499_v38  ;;  %v5821_v50 = vmul.f32 %v2878_v0, %v1409_v52 }
 0x45b   :  { %v2488_v11 = vsub.f32 2.0, %v2480_v16  ;;  %v2554_v22 = vadd.f32 0.2548296, %v2546_v43  ;;  %v2508_v8 = vadd.f32 -1.4531521, %v2500_v56  ;;  %v5823_v58 = vpop.eup %2889  ;;  %v1533_v19 = vsub.f32 1.0, %v1525_v27 }
 0x45c   :  { %v1483_v60 = vmul.f32 %v1475_v5, %v5648_v12  ;;  %v5829_v51 = vsel %vm2427_vm11, 1.0, %v6624_v32  ;;  %v2515_v36 = vmul.f32 %v2507_v24, %v5671_v23  ;;  %v1540_v41 = vmul.f32 %v1532_v59, %v5475_v63 }
 0x45d   :  { %v1522_v0 = vmul.f32 %v5628_v31, %v1482_v35  ;;  %v5837_v10 = vsel %vm2428_vm12, 1.0, %v6624_v32  ;;  %v2516_v14 = vmul.f32 %v2508_v8, %v5673_v15  ;;  %v5840_v55 = vmul.f32 %v2884_v1, %v2487_v20 }
 0x45e   :  { %v2561_v12 = vmul.f32 %v2553_v49, %v5706_v53  ;;  %v2523_v44 = vadd.f32 1.4214138, %v2515_v36  ;;  %v1422_v62 = vmul.f32 1.0614054, %v5752_v3  ;;  %v5844_v26 = vmul.f32 %v2886_v2, %v2488_v11 }
 0x45f   :  { %v2562_v63 = vmul.f32 %v2554_v22, %v5736_v61  ;;  %v2524_v45 = vadd.f32 1.4214138, %v2516_v14  ;;  %v1423_v31 = vmul.f32 1.0614054, %v5766_v18  ;;  %v5848_v52 = vpop.eup %2891  ;;  %v1541_v6 = vmul.f32 %v1533_v19, %v5480_v47 }
 0x460   :  { %v1523_v16 = vmul.f32 %v5634_v4, %v1483_v60  ;;  %v2531_v1 = vmul.f32 %v2523_v44, %v5671_v23  ;;  %v1430_v43 = vadd.f32 -1.4531521, %v1422_v62  ;;  %v1548_v53 = vadd.f32 1.0, %v1540_v41 }
 0x461   :  { %v1530_v27 = vsub.f32 1.0, %v1522_v0  ;;  %v2532_v5 = vmul.f32 %v2524_v45, %v5673_v15  ;;  %v1431_v2 = vadd.f32 -1.4531521, %v1423_v31  ;;  %v5854_v38 = vpop.eup %2893  ;;  %v2601_v61 = vmul.f32 %v5713_v39, %v2561_v12 }
 0x462   :  { %v2539_v59 = vadd.f32 -0.28449672, %v2531_v1  ;;  %v1438_v35 = vmul.f32 %v1430_v43, %v5752_v3  ;;  %v2501_v56 = vmul.f32 1.0614054, %v5795_v33  ;;  %vm1350_vm13 = vcmp.ge.f32.partialorder %v5564_v13, 0.0  ;;  %v5875_v1 = vpop.permute.xlu1 %1605 }
 0x463   :  { %vm1351_vm14 = vcmp.ge.f32.partialorder %v5567_v46, 0.0  ;;  %v2602_v47 = vmul.f32 %v5733_v30, %v2562_v63  ;;  %v2540_v4 = vadd.f32 -0.28449672, %v2532_v5  ;;  %v1439_v20 = vmul.f32 %v1431_v2, %v5766_v18 }
 0x464   :  { %v2502_v49 = vmul.f32 1.0614054, %v5806_v7  ;;  %v1531_v24 = vsub.f32 1.0, %v1523_v16  ;;  %v2547_v11 = vmul.f32 %v2539_v59, %v5671_v23  ;;  %v1446_v39 = vadd.f32 1.4214138, %v1438_v35 }
 0x465   :  { %v2509_v22 = vadd.f32 -1.4531521, %v2501_v56  ;;  %v1538_v8 = vmul.f32 %v1530_v27, %v5782_v34  ;;  %v2548_v19 = vmul.f32 %v2540_v4, %v5673_v15  ;;  %v1447_v60 = vadd.f32 1.4214138, %v1439_v20  ;;  %v6625_v56 = vld [vmem:[#allocation118_spill] sm:$0xff] }
 0x466   :  { %v2510_v36 = vadd.f32 -1.4531521, %v2502_v49  ;;  %vm2429_vm15 = vcmp.ge.f32.partialorder %v5624_v37, 0.0  ;;  %vm2430_vm0 = vcmp.ge.f32.partialorder %v5632_v29, 0.0  ;;  %v2609_v30 = vsub.f32 1.0, %v2601_v61 }
 0x467   :  { %v2555_v41 = vadd.f32 0.2548296, %v2547_v11  ;;  %v1454_v0 = vmul.f32 %v1446_v39, %v5752_v3  ;;  %v2517_v14 = vmul.f32 %v2509_v22, %v5795_v33  ;;  %v2610_v12 = vsub.f32 1.0, %v2602_v47 }
 0x468   :  { %v2556_v44 = vadd.f32 0.2548296, %v2548_v19  ;;  %v1455_v62 = vmul.f32 %v1447_v60, %v5766_v18  ;;  %v2518_v34 = vmul.f32 %v2510_v36, %v5806_v7  ;;  %v1549_v63 = vadd.f32 1.0, %v1541_v6 }
 0x469   :  { %v1539_v45 = vmul.f32 %v1531_v24, %v5789_v28  ;;  %v2563_v31 = vmul.f32 %v2555_v41, %v5671_v23  ;;  %v1462_v16 = vadd.f32 -0.28449672, %v1454_v0  ;;  %v2525_v5 = vadd.f32 1.4214138, %v2517_v14  ;;  %v6626_v24 = vld [vmem:[#allocation95_spill] sm:$0xff] }
 0x46a   :  { %v2564_v43 = vmul.f32 %v2556_v44, %v5673_v15  ;;  %v1463_v27 = vadd.f32 -0.28449672, %v1455_v62  ;;  %v2526_v2 = vadd.f32 1.4214138, %v2518_v34  ;;  %v5879_v61 = vmul.f32 %v1548_v53, %v5456_v54  ;;  %v5889_v53 = vpop.permute.xlu0 %1600 }
 0x46b   :  { %v1546_v59 = vadd.f32 1.0, %v1538_v8  ;;  %v2617_v35 = vmul.f32 %v2609_v30, %v5803_v21  ;;  %v2603_v6 = vmul.f32 %v5641_v17, %v2563_v31  ;;  %v2618_v28 = vmul.f32 %v2610_v12, %v5816_v9  ;;  %v6628_v12 = vld [vmem:[#allocation117_spill] sm:$0xff] }
 0x46c   :  { %v2604_v23 = vmul.f32 %v6625_v56, %v2564_v43  ;;  %v1470_v47 = vmul.f32 %v1462_v16, %v5752_v3  ;;  %v1471_v4 = vmul.f32 %v1463_v27, %v5766_v18  ;;  %v1547_v15 = vadd.f32 1.0, %v1539_v45  ;;  %v6629_v16 = vld [vmem:[#allocation57_spill] sm:$0xff]  ;;  %v6630_v27 = vld [vmem:[#allocation36_spill] sm:$0xff] }
 0x46d   :  { %v2611_v20 = vsub.f32 1.0, %v2603_v6  ;;  %v1424_v49 = vmul.f32 1.0614054, %v5819_v42  ;;  %v1425_v54 = vmul.f32 1.0614054, %v5821_v50  ;;  %v5892_v21 = vmul.f32 %v1549_v63, %v6626_v24 }
 0x46e   :  { %v2612_v11 = vsub.f32 1.0, %v2604_v23  ;;  %v2533_v9 = vmul.f32 %v2525_v5, %v5795_v33  ;;  %v2534_v39 = vmul.f32 %v2526_v2, %v5806_v7  ;;  %v2625_v22 = vadd.f32 1.0, %v2617_v35  ;;  %v6631_v35 = vld [vmem:[#allocation79_spill] sm:$0xff] }
 0x46f   :  { %v1565_v17 = vpop.permute.xlu1 %1564  ;;  %v2619_v8 = vmul.f32 %v2611_v20, %v5829_v51  ;;  %v5900_v19 = vsel %vm1350_vm13, 1.0, %v6624_v32  ;;  %v5905_v60 = vsel %vm1351_vm14, 1.0, %v6624_v32  ;;  %v2626_v36 = vadd.f32 1.0, %v2618_v28  ;;  %v6627_v51 = vld [vmem:[#allocation116_spill] sm:$0xff]  ;;  %v6632_v28 = vld [vmem:[#allocation81_spill] sm:$0xff] }
 0x470   :  { %v2620_v30 = vmul.f32 %v2612_v11, %v5837_v10  ;;  %v1478_v41 = vadd.f32 0.2548296, %v1470_v47  ;;  %v1479_v0 = vadd.f32 0.2548296, %v1471_v4  ;;  %vm1352_vm1 = vcmp.ge.f32.partialorder %v5652_v57, 0.0  ;;  %v1570_v34 = vpop.permute.xlu0 %1569  ;;  %v6633_v47 = vld [vmem:[#allocation103_spill] sm:$0xff] }
 0x471   :  { %vm1353_vm2 = vcmp.ge.f32.partialorder %v5655_v40, 0.0  ;;  %v1554_v14 = vmul.f32 %v1546_v59, %v6627_v51  ;;  %v1555_v13 = vmul.f32 %v1547_v15, %v6628_v12  ;;  %v1432_v44 = vadd.f32 -1.4531521, %v1424_v49  ;;  %v6634_v4 = vld [vmem:[#allocation105_spill] sm:$0xff]  ;;  %v6640_v12 = vld [vmem:[#allocation24_spill] sm:$0xff] }
 0x472   :  { %v1433_v62 = vadd.f32 -1.4531521, %v1425_v54  ;;  %v5915_v46 = vsel %vm2429_vm15, 1.0, %v6624_v32  ;;  %v5920_v10 = vsel %vm2430_vm0, 1.0, %v6624_v32  ;;  %v2541_v45 = vadd.f32 -0.28449672, %v2533_v9 }
 0x473   :  { %v2644_v63 = vpop.permute.xlu1 %2643  ;;  %v2542_v31 = vadd.f32 -0.28449672, %v2534_v39  ;;  %v2627_v2 = vadd.f32 1.0, %v2619_v8  ;;  %v2628_v59 = vadd.f32 1.0, %v2620_v30  ;;  %v2633_v6 = vmul.f32 %v2625_v22, %v6631_v35  ;;  %v6635_v22 = vld [vmem:[#allocation107_spill] sm:$0xff] }
 0x474   :  { %v2661_v43 = vmul.f32 %v2644_v63, %v6629_v16  ;;  %v2662_v5 = vmul.f32 %v2644_v63, %v6630_v27  ;;  %v2634_v56 = vmul.f32 %v2626_v36, %v6632_v28  ;;  %v1486_v37 = vmul.f32 %v1478_v41, %v5752_v3  ;;  %v6636_v3 = vld [vmem:[#allocation108_spill] sm:$0xff]  ;;  %v6642_v16 = vld [vmem:[#allocation43_spill] sm:$0xff] }
 0x475   :  { %v1487_v23 = vmul.f32 %v1479_v0, %v5766_v18  ;;  %v1582_v29 = vmul.f32 %v1565_v17, %v6633_v47  ;;  %v1583_v15 = vmul.f32 %v1565_v17, %v6634_v4  ;;  %v1440_v20 = vmul.f32 %v1432_v44, %v5819_v42  ;;  %v6637_v18 = vld [vmem:[#allocation90_spill] sm:$0xff]  ;;  %v6638_v41 = vld [vmem:[#allocation32_spill] sm:$0xff]  ;;  %v6639_v17 = vld [vmem:[#allocation75_spill] sm:$0xff] }
 0x476   :  { %v1441_v49 = vmul.f32 %v1433_v62, %v5821_v50  ;;  %v2669_v54 = vmul.f32 %v2661_v43, %v2633_v6  ;;  %v2670_v24 = vmul.f32 %v2662_v5, %v2634_v56  ;;  %v2549_v9 = vmul.f32 %v2541_v45, %v5795_v33  ;;  %v6641_v62 = vld [vmem:[#allocation66_spill] sm:$0xff] }
 0x477   :  { %v2649_v11 = vpop.permute.xlu0 %2648  ;;  %v2550_v39 = vmul.f32 %v2542_v31, %v5806_v7  ;;  %v2635_v8 = vmul.f32 %v2627_v2, %v6635_v22  ;;  %v2636_v36 = vmul.f32 %v2628_v59, %v6636_v3  ;;  %v1584_v51 = vmul.f32 %v1570_v34, %v6639_v17 }
 0x478   :  { %v2663_v30 = vmul.f32 %v2649_v11, %v6637_v18  ;;  %v2664_v0 = vmul.f32 %v2649_v11, %v6638_v41  ;;  %v1585_v44 = vmul.f32 %v1570_v34, %v6640_v12  ;;  %v1526_v63 = vmul.f32 %v6641_v62, %v1486_v37  ;;  %v1575_v35 = vpop.permute.xlu1 %1574 }
 0x479   :  { %v1527_v43 = vmul.f32 %v6642_v16, %v1487_v23  ;;  %v2557_v5 = vadd.f32 0.2548296, %v2549_v9  ;;  %v2558_v31 = vadd.f32 0.2548296, %v2550_v39  ;;  %v2677_v2 = vmul.f32 %v2669_v54, %v5889_v53  ;;  %v6643_v9 = vld [vmem:[#allocation40_spill] sm:$0xff] }
 0x47a   :  { %v2671_v27 = vmul.f32 %v2663_v30, %v2635_v8  ;;  %v2672_v45 = vmul.f32 %v2664_v0, %v2636_v36  ;;  %v2678_v59 = vmul.f32 %v2670_v24, %v5889_v53  ;;  %v1448_v6 = vadd.f32 1.4214138, %v1440_v20 }
 0x47b   :  { %v1449_v28 = vadd.f32 1.4214138, %v1441_v49  ;;  %v2565_v34 = vmul.f32 %v2557_v5, %v5795_v33  ;;  %v2566_v37 = vmul.f32 %v2558_v31, %v5806_v7  ;;  %v1534_v23 = vsub.f32 1.0, %v1526_v63  ;;  %v2654_v36 = vpop.permute.xlu0 %2653  ;;  %v6647_v31 = vld [vmem:[#allocation19_spill] sm:$0xff] }
 0x47c   :  { %v2679_v56 = vmul.f32 %v2671_v27, %v5875_v1  ;;  %v2680_v47 = vmul.f32 %v2672_v45, %v5875_v1  ;;  %v1535_v4 = vsub.f32 1.0, %v1527_v43  ;;  %v5951_v11 = vsel %vm1352_vm1, 1.0, %v6624_v32  ;;  %v1580_v17 = vpop.permute.xlu1 %1579  ;;  %v6646_v45 = vld [vmem:[#allocation16_spill] sm:$0xff] }
 0x47d   :  { %v5956_v20 = vsel %vm1353_vm2, 1.0, %v6624_v32  ;;  %v2605_v24 = vmul.f32 %v5770_v25, %v2565_v34  ;;  %v2606_v33 = vmul.f32 %v6643_v9, %v2566_v37  ;;  %v1590_v39 = vmul.f32 %v1582_v29, %v1554_v14  ;;  %v6648_v9 = vld [vmem:[#allocation71_spill] sm:$0xff] }
 0x47e   :  { %v2685_v49 = vadd.f32 %v2679_v56, %v2677_v2  ;;  %v2694_v54 = vadd.f32 %v2680_v47, %v2678_v59  ;;  %v1591_v7 = vmul.f32 %v1583_v15, %v1555_v13  ;;  %v1456_v22 = vmul.f32 %v1448_v6, %v5819_v42  ;;  %v6644_v15 = vld [vmem:[#allocation115_spill] sm:$0xff] }
 0x47f   :  { %v1457_v8 = vmul.f32 %v1449_v28, %v5821_v50  ;;  %v1592_v57 = vmul.f32 %v1584_v51, %v5879_v61  ;;  %v1593_v3 = vmul.f32 %v1585_v44, %v5892_v21  ;;  %v2613_v40 = vsub.f32 1.0, %v2605_v24  ;;  %v6645_v51 = vld [vmem:[#allocation112_spill] sm:$0xff] }
 0x480   :  { %v2614_v18 = vsub.f32 1.0, %v2606_v33  ;;  %v1542_v30 = vmul.f32 %v1534_v23, %v5900_v19  ;;  %v1543_v41 = vmul.f32 %v1535_v4, %v5905_v60  ;;  %v1464_v25 = vadd.f32 -0.28449672, %v1456_v22  ;;  %v1611_v37 = vpop.permute.xlu1 %1610 }
 0x481   :  { %v1465_v0 = vadd.f32 -0.28449672, %v1457_v8  ;;  %v2621_v14 = vmul.f32 %v2613_v40, %v5915_v46  ;;  %v2503_v29 = vmul.f32 1.0614054, %v5840_v55  ;;  %v2504_v61 = vmul.f32 1.0614054, %v5844_v26 }
 0x482   :  { %v2622_v13 = vmul.f32 %v2614_v18, %v5920_v10  ;;  %v2665_v21 = vmul.f32 %v2654_v36, %v6644_v15  ;;  %v2666_v12 = vmul.f32 %v2654_v36, %v6645_v51  ;;  %v1472_v44 = vmul.f32 %v1464_v25, %v5819_v42 }
 0x483   :  { %v1473_v19 = vmul.f32 %v1465_v0, %v5821_v50  ;;  %v2629_v60 = vadd.f32 1.0, %v2621_v14  ;;  %v2511_v63 = vadd.f32 -1.4531521, %v2503_v29  ;;  %v2512_v16 = vadd.f32 -1.4531521, %v2504_v61 }
 0x484   :  { %v2630_v62 = vadd.f32 1.0, %v2622_v13  ;;  %v1618_v46 = vmul.f32 %v5889_v53, %v1590_v39  ;;  %v1619_v10 = vmul.f32 %v5889_v53, %v1591_v7  ;;  %v1480_v43 = vadd.f32 0.2548296, %v1472_v44  ;;  %v6649_v39 = vld [vmem:[#allocation31_spill] sm:$0xff]  ;;  %v2659_v13 = vpop.permute.xlu0 %2658 }
 0x485   :  { %v1481_v27 = vadd.f32 0.2548296, %v1473_v19  ;;  %v2637_v5 = vmul.f32 %v2629_v60, %v6646_v45  ;;  %v2519_v59 = vmul.f32 %v2511_v63, %v5840_v55  ;;  %v2520_v6 = vmul.f32 %v2512_v16, %v5844_v26  ;;  %v6654_v45 = vld [vmem:[#allocation45_spill] sm:$0xff] }
 0x486   :  { %v2638_v2 = vmul.f32 %v2630_v62, %v6647_v31  ;;  %v1550_v28 = vadd.f32 1.0, %v1542_v30  ;;  %v1551_v56 = vadd.f32 1.0, %v1543_v41  ;;  %v1488_v47 = vmul.f32 %v1480_v43, %v5819_v42  ;;  %v6651_v41 = vld [vmem:[#allocation122_spill] sm:$0xff]  ;;  %v6656_v31 = vld [vmem:[#allocation41_spill] sm:$0xff] }
 0x487   :  { %v1489_v34 = vmul.f32 %v1481_v27, %v5821_v50  ;;  %v2673_v23 = vmul.f32 %v2665_v21, %v2637_v5  ;;  %v2527_v53 = vadd.f32 1.4214138, %v2519_v59  ;;  %v2528_v24 = vadd.f32 1.4214138, %v2520_v6  ;;  %v6650_v50 = vld [vmem:[#allocation121_spill] sm:$0xff] }
 0x488   :  { %v2674_v4 = vmul.f32 %v2666_v12, %v2638_v2  ;;  %v1586_v33 = vmul.f32 %v1575_v35, %v6648_v9  ;;  %v1587_v7 = vmul.f32 %v1575_v35, %v6649_v39  ;;  %v1528_v22 = vmul.f32 %v5810_v48, %v1488_v47 }
 0x489   :  { %v1529_v8 = vmul.f32 %v5823_v58, %v1489_v34  ;;  %v2535_v36 = vmul.f32 %v2527_v53, %v5840_v55  ;;  %v2536_v40 = vmul.f32 %v2528_v24, %v5844_v26  ;;  %v2681_v42 = vmul.f32 %v2673_v23, %v1611_v37 }
 0x48a   :  { %v2682_v18 = vmul.f32 %v2674_v4, %v1611_v37  ;;  %v1558_v30 = vmul.f32 %v1550_v28, %v6650_v50  ;;  %v1559_v25 = vmul.f32 %v1551_v56, %v6651_v41  ;;  %v1536_v0 = vsub.f32 1.0, %v1528_v22  ;;  %v1616_v28 = vpop.permute.xlu0 %1615 }
 0x48b   :  { %v1537_v14 = vsub.f32 1.0, %v1529_v8  ;;  %v2543_v29 = vadd.f32 -0.28449672, %v2535_v36  ;;  %v2544_v61 = vadd.f32 -0.28449672, %v2536_v40  ;;  %v5990_v35 = vadd.f32 %v2685_v49, %v2681_v42  ;;  %v6652_v49 = vld [vmem:[#allocation96_spill] sm:$0xff] }
 0x48c   :  { %v5992_v48 = vadd.f32 %v2694_v54, %v2682_v18  ;;  %v1620_v58 = vmul.f32 %v5875_v1, %v1592_v57  ;;  %v1621_v15 = vmul.f32 %v5875_v1, %v1593_v3  ;;  %v1544_v21 = vmul.f32 %v1536_v0, %v5951_v11  ;;  %v6653_v54 = vld [vmem:[#allocation23_spill] sm:$0xff]  ;;  %v6655_v3 = vld [vmem:[#allocation53_spill] sm:$0xff]  ;;  %v6659_v40 = vld [vmem:[#allocation18_spill] sm:$0xff] }
 0x48d   :  { %v1545_v51 = vmul.f32 %v1537_v14, %v5956_v20  ;;  %v1594_v12 = vmul.f32 %v1586_v33, %v1558_v30  ;;  %v1595_v44 = vmul.f32 %v1587_v7, %v1559_v25  ;;  %v2551_v19 = vmul.f32 %v2543_v29, %v5840_v55  ;;  %v6658_v8 = vld [vmem:[#allocation13_spill] sm:$0xff]  ;;  %v6660_v30 = vld [vmem:[#allocation114_spill] sm:$0xff] }
 0x48e   :  { %v2552_v60 = vmul.f32 %v2544_v61, %v5844_v26  ;;  %v1552_v62 = vadd.f32 1.0, %v1544_v21  ;;  %v1588_v16 = vmul.f32 %v1580_v17, %v6652_v49  ;;  %v1589_v43 = vmul.f32 %v1580_v17, %v6653_v54  ;;  %v6657_v17 = vld [vmem:[#allocation49_spill] sm:$0xff]  ;;  %v6661_v25 = vld [vmem:[#allocation106_spill] sm:$0xff] }
 0x48f   :  { %v1553_v63 = vadd.f32 1.0, %v1545_v51  ;;  %v2559_v27 = vadd.f32 0.2548296, %v2551_v19  ;;  %v1622_v5 = vmul.f32 %v1611_v37, %v1594_v12  ;;  %v1623_v20 = vmul.f32 %v1611_v37, %v1595_v44 }
 0x490   :  { %v2560_v57 = vadd.f32 0.2548296, %v2552_v60  ;;  %v1560_v1 = vmul.f32 %v1552_v62, %v6654_v45  ;;  %vm2431_vm3 = vcmp.ge.f32.partialorder %v6656_v31, 0.0  ;;  %v1626_v2 = vadd.f32 %v1620_v58, %v1618_v46  ;;  %v6662_v45 = vld [vmem:[#allocation6_spill] sm:$0xff] }
 0x491   :  { %v1561_v11 = vmul.f32 %v1553_v63, %v6655_v3  ;;  %v2567_v59 = vmul.f32 %v2559_v27, %v5840_v55  ;;  %v1635_v56 = vadd.f32 %v1621_v15, %v1619_v10  ;;  %vm2432_vm4 = vcmp.ge.f32.partialorder %v6657_v17, 0.0  ;;  %v2901_v19 = vld.sshfl [vmem:[%s6028_s0] sm:$0x33 pattern:$0x76325410]  ;;  %v1647_v63 = vpop.permute.xlu1 %1646 }
 0x492   :  { %v2568_v6 = vmul.f32 %v2560_v57, %v5844_v26  ;;  %v1596_v47 = vmul.f32 %v1588_v16, %v1560_v1  ;;  %v1627_v37 = vadd.f32 %v1626_v2, %v1622_v5  ;;  %v2439_v46 = vsel %vm2431_vm3, 1.0, %v6624_v32 }
 0x493   :  { %v1597_v34 = vmul.f32 %v1589_v43, %v1561_v11  ;;  %v2607_v23 = vmul.f32 %v5848_v52, %v2567_v59  ;;  %v1636_v9 = vadd.f32 %v1635_v56, %v1623_v20  ;;  %v2440_v26 = vsel %vm2432_vm4, 1.0, %v6624_v32 }
 0x494   :  { %v2608_v4 = vmul.f32 %v5854_v38, %v2568_v6  ;;  %v1624_v53 = vmul.f32 %v1616_v28, %v1596_v47  ;;  %v2415_v36 = vmul.f32 0.5, %v6658_v8  ;;  %v2416_v52 = vmul.f32 0.5, %v6659_v40 }
 0x495   :  { %v1625_v24 = vmul.f32 %v1616_v28, %v1597_v34  ;;  %v2615_v33 = vsub.f32 1.0, %v2607_v23  ;;  %v2667_v41 = vmul.f32 %v2659_v13, %v6660_v30  ;;  %v2668_v0 = vmul.f32 %v2659_v13, %v6661_v25 }
 0x496   :  { %v2616_v55 = vsub.f32 1.0, %v2608_v4  ;;  %v1628_v39 = vadd.f32 %v1627_v37, %v1624_v53  ;;  %v1662_v57 = vcombine.high %v2901_v19, %v2901_v19  ;;  %v1652_v1 = vrot.slane %v1647_v63, %v6662_v45 }
 0x497   :  { %v1637_v10 = vadd.f32 %v1636_v9, %v1625_v24  ;;  %v2623_v7 = vmul.f32 %v2615_v33, %v2439_v46 }
 0x498   :  { %v2624_v22 = vmul.f32 %v2616_v55, %v2440_v26  ;;  %v1629_v42 = vrot.slane %v1628_v39, 4 }
 0x499   :  { %v1638_v38 = vrot.slane %v1637_v10, 4  ;;  %v2631_v18 = vadd.f32 1.0, %v2623_v7 }
 0x49a   :  { %v2632_v50 = vadd.f32 1.0, %v2624_v22  ;;  %v1630_v14 = vadd.f32 %v1629_v42, %v1628_v39 }
 0x49b   :  { %v1639_v29 = vadd.f32 %v1638_v38, %v1637_v10  ;;  %v2639_v61 = vmul.f32 %v2631_v18, %v2415_v36 }
 0x49c   :  { %v2640_v32 = vmul.f32 %v2632_v50, %v2416_v52  ;;  %v1631_v58 = vrot.slane %v1630_v14, 2 }
 0x49d   :  { %v1640_v15 = vrot.slane %v1639_v29, 2  ;;  %v2675_v21 = vmul.f32 %v2667_v41, %v2639_v61 }
 0x49e   :  { %v2676_v51 = vmul.f32 %v2668_v0, %v2640_v32  ;;  %v1632_v12 = vadd.f32 %v1631_v58, %v1630_v14 }
 0x49f   :  { %v1641_v44 = vadd.f32 %v1640_v15, %v1639_v29  ;;  %v2683_v60 = vmul.f32 %v2675_v21, %v1616_v28 }
 0x4a0   :  { %v2684_v62 = vmul.f32 %v2676_v51, %v1616_v28  ;;  %v1633_v49 = vrot.slane %v1632_v12, 1 }
 0x4a1   :  { %v1642_v16 = vrot.slane %v1641_v44, 1  ;;  %v2687_v13 = vadd.f32 %v5990_v35, %v2683_v60 }
 0x4a2   :  { %v2696_v54 = vadd.f32 %v5992_v48, %v2684_v62  ;;  %v1634_v43 = vadd.f32 %v1633_v49, %v1632_v12  ;;  %v2902_v48 = vld.sshfl [vmem:[%s6028_s0 + $0x4] sm:$0x33 pattern:$0x76325410] }
 0x4a3   :  { %v1643_v27 = vadd.f32 %v1642_v16, %v1641_v44  ;;  %v2688_v3 = vrot.slane %v2687_v13, 4  ;;  %v2712_v24 = vcombine.high %v2902_v48, %v2902_v48 }
 0x4a4   :  { %v2697_v11 = vrot.slane %v2696_v54, 4  ;;  %v1653_v5 = vadd.f32 %v1652_v1, %v1634_v43 }
 0x4a5   :  { %v1654_v20 = vadd.f32 %v1652_v1, %v1643_v27  ;;  %v2689_v31 = vadd.f32 %v2688_v3, %v2687_v13 }
 0x4a6   :  { %v2698_v2 = vadd.f32 %v2697_v11, %v2696_v54  ;;  %v1665_v59 = vadd.f32 %v2901_v19, %v1653_v5 }
 0x4a7   :  { %v1666_v6 = vadd.f32 %v1662_v57, %v1654_v20  ;;  %v2690_v28 = vrot.slane %v2689_v31, 2 }
 0x4a8   :  { %v2699_v56 = vrot.slane %v2698_v2, 2 }
 0x4a9   :  { %v1669_v47 = vcombine.low %v1665_v59, %v1666_v6  ;;  %v2691_v34 = vadd.f32 %v2690_v28, %v2689_v31 }
 0x4aa   :  { %v2700_v35 = vadd.f32 %v2699_v56, %v2698_v2 }
 0x4ab   :  { %2749 = vst.sshfl [vmem:[#allocation3] sm:$0x33 pattern:$0x76325410] %v1669_v47  ;;  %v2692_v17 = vrot.slane %v2691_v34, 1 }
 0x4ac   :  { %v2701_v23 = vrot.slane %v2700_v35, 1 }
 0x4ad   :  { %v2693_v4 = vadd.f32 %v2692_v17, %v2691_v34 }
 0x4ae   :  { %v2702_v53 = vadd.f32 %v2701_v23, %v2700_v35 }
 0x4af   :  { %v2703_v37 = vadd.f32 %v2693_v4, %v1652_v1 }
 0x4b0   :  { %v2704_v9 = vadd.f32 %v2702_v53, %v1652_v1 }
 0x4b1   :  { %v2715_v46 = vadd.f32 %v2902_v48, %v2703_v37 }
 0x4b2   :  { %v2716_v33 = vadd.f32 %v2712_v24, %v2704_v9 }
 0x4b4   :  { %v2719_v55 = vcombine.low %v2715_v46, %v2716_v33 }
 0x4b6   :  { %2751 = vst.sshfl [vmem:[#allocation3 + $0x4] sm:$0x33 pattern:$0x76325410] %v2719_v55 }
 0x4b7   :  { %2914 = shalt.err (!%p2911_p4)
}
 0x4b8   :  { %s2940_s0 = smov 64   ;;  %s2941_s8 = smov 4  }
 0x4b9   :  { %2741 = dma.vmem_to_hbm [thread:$0]  %s2736_s3, 128, %s6040_s12, [#allocation4], %s2940_s0, %s2940_s0, %s2941_s8  }
 0x4ba   :  { %2923 = dma.done.wait [#allocation4], 128  }
 0x4bb   :  { %2924 = vsyncadd [#allocation4], 4294967168 }
 0x4bc   :  { %2745 = vsyncpa [#allocation4], 1 }

</bundles_post_ra>
